<compile_context>
chip_gen: v5e
topology: v5e:2x2
jax: 0.10.0
libtpu: 0.0.40
codegen_flags: <defaults>
</compile_context>

<pallas_src>
import functools

import jax
import jax.numpy as jnp
from jax.experimental import pallas as pl
from jax.experimental.pallas import tpu as pltpu

LEAKY_SLOPE = 0.01          # nn.LeakyReLU() default
BN_EPS = 1e-5               # nn.BatchNorm2d default
LANE = 128                  # TPU lane width: channel padding target


def _round_up(x, m):
    return (x + m - 1) // m * m


@functools.lru_cache(maxsize=None)
def _tpu_vmem_bytes():
    get_info = getattr(pltpu, "get_tpu_info", None)
    if get_info is not None:
        try:
            cap = getattr(get_info(), "vmem_capacity_bytes", None)
            if cap:
                return int(cap)
        except Exception:
            pass
    return 64 * 1024 * 1024     # conservative (v7x per-core VMEM)


def _vmem_limit():
    return min(int(_tpu_vmem_bytes() * 3 // 4), 112 * 1024 * 1024)


def _pick_cin_tile(cin_p, cout_p):
    """Largest LANE-multiple divisor of Cin_p whose double-buffered 3x3 weight
    block stays well inside VMEM (keeps v7x feasible at AdaBins channel
    counts)."""
    limit = max(_tpu_vmem_bytes() // 4, 8 << 20)
    best = LANE
    d = LANE
    while d <= cin_p:
        if cin_p % d == 0 and 2 * 9 * d * cout_p * 2 <= limit:
            best = d
        d += LANE
    return best


def _pick_row_tile(n, h, w, tk, cout_p, n_k):
    """Largest divisor of H (subject to the (8,128) alignment rule on the
    flattened row blocks) whose per-step double-buffered footprint fits a
    generation-aware VMEM budget; prefers tilings giving the parallel grid
    >= 2 steps so both v7x TensorCores stay busy."""
    wp = w + 2
    budget = int(_tpu_vmem_bytes() * 0.7)
    budget -= 2 * 9 * tk * cout_p * 2          # resident double-buffered weights
    budget -= 2 << 20                          # fixed headroom

    def fits(th):
        l = th * wp
        per = 0
        per += 2 * l * tk * 2                  # main input block (x2 buffers)
        per += 2 * 2 * wp * tk * 2             # halo row blocks
        per += 2 * l * cout_p * 2              # output block
        per += 2 * 2 * cout_p * 4              # packed stats block
        per += ((th + 2) * wp + 8) * tk * 2    # staging scratch
        per += l * cout_p * 4 * (3 if n_k > 1 else 2)   # acc scratch + SSA acc
        return per <= budget

    cands = [t for t in range(1, h + 1)
             if h % t == 0 and (t == h or (t * wp) % 8 == 0)]
    good = [t for t in cands if fits(t)]
    pool = good if good else cands[:1]
    both_tc = [t for t in pool if n * (h // t) >= 2]
    pool = both_tc if both_tc else pool
    return max(pool)


def _col_masks(th, w):
    """Column masks for the flat W-halo-padded row layout (period W+2).
    mask_in : 1 on data columns [1, W], 0 on the two pad columns.
    mask_out: 1 on the W valid accumulator columns [0, W), 0 on the 2 seams."""
    wp = w + 2
    l = th * wp
    col = jnp.arange(l, dtype=jnp.int32) % wp
    mask_in = ((col >= 1) & (col <= w)).astype(jnp.float32).reshape(l, 1)
    mask_out = (col < w).astype(jnp.float32).reshape(l, 1)
    return mask_in, mask_out


# -----------------------------------------------------------------------------
# Pallas kernel: Conv2d(3x3, stride=1, pad=1)  [+ fused previous-stage BN
# affine + LeakyReLU on the input]  + per-tile partial BN batch statistics.
# -----------------------------------------------------------------------------
def _conv3x3_bn_stats_kernel(mask_in_ref, mask_out_ref, scale_ref, shift_ref,
                             xm_ref, xt_ref, xb_ref, w_ref,
                             y_ref, stat_ref, v_ref, *acc_scratch,
                             apply_preact, th, w, n_k):
    # mask_in/out : (L, 1) f32        column masks (L = TH*(W+2))
    # scale/shift : (1, tk) f32       previous-stage BN affine (stage 2 only)
    # xm          : (1, L, tk) bf16   main rows, flat W-halo-padded layout
    # xt, xb      : (1, 1, WP, tk)    1-row halos (index clamped at edges)
    # w           : (3, 3, tk, Cout)  HWIO conv weights (bf16)
    # y           : (1, L, Cout) bf16 conv output, same flat padded layout
    # stat        : (1, 1, 2, Cout)   f32 [sum, sum-of-squares] over valid px
    # v           : VMEM ((TH+2)*WP + 8, tk) bf16  staged halo'd window
    # acc         : VMEM (L, Cout) f32 accumulator (only when n_k > 1)
    wp = w + 2
    L = th * wp
    tk = v_ref.shape[-1]
    cout_p = y_ref.shape[-1]
    i = pl.program_id(1)
    n_row = pl.num_programs(1)
    k = pl.program_id(2)

    def load(val, m):
        # Stage 2 fuses the previous stage's BatchNorm affine + LeakyReLU here;
        # `m` re-zeroes the conv zero-pad columns (the affine shift would
        # otherwise make them nonzero).
        if not apply_preact:
            return val
        a = val.astype(jnp.float32) * scale_ref[0] + shift_ref[0]
        a = jnp.where(a >= 0, a, LEAKY_SLOPE * a)
        return (a * m).astype(v_ref.dtype)

    # ---- stage the (TH+2, WP) halo'd window into the flat VMEM scratch ----
    # TODO(synk): for stage 1 (no pre-activation) this is a pure VMEM->VMEM
    # copy; a manual-DMA (memory_space=pl.ANY) variant could land the main rows
    # directly in v_ref, or the upsample/concat producer could be fused here.
    v_ref[wp:wp + L, :] = load(xm_ref[0],
                               mask_in_ref[...] if apply_preact else None)
    halo_mask = mask_in_ref[0:wp, :] if apply_preact else None

    @pl.when(i > 0)
    def _():
        v_ref[0:wp, :] = load(xt_ref[0, 0], halo_mask)

    @pl.when(i == 0)
    def _():
        v_ref[0:wp, :] = jnp.zeros((wp, tk), v_ref.dtype)

    @pl.when(i < n_row - 1)
    def _():
        v_ref[wp + L:wp + L + wp, :] = load(xb_ref[0, 0], halo_mask)

    @pl.when(i == n_row - 1)
    def _():
        v_ref[wp + L:wp + L + wp, :] = jnp.zeros((wp, tk), v_ref.dtype)

    v_ref[(th + 2) * wp:, :] = jnp.zeros((8, tk), v_ref.dtype)   # slack tail

    # ---- 3x3 conv: 9 contiguous flat-slice bf16 MXU matmuls, summed in SSA.
    # Each accumulator row spans all WP columns; the 2 seam columns per row are
    # junk and get masked below.  Conv bias omitted (cancels under batch-stat
    # BatchNorm).
    total = None
    for dy in range(3):
        for dx in range(3):
            s0 = dy * wp + dx
            patch = v_ref[s0:s0 + L, :]                  # contiguous flat slice
            d = jnp.dot(patch, w_ref[dy, dx],
                        preferred_element_type=jnp.float32)
            total = d if total is None else total + d

    def emit(y_flat):
        # Mask the junk seam columns, then shift by one flat position so data
        # col x lands at padded col x+1 of the W-halo-padded output layout;
        # the masked junk becomes the zero pad columns.
        ym = y_flat * mask_out_ref[...]
        shifted = jnp.concatenate(
            [jnp.zeros((1, cout_p), ym.dtype), ym[:L - 1, :]], axis=0)
        y_ref[0] = shifted.astype(y_ref.dtype)
        # Partial BN statistics in f32 from the f32 accumulator (pre-cast).
        stat_ref[0, 0, 0:1, :] = jnp.sum(ym, axis=0, keepdims=True)
        stat_ref[0, 0, 1:2, :] = jnp.sum(ym * ym, axis=0, keepdims=True)

    if n_k == 1:
        emit(total)
    else:
        acc_ref = acc_scratch[0]

        @pl.when(k == 0)
        def _():
            acc_ref[...] = total

        @pl.when((k > 0) & (k < n_k - 1))
        def _():
            acc_ref[...] += total

        @pl.when(k == n_k - 1)
        def _():
            emit(acc_ref[...] + total)


def _conv3x3_stage(x_flat, x_4d, w_p, mask_in, mask_out, pre_scale, pre_shift,
                   *, apply_preact, th, tk):
    """One conv stage.  x_flat: (N, H*(W+2), Cin_p) bf16 (W-halo-padded flat
    layout); x_4d: the same buffer viewed as (N, H, W+2, Cin_p) for the 1-row
    halo fetches."""
    n, h, wp, cin_p = x_4d.shape
    w = wp - 2
    l = th * wp
    n_row = h // th
    n_k = cin_p // tk
    cout_p = w_p.shape[-1]

    kernel = functools.partial(_conv3x3_bn_stats_kernel,
                               apply_preact=apply_preact, th=th, w=w, n_k=n_k)
    scratch = [pltpu.VMEM(((th + 2) * wp + 8, tk), jnp.bfloat16)]
    if n_k > 1:
        scratch.append(pltpu.VMEM((l, cout_p), jnp.float32))

    # TODO(synk): with a recent-enough Pallas, pipeline_mode=pl.Buffered(1) on
    # the constant-index inputs (masks, scale/shift, weights when n_k == 1)
    # would reclaim their second VMEM buffer; omitted here for compile safety.
    return pl.pallas_call(
        kernel,
        out_shape=(
            jax.ShapeDtypeStruct((n, h * wp, cout_p), jnp.bfloat16),
            jax.ShapeDtypeStruct((n, n_row, 2, cout_p), jnp.float32),
        ),
        grid=(n, n_row, n_k),
        in_specs=[
            pl.BlockSpec((l, 1), lambda b, i, k: (0, 0)),        # mask_in
            pl.BlockSpec((l, 1), lambda b, i, k: (0, 0)),        # mask_out
            pl.BlockSpec((1, tk), lambda b, i, k: (0, k)),       # pre_scale
            pl.BlockSpec((1, tk), lambda b, i, k: (0, k)),       # pre_shift
            # main TH rows of this tile (flat layout)
            pl.BlockSpec((1, l, tk), lambda b, i, k: (b, i, k)),
            # 1-row halos above / below (4-D view; clamped at image edges,
            # zeroed in-kernel there)
            pl.BlockSpec((1, 1, wp, tk),
                         lambda b, i, k: (b, jnp.maximum(i * th - 1, 0), 0, k)),
            pl.BlockSpec((1, 1, wp, tk),
                         lambda b, i, k: (b, jnp.minimum(i * th + th, h - 1), 0, k)),
            pl.BlockSpec((3, 3, tk, cout_p), lambda b, i, k: (0, 0, k, 0)),
        ],
        out_specs=(
            pl.BlockSpec((1, l, cout_p), lambda b, i, k: (b, i, 0)),
            pl.BlockSpec((1, 1, 2, cout_p), lambda b, i, k: (b, i, 0, 0)),
        ),
        scratch_shapes=scratch,
        compiler_params=pltpu.CompilerParams(
            dimension_semantics=("parallel", "parallel", "arbitrary"),
            vmem_limit_bytes=_vmem_limit()),
    )(mask_in, mask_out, pre_scale, pre_shift, x_flat, x_4d, x_4d, w_p)


# -----------------------------------------------------------------------------
# Pallas kernel: final BatchNorm affine + LeakyReLU (lane-dense elementwise)
# -----------------------------------------------------------------------------
def _affine_lrelu_kernel(x_ref, sc_ref, sh_ref, o_ref):
    a = x_ref[0].astype(jnp.float32) * sc_ref[0] + sh_ref[0]
    o_ref[0] = jnp.where(a >= 0, a, LEAKY_SLOPE * a).astype(o_ref.dtype)


def _affine_lrelu(y_flat, scale, shift, *, th, wp, out_dtype=jnp.float32):
    n, hl, c = y_flat.shape
    l = th * wp
    n_row = hl // l
    return pl.pallas_call(
        _affine_lrelu_kernel,
        out_shape=jax.ShapeDtypeStruct((n, hl, c), out_dtype),
        grid=(n, n_row),
        in_specs=[
            pl.BlockSpec((1, l, c), lambda b, i: (b, i, 0)),
            pl.BlockSpec((1, c), lambda b, i: (0, 0)),
            pl.BlockSpec((1, c), lambda b, i: (0, 0)),
        ],
        out_specs=pl.BlockSpec((1, l, c), lambda b, i: (b, i, 0)),
        compiler_params=pltpu.CompilerParams(
            dimension_semantics=("parallel", "parallel"),
            vmem_limit_bytes=_vmem_limit()),
    )(y_flat, scale, shift)


# -----------------------------------------------------------------------------
# Wrapper glue
# -----------------------------------------------------------------------------
def _bn_scale_shift(stats, gamma, beta, count, c_pad):
    """Fold the per-tile [sum, sumsq] partials into the training-mode BatchNorm
    affine: y_norm = y * scale + shift, biased variance E[y^2] - E[y]^2."""
    g = jnp.zeros((c_pad,), jnp.float32).at[:gamma.shape[0]].set(
        gamma.astype(jnp.float32))
    b = jnp.zeros((c_pad,), jnp.float32).at[:beta.shape[0]].set(
        beta.astype(jnp.float32))
    total = stats[:, :, 0, :].sum(axis=(0, 1))
    total_sq = stats[:, :, 1, :].sum(axis=(0, 1))
    mean = total / count
    var = jnp.maximum(total_sq / count - mean * mean, 0.0)
    scale = g * jax.lax.rsqrt(var + BN_EPS)
    shift = b - mean * scale
    return scale.reshape(1, -1), shift.reshape(1, -1)


def _interp_matrix(out_size, in_size):
    """M[o, i] so that out = M @ in == F.interpolate(..., 'bilinear',
    align_corners=True) along one axis."""
    o = jnp.arange(out_size, dtype=jnp.float32)
    scale = (in_size - 1) / max(out_size - 1, 1)
    src = o * scale
    i0 = jnp.clip(jnp.floor(src).astype(jnp.int32), 0, in_size - 1)
    i1 = jnp.clip(i0 + 1, 0, in_size - 1)
    frac = src - i0.astype(jnp.float32)
    M = jnp.zeros((out_size, in_size), jnp.float32)
    M = M.at[jnp.arange(out_size), i0].add(1.0 - frac)
    M = M.at[jnp.arange(out_size), i1].add(frac)
    return M


def upsample_bn_forward(x_nchw, concat_nchw, params, row_tile=None):
    """Equivalent of UpSampleBN.forward(x, concat_with). NCHW in, NCHW out."""
    n, c_x, hi, wi = x_nchw.shape
    _, c_skip, h, w = concat_nchw.shape
    cin, cout = c_x + c_skip, params['w1'].shape[-1]
    cin_p, cout_p = _round_up(cin, LANE), _round_up(cout, LANE)
    wp = w + 2

    tk1 = _pick_cin_tile(cin_p, cout_p)
    tk2 = _pick_cin_tile(cout_p, cout_p)
    if row_tile is None:
        row_tile = _pick_row_tile(n, h, w, max(tk1, tk2), cout_p,
                                  max(cin_p // tk1, cout_p // tk2))
    th = row_tile
    assert h % th == 0 and (th == h or (th * wp) % 8 == 0), (th, h, wp)

    # --- XLA glue: NHWC, bilinear upsample (align_corners=True), concat ---
    # TODO(synk): a production caller should feed NHWC directly and split w1
    # into its up_x / skip halves so the concatenated tensor never hits HBM.
    x_nhwc = jnp.transpose(x_nchw, (0, 2, 3, 1))
    c_nhwc = jnp.transpose(concat_nchw, (0, 2, 3, 1))
    up = jnp.einsum('nhwc,Hh,Ww->nHWc', x_nhwc,
                    _interp_matrix(h, hi), _interp_matrix(w, wi))
    f4 = jnp.concatenate([up.astype(jnp.bfloat16),
                          c_nhwc.astype(jnp.bfloat16)], axis=-1)
    # Single bf16 materialization with the W-halo zero pad + lane-dense
    # (multiple-of-128) channel pad fused in.
    f4 = jnp.pad(f4, ((0, 0), (0, 0), (1, 1), (0, cin_p - cin)))
    f_flat = f4.reshape(n, h * wp, cin_p)          # free reshape (same buffer)

    w1 = jnp.pad(params['w1'], ((0, 0), (0, 0), (0, cin_p - cin),
                                (0, cout_p - cout))).astype(jnp.bfloat16)
    w2 = jnp.pad(params['w2'], ((0, 0), (0, 0), (0, cout_p - cout),
                                (0, cout_p - cout))).astype(jnp.bfloat16)

    mask_in, mask_out = _col_masks(th, w)
    dummy_aff = jnp.zeros((1, cin_p), jnp.float32)

    # --- stage 1: Conv3x3 + partial BN stats (Pallas) ---
    y1, st1 = _conv3x3_stage(f_flat, f4, w1, mask_in, mask_out,
                             dummy_aff, dummy_aff,
                             apply_preact=False, th=th, tk=tk1)
    scale1, shift1 = _bn_scale_shift(st1, params['g1'], params['be1'],
                                     n * h * w, cout_p)

    # --- stage 2: fused (BN1 + LeakyReLU) pre-activation + Conv3x3 + stats ---
    y1_4d = y1.reshape(n, h, wp, cout_p)           # free view for halo fetches
    y2, st2 = _conv3x3_stage(y1, y1_4d, w2, mask_in, mask_out,
                             scale1, shift1,
                             apply_preact=True, th=th, tk=tk2)
    scale2, shift2 = _bn_scale_shift(st2, params['g2'], params['be2'],
                                     n * h * w, cout_p)

    # --- final BN2 + LeakyReLU (lane-dense elementwise Pallas kernel) ---
    out_flat = _affine_lrelu(y2, scale2, shift2, th=th, wp=wp)
    out = out_flat.reshape(n, h, wp, cout_p)[:, :, 1:w + 1, :cout]
    return jnp.transpose(out, (0, 3, 1, 2))


# -----------------------------------------------------------------------------
# Pure-JAX reference (training-mode BatchNorm, biased variance)
# -----------------------------------------------------------------------------
def _reference(x, concat_with, params):
    _, _, hi, wi = x.shape
    _, _, h, w = concat_with.shape
    up = jnp.einsum('nchw,Hh,Ww->ncHW', x,
                    _interp_matrix(h, hi), _interp_matrix(w, wi))
    f = jnp.concatenate([up, concat_with], axis=1)

    def conv(z, wgt):
        return jax.lax.conv_general_dilated(
            z, wgt, (1, 1), 'SAME',
            dimension_numbers=('NCHW', 'HWIO', 'NCHW'))

    def bn_lrelu(z, g, b):
        mean = z.mean(axis=(0, 2, 3), keepdims=True)
        var = z.var(axis=(0, 2, 3), keepdims=True)
        zn = (z - mean) * jax.lax.rsqrt(var + BN_EPS)
        zn = zn * g.reshape(1, -1, 1, 1) + b.reshape(1, -1, 1, 1)
        return jnp.where(zn >= 0, zn, LEAKY_SLOPE * zn)

    y = bn_lrelu(conv(f, params['w1']), params['g1'], params['be1'])
    y = bn_lrelu(conv(y, params['w2']), params['g2'], params['be2'])
    return y


if __name__ == "__main__":
    key = jax.random.PRNGKey(0)
    kx, kc, kw1, kg1, kb1, kw2, kg2, kb2 = jax.random.split(key, 8)

    # Small shapes consistent with the module:
    #   x: (2, 4, 8, 8), concat_with: (2, 4, 16, 16)
    #   => skip_input = 8, output_features = 8
    n, c_x, c_skip = 2, 4, 4
    skip_input, output_features = c_x + c_skip, 8
    hi = wi = 8
    ho = wo = 16

    x = jax.random.normal(kx, (n, c_x, hi, wi), jnp.float32)
    concat_with = jax.random.normal(kc, (n, c_skip, ho, wo), jnp.float32)

    # Synthetic parameters (HWIO conv weights; conv bias omitted because it
    # cancels exactly under training-mode BatchNorm).
    params = dict(
        w1=jax.random.normal(kw1, (3, 3, skip_input, output_features),
                             jnp.float32) * 0.1,
        g1=jax.random.uniform(kg1, (output_features,), jnp.float32, 0.5, 1.5),
        be1=jax.random.normal(kb1, (output_features,), jnp.float32) * 0.1,
        w2=jax.random.normal(kw2, (3, 3, output_features, output_features),
                             jnp.float32) * 0.1,
        g2=jax.random.uniform(kg2, (output_features,), jnp.float32, 0.5, 1.5),
        be2=jax.random.normal(kb2, (output_features,), jnp.float32) * 0.1,
    )

    # row_tile=8 -> two row tiles per image so the halo / cross-tile BN-stat
    # path is exercised at runtime (the auto-picker would otherwise pick H).
    fwd = jax.jit(functools.partial(upsample_bn_forward, row_tile=8))
    out = fwd(x, concat_with, params)
    jax.block_until_ready(out)
    assert out.shape == (n, output_features, ho, wo), out.shape
    assert bool(jnp.all(jnp.isfinite(out)))

    # Numerical sanity vs. a pure-JAX f32 reference (kernel uses bf16 matmuls
    # with f32 accumulation, so tolerance is loose).
    ref = _reference(x, concat_with, params)
    err = float(jnp.max(jnp.abs(out.astype(jnp.float32) - ref)))
    assert err < 0.25, f"max abs err vs reference: {err}"
    print("KERNEL_OK")
</pallas_src>

<mosaic_0001>
module attributes {stable_mosaic.version = 11 : i64} {
  func.func @_conv3x3_bn_stats_kernel(%arg0: i32, %arg1: i32, %arg2: i32, %arg3: memref<144x1xf32, #tpu.memory_space<vmem>>, %arg4: memref<144x1xf32, #tpu.memory_space<vmem>>, %arg5: memref<1x128xf32, #tpu.memory_space<vmem>>, %arg6: memref<1x128xf32, #tpu.memory_space<vmem>>, %arg7: memref<1x144x128xbf16, #tpu.memory_space<vmem>>, %arg8: memref<1x1x18x128xbf16, #tpu.memory_space<vmem>>, %arg9: memref<1x1x18x128xbf16, #tpu.memory_space<vmem>>, %arg10: memref<3x3x128x128xbf16, #tpu.memory_space<vmem>>, %arg11: memref<1x144x128xbf16, #tpu.memory_space<vmem>>, %arg12: memref<1x1x2x128xf32, #tpu.memory_space<vmem>>, %arg13: memref<188x128xbf16, #tpu.memory_space<vmem>>) attributes {dimension_semantics = [#tpu.dimension_semantics<parallel>, #tpu.dimension_semantics<parallel>, #tpu.dimension_semantics<arbitrary>], iteration_bounds = array<i64: 2, 2, 1>, scalar_prefetch = 0 : i64, scratch_operands = 1 : i64, tpu.core_type = #tpu.core_type<tc>, window_params = [{pipeline_mode = #tpu.pipeline_mode<synchronous>, transform_indices = @transform_0, window_bounds = array<i64: 144, 1>}, {pipeline_mode = #tpu.pipeline_mode<synchronous>, transform_indices = @transform_1, window_bounds = array<i64: 144, 1>}, {transform_indices = @transform_2, window_bounds = array<i64: 1, 128>}, {transform_indices = @transform_3, window_bounds = array<i64: 1, 128>}, {transform_indices = @transform_4, window_bounds = array<i64: 1, 144, 128>}, {transform_indices = @transform_5, window_bounds = array<i64: 1, 1, 18, 128>}, {transform_indices = @transform_6, window_bounds = array<i64: 1, 1, 18, 128>}, {transform_indices = @transform_7, window_bounds = array<i64: 3, 3, 128, 128>}, {transform_indices = @transform_8, window_bounds = array<i64: 1, 144, 128>}, {transform_indices = @transform_9, window_bounds = array<i64: 1, 1, 2, 128>}]} {
    %c0 = arith.constant 0 : index
    %c0_0 = arith.constant 0 : index
    %c0_1 = arith.constant 0 : index
    %0 = vector.load %arg7[%c0, %c0_0, %c0_1] : memref<1x144x128xbf16, #tpu.memory_space<vmem>>, vector<1x144x128xbf16>
    %1 = vector.shape_cast %0 : vector<1x144x128xbf16> to vector<144x128xbf16>
    %c18 = arith.constant 18 : index
    %c0_2 = arith.constant 0 : index
    %2 = vector.load %arg13[%c18, %c0_2] : memref<188x128xbf16, #tpu.memory_space<vmem>>, vector<144x128xbf16>
    tpu.vector_store %arg13[%c18, %c0_2], %1 {strides = array<i32>} : memref<188x128xbf16, #tpu.memory_space<vmem>>, vector<144x128xbf16>,
    %c0_i32 = arith.constant 0 : i32
    %3 = arith.cmpi sgt, %arg1, %c0_i32 : i32
    %4 = arith.extui %3 : i1 to i32
    %c0_i32_3 = arith.constant 0 : i32
    %5 = arith.cmpi ne, %4, %c0_i32_3 : i32
    scf.if %5 {
      %c0_82 = arith.constant 0 : index
      %c0_83 = arith.constant 0 : index
      %c0_84 = arith.constant 0 : index
      %c0_85 = arith.constant 0 : index
      %82 = vector.load %arg8[%c0_82, %c0_83, %c0_84, %c0_85] : memref<1x1x18x128xbf16, #tpu.memory_space<vmem>>, vector<1x1x18x128xbf16>
      %83 = vector.shape_cast %82 : vector<1x1x18x128xbf16> to vector<18x128xbf16>
      %c0_86 = arith.constant 0 : index
      %c0_87 = arith.constant 0 : index
      %84 = vector.load %arg13[%c0_86, %c0_87] : memref<188x128xbf16, #tpu.memory_space<vmem>>, vector<18x128xbf16>
      tpu.vector_store %arg13[%c0_86, %c0_87], %83 {strides = array<i32>} : memref<188x128xbf16, #tpu.memory_space<vmem>>, vector<18x128xbf16>,
    } else {
    }
    %c0_i32_4 = arith.constant 0 : i32
    %6 = arith.cmpi eq, %arg1, %c0_i32_4 : i32
    %7 = arith.extui %6 : i1 to i32
    %c0_i32_5 = arith.constant 0 : i32
    %8 = arith.cmpi ne, %7, %c0_i32_5 : i32
    scf.if %8 {
      %cst_82 = arith.constant 0.000000e+00 : bf16
      %82 = vector.broadcast %cst_82 : bf16 to vector<18x128xbf16>
      %c0_83 = arith.constant 0 : index
      %c0_84 = arith.constant 0 : index
      %83 = vector.load %arg13[%c0_83, %c0_84] : memref<188x128xbf16, #tpu.memory_space<vmem>>, vector<18x128xbf16>
      tpu.vector_store %arg13[%c0_83, %c0_84], %82 {strides = array<i32>} : memref<188x128xbf16, #tpu.memory_space<vmem>>, vector<18x128xbf16>,
    } else {
    }
    %c1_i32 = arith.constant 1 : i32
    %9 = arith.cmpi slt, %arg1, %c1_i32 : i32
    %10 = arith.extui %9 : i1 to i32
    %c0_i32_6 = arith.constant 0 : i32
    %11 = arith.cmpi ne, %10, %c0_i32_6 : i32
    scf.if %11 {
      %c0_82 = arith.constant 0 : index
      %c0_83 = arith.constant 0 : index
      %c0_84 = arith.constant 0 : index
      %c0_85 = arith.constant 0 : index
      %82 = vector.load %arg9[%c0_82, %c0_83, %c0_84, %c0_85] : memref<1x1x18x128xbf16, #tpu.memory_space<vmem>>, vector<1x1x18x128xbf16>
      %83 = vector.shape_cast %82 : vector<1x1x18x128xbf16> to vector<18x128xbf16>
      %c162 = arith.constant 162 : index
      %c0_86 = arith.constant 0 : index
      %84 = vector.load %arg13[%c162, %c0_86] : memref<188x128xbf16, #tpu.memory_space<vmem>>, vector<18x128xbf16>
      tpu.vector_store %arg13[%c162, %c0_86], %83 {strides = array<i32>} : memref<188x128xbf16, #tpu.memory_space<vmem>>, vector<18x128xbf16>,
    } else {
    }
    %c1_i32_7 = arith.constant 1 : i32
    %12 = arith.cmpi eq, %arg1, %c1_i32_7 : i32
    %13 = arith.extui %12 : i1 to i32
    %c0_i32_8 = arith.constant 0 : i32
    %14 = arith.cmpi ne, %13, %c0_i32_8 : i32
    scf.if %14 {
      %cst_82 = arith.constant 0.000000e+00 : bf16
      %82 = vector.broadcast %cst_82 : bf16 to vector<18x128xbf16>
      %c162 = arith.constant 162 : index
      %c0_83 = arith.constant 0 : index
      %83 = vector.load %arg13[%c162, %c0_83] : memref<188x128xbf16, #tpu.memory_space<vmem>>, vector<18x128xbf16>
      tpu.vector_store %arg13[%c162, %c0_83], %82 {strides = array<i32>} : memref<188x128xbf16, #tpu.memory_space<vmem>>, vector<18x128xbf16>,
    } else {
    }
    %cst = arith.constant 0.000000e+00 : bf16
    %15 = vector.broadcast %cst : bf16 to vector<8x128xbf16>
    %c180 = arith.constant 180 : index
    %c0_9 = arith.constant 0 : index
    %16 = vector.load %arg13[%c180, %c0_9] : memref<188x128xbf16, #tpu.memory_space<vmem>>, vector<8x128xbf16>
    tpu.vector_store %arg13[%c180, %c0_9], %15 {strides = array<i32>} : memref<188x128xbf16, #tpu.memory_space<vmem>>, vector<8x128xbf16>,
    %c0_10 = arith.constant 0 : index
    %c0_11 = arith.constant 0 : index
    %17 = vector.load %arg13[%c0_10, %c0_11] : memref<188x128xbf16, #tpu.memory_space<vmem>>, vector<144x128xbf16>
    %c0_12 = arith.constant 0 : index
    %c0_13 = arith.constant 0 : index
    %c0_14 = arith.constant 0 : index
    %c0_15 = arith.constant 0 : index
    %18 = vector.load %arg10[%c0_12, %c0_13, %c0_14, %c0_15] : memref<3x3x128x128xbf16, #tpu.memory_space<vmem>>, vector<1x1x128x128xbf16>
    %19 = vector.shape_cast %18 : vector<1x1x128x128xbf16> to vector<128x128xbf16>
    %cst_16 = arith.constant dense<0.000000e+00> : vector<144x128xf32>
    %20 = tpu.matmul %17, %19, %cst_16 {dimension_numbers = #tpu.dot_dimension_numbers<[1], [0], [0], [1], [0, 0, 1, 1], [], []>} : vector<144x128xbf16>, vector<128x128xbf16>, vector<144x128xf32> -> vector<144x128xf32>
    %c1 = arith.constant 1 : index
    %c0_17 = arith.constant 0 : index
    %21 = vector.load %arg13[%c1, %c0_17] : memref<188x128xbf16, #tpu.memory_space<vmem>>, vector<144x128xbf16>
    %c0_18 = arith.constant 0 : index
    %c1_19 = arith.constant 1 : index
    %c0_20 = arith.constant 0 : index
    %c0_21 = arith.constant 0 : index
    %22 = vector.load %arg10[%c0_18, %c1_19, %c0_20, %c0_21] : memref<3x3x128x128xbf16, #tpu.memory_space<vmem>>, vector<1x1x128x128xbf16>
    %23 = vector.shape_cast %22 : vector<1x1x128x128xbf16> to vector<128x128xbf16>
    %cst_22 = arith.constant dense<0.000000e+00> : vector<144x128xf32>
    %24 = tpu.matmul %21, %23, %cst_22 {dimension_numbers = #tpu.dot_dimension_numbers<[1], [0], [0], [1], [0, 0, 1, 1], [], []>} : vector<144x128xbf16>, vector<128x128xbf16>, vector<144x128xf32> -> vector<144x128xf32>
    %25 = arith.addf %20, %24 : vector<144x128xf32>
    %c2 = arith.constant 2 : index
    %c0_23 = arith.constant 0 : index
    %26 = vector.load %arg13[%c2, %c0_23] : memref<188x128xbf16, #tpu.memory_space<vmem>>, vector<144x128xbf16>
    %c0_24 = arith.constant 0 : index
    %c2_25 = arith.constant 2 : index
    %c0_26 = arith.constant 0 : index
    %c0_27 = arith.constant 0 : index
    %27 = vector.load %arg10[%c0_24, %c2_25, %c0_26, %c0_27] : memref<3x3x128x128xbf16, #tpu.memory_space<vmem>>, vector<1x1x128x128xbf16>
    %28 = vector.shape_cast %27 : vector<1x1x128x128xbf16> to vector<128x128xbf16>
    %cst_28 = arith.constant dense<0.000000e+00> : vector<144x128xf32>
    %29 = tpu.matmul %26, %28, %cst_28 {dimension_numbers = #tpu.dot_dimension_numbers<[1], [0], [0], [1], [0, 0, 1, 1], [], []>} : vector<144x128xbf16>, vector<128x128xbf16>, vector<144x128xf32> -> vector<144x128xf32>
    %30 = arith.addf %25, %29 : vector<144x128xf32>
    %c18_29 = arith.constant 18 : index
    %c0_30 = arith.constant 0 : index
    %31 = vector.load %arg13[%c18_29, %c0_30] : memref<188x128xbf16, #tpu.memory_space<vmem>>, vector<144x128xbf16>
    %c1_31 = arith.constant 1 : index
    %c0_32 = arith.constant 0 : index
    %c0_33 = arith.constant 0 : index
    %c0_34 = arith.constant 0 : index
    %32 = vector.load %arg10[%c1_31, %c0_32, %c0_33, %c0_34] : memref<3x3x128x128xbf16, #tpu.memory_space<vmem>>, vector<1x1x128x128xbf16>
    %33 = vector.shape_cast %32 : vector<1x1x128x128xbf16> to vector<128x128xbf16>
    %cst_35 = arith.constant dense<0.000000e+00> : vector<144x128xf32>
    %34 = tpu.matmul %31, %33, %cst_35 {dimension_numbers = #tpu.dot_dimension_numbers<[1], [0], [0], [1], [0, 0, 1, 1], [], []>} : vector<144x128xbf16>, vector<128x128xbf16>, vector<144x128xf32> -> vector<144x128xf32>
    %35 = arith.addf %30, %34 : vector<144x128xf32>
    %c19 = arith.constant 19 : index
    %c0_36 = arith.constant 0 : index
    %36 = vector.load %arg13[%c19, %c0_36] : memref<188x128xbf16, #tpu.memory_space<vmem>>, vector<144x128xbf16>
    %c1_37 = arith.constant 1 : index
    %c1_38 = arith.constant 1 : index
    %c0_39 = arith.constant 0 : index
    %c0_40 = arith.constant 0 : index
    %37 = vector.load %arg10[%c1_37, %c1_38, %c0_39, %c0_40] : memref<3x3x128x128xbf16, #tpu.memory_space<vmem>>, vector<1x1x128x128xbf16>
    %38 = vector.shape_cast %37 : vector<1x1x128x128xbf16> to vector<128x128xbf16>
    %cst_41 = arith.constant dense<0.000000e+00> : vector<144x128xf32>
    %39 = tpu.matmul %36, %38, %cst_41 {dimension_numbers = #tpu.dot_dimension_numbers<[1], [0], [0], [1], [0, 0, 1, 1], [], []>} : vector<144x128xbf16>, vector<128x128xbf16>, vector<144x128xf32> -> vector<144x128xf32>
    %40 = arith.addf %35, %39 : vector<144x128xf32>
    %c20 = arith.constant 20 : index
    %c0_42 = arith.constant 0 : index
    %41 = vector.load %arg13[%c20, %c0_42] : memref<188x128xbf16, #tpu.memory_space<vmem>>, vector<144x128xbf16>
    %c1_43 = arith.constant 1 : index
    %c2_44 = arith.constant 2 : index
    %c0_45 = arith.constant 0 : index
    %c0_46 = arith.constant 0 : index
    %42 = vector.load %arg10[%c1_43, %c2_44, %c0_45, %c0_46] : memref<3x3x128x128xbf16, #tpu.memory_space<vmem>>, vector<1x1x128x128xbf16>
    %43 = vector.shape_cast %42 : vector<1x1x128x128xbf16> to vector<128x128xbf16>
    %cst_47 = arith.constant dense<0.000000e+00> : vector<144x128xf32>
    %44 = tpu.matmul %41, %43, %cst_47 {dimension_numbers = #tpu.dot_dimension_numbers<[1], [0], [0], [1], [0, 0, 1, 1], [], []>} : vector<144x128xbf16>, vector<128x128xbf16>, vector<144x128xf32> -> vector<144x128xf32>
    %45 = arith.addf %40, %44 : vector<144x128xf32>
    %c36 = arith.constant 36 : index
    %c0_48 = arith.constant 0 : index
    %46 = vector.load %arg13[%c36, %c0_48] : memref<188x128xbf16, #tpu.memory_space<vmem>>, vector<144x128xbf16>
    %c2_49 = arith.constant 2 : index
    %c0_50 = arith.constant 0 : index
    %c0_51 = arith.constant 0 : index
    %c0_52 = arith.constant 0 : index
    %47 = vector.load %arg10[%c2_49, %c0_50, %c0_51, %c0_52] : memref<3x3x128x128xbf16, #tpu.memory_space<vmem>>, vector<1x1x128x128xbf16>
    %48 = vector.shape_cast %47 : vector<1x1x128x128xbf16> to vector<128x128xbf16>
    %cst_53 = arith.constant dense<0.000000e+00> : vector<144x128xf32>
    %49 = tpu.matmul %46, %48, %cst_53 {dimension_numbers = #tpu.dot_dimension_numbers<[1], [0], [0], [1], [0, 0, 1, 1], [], []>} : vector<144x128xbf16>, vector<128x128xbf16>, vector<144x128xf32> -> vector<144x128xf32>
    %50 = arith.addf %45, %49 : vector<144x128xf32>
    %c37 = arith.constant 37 : index
    %c0_54 = arith.constant 0 : index
    %51 = vector.load %arg13[%c37, %c0_54] : memref<188x128xbf16, #tpu.memory_space<vmem>>, vector<144x128xbf16>
    %c2_55 = arith.constant 2 : index
    %c1_56 = arith.constant 1 : index
    %c0_57 = arith.constant 0 : index
    %c0_58 = arith.constant 0 : index
    %52 = vector.load %arg10[%c2_55, %c1_56, %c0_57, %c0_58] : memref<3x3x128x128xbf16, #tpu.memory_space<vmem>>, vector<1x1x128x128xbf16>
    %53 = vector.shape_cast %52 : vector<1x1x128x128xbf16> to vector<128x128xbf16>
    %cst_59 = arith.constant dense<0.000000e+00> : vector<144x128xf32>
    %54 = tpu.matmul %51, %53, %cst_59 {dimension_numbers = #tpu.dot_dimension_numbers<[1], [0], [0], [1], [0, 0, 1, 1], [], []>} : vector<144x128xbf16>, vector<128x128xbf16>, vector<144x128xf32> -> vector<144x128xf32>
    %55 = arith.addf %50, %54 : vector<144x128xf32>
    %c38 = arith.constant 38 : index
    %c0_60 = arith.constant 0 : index
    %56 = vector.load %arg13[%c38, %c0_60] : memref<188x128xbf16, #tpu.memory_space<vmem>>, vector<144x128xbf16>
    %c2_61 = arith.constant 2 : index
    %c2_62 = arith.constant 2 : index
    %c0_63 = arith.constant 0 : index
    %c0_64 = arith.constant 0 : index
    %57 = vector.load %arg10[%c2_61, %c2_62, %c0_63, %c0_64] : memref<3x3x128x128xbf16, #tpu.memory_space<vmem>>, vector<1x1x128x128xbf16>
    %58 = vector.shape_cast %57 : vector<1x1x128x128xbf16> to vector<128x128xbf16>
    %cst_65 = arith.constant dense<0.000000e+00> : vector<144x128xf32>
    %59 = tpu.matmul %56, %58, %cst_65 {dimension_numbers = #tpu.dot_dimension_numbers<[1], [0], [0], [1], [0, 0, 1, 1], [], []>} : vector<144x128xbf16>, vector<128x128xbf16>, vector<144x128xf32> -> vector<144x128xf32>
    %60 = arith.addf %55, %59 : vector<144x128xf32>
    %c0_66 = arith.constant 0 : index
    %c0_67 = arith.constant 0 : index
    %61 = vector.load %arg4[%c0_66, %c0_67] : memref<144x1xf32, #tpu.memory_space<vmem>>, vector<144x1xf32>
    %62 = vector.broadcast %61 : vector<144x1xf32> to vector<144x128xf32>
    %63 = arith.mulf %60, %62 : vector<144x128xf32>
    %cst_68 = arith.constant 0.000000e+00 : f32
    %64 = vector.broadcast %cst_68 : f32 to vector<1x128xf32>
    %65 = vector.extract_strided_slice %63 {offsets = [0, 0], sizes = [143, 128], strides = [1, 1]} : vector<144x128xf32> to vector<143x128xf32>
    %66 = tpu.concatenate %64, %65 in 0 : vector<1x128xf32>, vector<143x128xf32> -> vector<144x128xf32>
    %67 = arith.truncf %66 : vector<144x128xf32> to vector<144x128xbf16>
    %c0_69 = arith.constant 0 : index
    %c0_70 = arith.constant 0 : index
    %c0_71 = arith.constant 0 : index
    %68 = vector.load %arg11[%c0_69, %c0_70, %c0_71] : memref<1x144x128xbf16, #tpu.memory_space<vmem>>, vector<1x144x128xbf16>
    %69 = vector.shape_cast %68 : vector<1x144x128xbf16> to vector<144x128xbf16>
    %70 = vector.shape_cast %67 : vector<144x128xbf16> to vector<1x144x128xbf16>
    tpu.vector_store %arg11[%c0_69, %c0_70, %c0_71], %70 {strides = array<i32>} : memref<1x144x128xbf16, #tpu.memory_space<vmem>>, vector<1x144x128xbf16>,
    %cst_72 = arith.constant dense<0.000000e+00> : vector<128xf32>
    %71 = vector.multi_reduction <add>, %63, %cst_72 [0] : vector<144x128xf32> to vector<128xf32>
    %72 = vector.shape_cast %71 : vector<128xf32> to vector<1x128xf32>
    %c0_73 = arith.constant 0 : index
    %c0_74 = arith.constant 0 : index
    %c0_75 = arith.constant 0 : index
    %c0_76 = arith.constant 0 : index
    %73 = vector.load %arg12[%c0_73, %c0_74, %c0_75, %c0_76] : memref<1x1x2x128xf32, #tpu.memory_space<vmem>>, vector<1x1x1x128xf32>
    %74 = vector.shape_cast %73 : vector<1x1x1x128xf32> to vector<1x128xf32>
    %75 = vector.shape_cast %72 : vector<1x128xf32> to vector<1x1x1x128xf32>
    tpu.vector_store %arg12[%c0_73, %c0_74, %c0_75, %c0_76], %75 {strides = array<i32>} : memref<1x1x2x128xf32, #tpu.memory_space<vmem>>, vector<1x1x1x128xf32>,
    %76 = arith.mulf %63, %63 : vector<144x128xf32>
    %cst_77 = arith.constant dense<0.000000e+00> : vector<128xf32>
    %77 = vector.multi_reduction <add>, %76, %cst_77 [0] : vector<144x128xf32> to vector<128xf32>
    %78 = vector.shape_cast %77 : vector<128xf32> to vector<1x128xf32>
    %c0_78 = arith.constant 0 : index
    %c0_79 = arith.constant 0 : index
    %c1_80 = arith.constant 1 : index
    %c0_81 = arith.constant 0 : index
    %79 = vector.load %arg12[%c0_78, %c0_79, %c1_80, %c0_81] : memref<1x1x2x128xf32, #tpu.memory_space<vmem>>, vector<1x1x1x128xf32>
    %80 = vector.shape_cast %79 : vector<1x1x1x128xf32> to vector<1x128xf32>
    %81 = vector.shape_cast %78 : vector<1x128xf32> to vector<1x1x1x128xf32>
    tpu.vector_store %arg12[%c0_78, %c0_79, %c1_80, %c0_81], %81 {strides = array<i32>} : memref<1x1x2x128xf32, #tpu.memory_space<vmem>>, vector<1x1x1x128xf32>,
    return
  }
  func.func @transform_0(%arg0: i32, %arg1: i32, %arg2: i32) -> (i32, i32) {
    %c0_i32 = arith.constant 0 : i32
    %c0_i32_0 = arith.constant 0 : i32
    %c0_i32_1 = arith.constant 0 : i32
    return %c0_i32, %c0_i32_0 : i32, i32
  }
  func.func @transform_1(%arg0: i32, %arg1: i32, %arg2: i32) -> (i32, i32) {
    %c0_i32 = arith.constant 0 : i32
    %c0_i32_0 = arith.constant 0 : i32
    %c0_i32_1 = arith.constant 0 : i32
    return %c0_i32, %c0_i32_0 : i32, i32
  }
  func.func @transform_2(%arg0: i32, %arg1: i32, %arg2: i32) -> (i32, i32) {
    %c0_i32 = arith.constant 0 : i32
    %c0_i32_0 = arith.constant 0 : i32
    return %c0_i32, %arg2 : i32, i32
  }
  func.func @transform_3(%arg0: i32, %arg1: i32, %arg2: i32) -> (i32, i32) {
    %c0_i32 = arith.constant 0 : i32
    %c0_i32_0 = arith.constant 0 : i32
    return %c0_i32, %arg2 : i32, i32
  }
  func.func @transform_4(%arg0: i32, %arg1: i32, %arg2: i32) -> (i32, i32, i32) {
    %c0_i32 = arith.constant 0 : i32
    return %arg0, %arg1, %arg2 : i32, i32, i32
  }
  func.func @transform_5(%arg0: i32, %arg1: i32, %arg2: i32) -> (i32, i32, i32, i32) {
    %c8_i32 = arith.constant 8 : i32
    %0 = arith.muli %arg1, %c8_i32 : i32
    %c1_i32 = arith.constant 1 : i32
    %1 = arith.subi %0, %c1_i32 : i32
    %c0_i32 = arith.constant 0 : i32
    %2 = arith.maxsi %1, %c0_i32 : i32
    %c0_i32_0 = arith.constant 0 : i32
    %c0_i32_1 = arith.constant 0 : i32
    return %arg0, %2, %c0_i32_0, %arg2 : i32, i32, i32, i32
  }
  func.func @transform_6(%arg0: i32, %arg1: i32, %arg2: i32) -> (i32, i32, i32, i32) {
    %c8_i32 = arith.constant 8 : i32
    %0 = arith.muli %arg1, %c8_i32 : i32
    %c8_i32_0 = arith.constant 8 : i32
    %1 = arith.addi %0, %c8_i32_0 : i32
    %c15_i32 = arith.constant 15 : i32
    %2 = arith.minsi %1, %c15_i32 : i32
    %c0_i32 = arith.constant 0 : i32
    %c0_i32_1 = arith.constant 0 : i32
    return %arg0, %2, %c0_i32, %arg2 : i32, i32, i32, i32
  }
  func.func @transform_7(%arg0: i32, %arg1: i32, %arg2: i32) -> (i32, i32, i32, i32) {
    %c0_i32 = arith.constant 0 : i32
    %c0_i32_0 = arith.constant 0 : i32
    %c0_i32_1 = arith.constant 0 : i32
    %c0_i32_2 = arith.constant 0 : i32
    return %c0_i32, %c0_i32_0, %arg2, %c0_i32_1 : i32, i32, i32, i32
  }
  func.func @transform_8(%arg0: i32, %arg1: i32, %arg2: i32) -> (i32, i32, i32) {
    %c0_i32 = arith.constant 0 : i32
    %c0_i32_0 = arith.constant 0 : i32
    return %arg0, %arg1, %c0_i32 : i32, i32, i32
  }
  func.func @transform_9(%arg0: i32, %arg1: i32, %arg2: i32) -> (i32, i32, i32, i32) {
    %c0_i32 = arith.constant 0 : i32
    %c0_i32_0 = arith.constant 0 : i32
    %c0_i32_1 = arith.constant 0 : i32
    return %arg0, %arg1, %c0_i32, %c0_i32_0 : i32, i32, i32, i32
  }
}

module attributes {stable_mosaic.version = 11 : i64} {
  func.func @_affine_lrelu_kernel(%arg0: i32, %arg1: i32, %arg2: memref<1x144x128xbf16, #tpu.memory_space<vmem>>, %arg3: memref<1x128xf32, #tpu.memory_space<vmem>>, %arg4: memref<1x128xf32, #tpu.memory_space<vmem>>, %arg5: memref<1x144x128xf32, #tpu.memory_space<vmem>>) attributes {dimension_semantics = [#tpu.dimension_semantics<parallel>, #tpu.dimension_semantics<parallel>], iteration_bounds = array<i64: 2, 2>, scalar_prefetch = 0 : i64, scratch_operands = 0 : i64, tpu.core_type = #tpu.core_type<tc>, window_params = [{transform_indices = @transform_0, window_bounds = array<i64: 1, 144, 128>}, {pipeline_mode = #tpu.pipeline_mode<synchronous>, transform_indices = @transform_1, window_bounds = array<i64: 1, 128>}, {pipeline_mode = #tpu.pipeline_mode<synchronous>, transform_indices = @transform_2, window_bounds = array<i64: 1, 128>}, {transform_indices = @transform_3, window_bounds = array<i64: 1, 144, 128>}]} {
    %c0 = arith.constant 0 : index
    %c0_0 = arith.constant 0 : index
    %c0_1 = arith.constant 0 : index
    %0 = vector.load %arg2[%c0, %c0_0, %c0_1] : memref<1x144x128xbf16, #tpu.memory_space<vmem>>, vector<1x144x128xbf16>
    %1 = vector.shape_cast %0 : vector<1x144x128xbf16> to vector<144x128xbf16>
    %2 = arith.extf %1 : vector<144x128xbf16> to vector<144x128xf32>
    %c0_2 = arith.constant 0 : index
    %c0_3 = arith.constant 0 : index
    %3 = vector.load %arg3[%c0_2, %c0_3] : memref<1x128xf32, #tpu.memory_space<vmem>>, vector<1x128xf32>
    %4 = vector.shape_cast %3 : vector<1x128xf32> to vector<128xf32>
    %5 = vector.shape_cast %4 : vector<128xf32> to vector<1x128xf32>
    %6 = vector.broadcast %5 : vector<1x128xf32> to vector<144x128xf32>
    %7 = arith.mulf %2, %6 : vector<144x128xf32>
    %c0_4 = arith.constant 0 : index
    %c0_5 = arith.constant 0 : index
    %8 = vector.load %arg4[%c0_4, %c0_5] : memref<1x128xf32, #tpu.memory_space<vmem>>, vector<1x128xf32>
    %9 = vector.shape_cast %8 : vector<1x128xf32> to vector<128xf32>
    %10 = vector.shape_cast %9 : vector<128xf32> to vector<1x128xf32>
    %11 = vector.broadcast %10 : vector<1x128xf32> to vector<144x128xf32>
    %12 = arith.addf %7, %11 : vector<144x128xf32>
    %cst = arith.constant 0.000000e+00 : f32
    %13 = vector.broadcast %cst : f32 to vector<144x128xf32>
    %14 = arith.cmpf oge, %12, %13 : vector<144x128xf32>
    %cst_6 = arith.constant 0.00999999977 : f32
    %15 = vector.broadcast %cst_6 : f32 to vector<144x128xf32>
    %16 = arith.mulf %15, %12 : vector<144x128xf32>
    %17 = arith.select %14, %12, %16 : vector<144x128xi1>, vector<144x128xf32>
    %c0_7 = arith.constant 0 : index
    %c0_8 = arith.constant 0 : index
    %c0_9 = arith.constant 0 : index
    %18 = vector.load %arg5[%c0_7, %c0_8, %c0_9] : memref<1x144x128xf32, #tpu.memory_space<vmem>>, vector<1x144x128xf32>
    %19 = vector.shape_cast %18 : vector<1x144x128xf32> to vector<144x128xf32>
    %20 = vector.shape_cast %17 : vector<144x128xf32> to vector<1x144x128xf32>
    tpu.vector_store %arg5[%c0_7, %c0_8, %c0_9], %20 {strides = array<i32>} : memref<1x144x128xf32, #tpu.memory_space<vmem>>, vector<1x144x128xf32>,
    return
  }
  func.func @transform_0(%arg0: i32, %arg1: i32) -> (i32, i32, i32) {
    %c0_i32 = arith.constant 0 : i32
    %c0_i32_0 = arith.constant 0 : i32
    return %arg0, %arg1, %c0_i32 : i32, i32, i32
  }
  func.func @transform_1(%arg0: i32, %arg1: i32) -> (i32, i32) {
    %c0_i32 = arith.constant 0 : i32
    %c0_i32_0 = arith.constant 0 : i32
    %c0_i32_1 = arith.constant 0 : i32
    return %c0_i32, %c0_i32_0 : i32, i32
  }
  func.func @transform_2(%arg0: i32, %arg1: i32) -> (i32, i32) {
    %c0_i32 = arith.constant 0 : i32
    %c0_i32_0 = arith.constant 0 : i32
    %c0_i32_1 = arith.constant 0 : i32
    return %c0_i32, %c0_i32_0 : i32, i32
  }
  func.func @transform_3(%arg0: i32, %arg1: i32) -> (i32, i32, i32) {
    %c0_i32 = arith.constant 0 : i32
    %c0_i32_0 = arith.constant 0 : i32
    return %arg0, %arg1, %c0_i32 : i32, i32, i32
  }
}

module attributes {stable_mosaic.version = 11 : i64} {
  func.func @_conv3x3_bn_stats_kernel(%arg0: i32, %arg1: i32, %arg2: i32, %arg3: memref<144x1xf32, #tpu.memory_space<vmem>>, %arg4: memref<144x1xf32, #tpu.memory_space<vmem>>, %arg5: memref<1x128xf32, #tpu.memory_space<vmem>>, %arg6: memref<1x128xf32, #tpu.memory_space<vmem>>, %arg7: memref<1x144x128xbf16, #tpu.memory_space<vmem>>, %arg8: memref<1x1x18x128xbf16, #tpu.memory_space<vmem>>, %arg9: memref<1x1x18x128xbf16, #tpu.memory_space<vmem>>, %arg10: memref<3x3x128x128xbf16, #tpu.memory_space<vmem>>, %arg11: memref<1x144x128xbf16, #tpu.memory_space<vmem>>, %arg12: memref<1x1x2x128xf32, #tpu.memory_space<vmem>>, %arg13: memref<188x128xbf16, #tpu.memory_space<vmem>>) attributes {dimension_semantics = [#tpu.dimension_semantics<parallel>, #tpu.dimension_semantics<parallel>, #tpu.dimension_semantics<arbitrary>], iteration_bounds = array<i64: 2, 2, 1>, scalar_prefetch = 0 : i64, scratch_operands = 1 : i64, tpu.core_type = #tpu.core_type<tc>, window_params = [{pipeline_mode = #tpu.pipeline_mode<synchronous>, transform_indices = @transform_0, window_bounds = array<i64: 144, 1>}, {pipeline_mode = #tpu.pipeline_mode<synchronous>, transform_indices = @transform_1, window_bounds = array<i64: 144, 1>}, {transform_indices = @transform_2, window_bounds = array<i64: 1, 128>}, {transform_indices = @transform_3, window_bounds = array<i64: 1, 128>}, {transform_indices = @transform_4, window_bounds = array<i64: 1, 144, 128>}, {transform_indices = @transform_5, window_bounds = array<i64: 1, 1, 18, 128>}, {transform_indices = @transform_6, window_bounds = array<i64: 1, 1, 18, 128>}, {transform_indices = @transform_7, window_bounds = array<i64: 3, 3, 128, 128>}, {transform_indices = @transform_8, window_bounds = array<i64: 1, 144, 128>}, {transform_indices = @transform_9, window_bounds = array<i64: 1, 1, 2, 128>}]} {
    %c0 = arith.constant 0 : index
    %c0_0 = arith.constant 0 : index
    %c0_1 = arith.constant 0 : index
    %0 = vector.load %arg7[%c0, %c0_0, %c0_1] : memref<1x144x128xbf16, #tpu.memory_space<vmem>>, vector<1x144x128xbf16>
    %1 = vector.shape_cast %0 : vector<1x144x128xbf16> to vector<144x128xbf16>
    %c0_2 = arith.constant 0 : index
    %c0_3 = arith.constant 0 : index
    %2 = vector.load %arg3[%c0_2, %c0_3] : memref<144x1xf32, #tpu.memory_space<vmem>>, vector<144x1xf32>
    %3 = arith.extf %1 : vector<144x128xbf16> to vector<144x128xf32>
    %c0_4 = arith.constant 0 : index
    %c0_5 = arith.constant 0 : index
    %4 = vector.load %arg5[%c0_4, %c0_5] : memref<1x128xf32, #tpu.memory_space<vmem>>, vector<1x128xf32>
    %5 = vector.shape_cast %4 : vector<1x128xf32> to vector<128xf32>
    %6 = vector.shape_cast %5 : vector<128xf32> to vector<1x128xf32>
    %7 = vector.broadcast %6 : vector<1x128xf32> to vector<144x128xf32>
    %8 = arith.mulf %3, %7 : vector<144x128xf32>
    %c0_6 = arith.constant 0 : index
    %c0_7 = arith.constant 0 : index
    %9 = vector.load %arg6[%c0_6, %c0_7] : memref<1x128xf32, #tpu.memory_space<vmem>>, vector<1x128xf32>
    %10 = vector.shape_cast %9 : vector<1x128xf32> to vector<128xf32>
    %11 = vector.shape_cast %10 : vector<128xf32> to vector<1x128xf32>
    %12 = vector.broadcast %11 : vector<1x128xf32> to vector<144x128xf32>
    %13 = arith.addf %8, %12 : vector<144x128xf32>
    %cst = arith.constant 0.000000e+00 : f32
    %14 = vector.broadcast %cst : f32 to vector<144x128xf32>
    %15 = arith.cmpf oge, %13, %14 : vector<144x128xf32>
    %cst_8 = arith.constant 0.00999999977 : f32
    %16 = vector.broadcast %cst_8 : f32 to vector<144x128xf32>
    %17 = arith.mulf %16, %13 : vector<144x128xf32>
    %18 = arith.select %15, %13, %17 : vector<144x128xi1>, vector<144x128xf32>
    %19 = vector.broadcast %2 : vector<144x1xf32> to vector<144x128xf32>
    %20 = arith.mulf %18, %19 : vector<144x128xf32>
    %21 = arith.truncf %20 : vector<144x128xf32> to vector<144x128xbf16>
    %c18 = arith.constant 18 : index
    %c0_9 = arith.constant 0 : index
    %22 = vector.load %arg13[%c18, %c0_9] : memref<188x128xbf16, #tpu.memory_space<vmem>>, vector<144x128xbf16>
    tpu.vector_store %arg13[%c18, %c0_9], %21 {strides = array<i32>} : memref<188x128xbf16, #tpu.memory_space<vmem>>, vector<144x128xbf16>,
    %c0_10 = arith.constant 0 : index
    %c0_11 = arith.constant 0 : index
    %23 = vector.load %arg3[%c0_10, %c0_11] : memref<144x1xf32, #tpu.memory_space<vmem>>, vector<18x1xf32>
    %c0_i32 = arith.constant 0 : i32
    %24 = arith.cmpi sgt, %arg1, %c0_i32 : i32
    %25 = arith.extui %24 : i1 to i32
    %c0_i32_12 = arith.constant 0 : i32
    %26 = arith.cmpi ne, %25, %c0_i32_12 : i32
    scf.if %26 {
      %c0_92 = arith.constant 0 : index
      %c0_93 = arith.constant 0 : index
      %c0_94 = arith.constant 0 : index
      %c0_95 = arith.constant 0 : index
      %103 = vector.load %arg8[%c0_92, %c0_93, %c0_94, %c0_95] : memref<1x1x18x128xbf16, #tpu.memory_space<vmem>>, vector<1x1x18x128xbf16>
      %104 = vector.shape_cast %103 : vector<1x1x18x128xbf16> to vector<18x128xbf16>
      %105 = arith.extf %104 : vector<18x128xbf16> to vector<18x128xf32>
      %c0_96 = arith.constant 0 : index
      %c0_97 = arith.constant 0 : index
      %106 = vector.load %arg5[%c0_96, %c0_97] : memref<1x128xf32, #tpu.memory_space<vmem>>, vector<1x128xf32>
      %107 = vector.shape_cast %106 : vector<1x128xf32> to vector<128xf32>
      %108 = vector.shape_cast %107 : vector<128xf32> to vector<1x128xf32>
      %109 = vector.broadcast %108 : vector<1x128xf32> to vector<18x128xf32>
      %110 = arith.mulf %105, %109 : vector<18x128xf32>
      %c0_98 = arith.constant 0 : index
      %c0_99 = arith.constant 0 : index
      %111 = vector.load %arg6[%c0_98, %c0_99] : memref<1x128xf32, #tpu.memory_space<vmem>>, vector<1x128xf32>
      %112 = vector.shape_cast %111 : vector<1x128xf32> to vector<128xf32>
      %113 = vector.shape_cast %112 : vector<128xf32> to vector<1x128xf32>
      %114 = vector.broadcast %113 : vector<1x128xf32> to vector<18x128xf32>
      %115 = arith.addf %110, %114 : vector<18x128xf32>
      %cst_100 = arith.constant 0.000000e+00 : f32
      %116 = vector.broadcast %cst_100 : f32 to vector<18x128xf32>
      %117 = arith.cmpf oge, %115, %116 : vector<18x128xf32>
      %cst_101 = arith.constant 0.00999999977 : f32
      %118 = vector.broadcast %cst_101 : f32 to vector<18x128xf32>
      %119 = arith.mulf %118, %115 : vector<18x128xf32>
      %120 = arith.select %117, %115, %119 : vector<18x128xi1>, vector<18x128xf32>
      %121 = vector.broadcast %23 : vector<18x1xf32> to vector<18x128xf32>
      %122 = arith.mulf %120, %121 : vector<18x128xf32>
      %123 = arith.truncf %122 : vector<18x128xf32> to vector<18x128xbf16>
      %c0_102 = arith.constant 0 : index
      %c0_103 = arith.constant 0 : index
      %124 = vector.load %arg13[%c0_102, %c0_103] : memref<188x128xbf16, #tpu.memory_space<vmem>>, vector<18x128xbf16>
      tpu.vector_store %arg13[%c0_102, %c0_103], %123 {strides = array<i32>} : memref<188x128xbf16, #tpu.memory_space<vmem>>, vector<18x128xbf16>,
    } else {
    }
    %c0_i32_13 = arith.constant 0 : i32
    %27 = arith.cmpi eq, %arg1, %c0_i32_13 : i32
    %28 = arith.extui %27 : i1 to i32
    %c0_i32_14 = arith.constant 0 : i32
    %29 = arith.cmpi ne, %28, %c0_i32_14 : i32
    scf.if %29 {
      %cst_92 = arith.constant 0.000000e+00 : bf16
      %103 = vector.broadcast %cst_92 : bf16 to vector<18x128xbf16>
      %c0_93 = arith.constant 0 : index
      %c0_94 = arith.constant 0 : index
      %104 = vector.load %arg13[%c0_93, %c0_94] : memref<188x128xbf16, #tpu.memory_space<vmem>>, vector<18x128xbf16>
      tpu.vector_store %arg13[%c0_93, %c0_94], %103 {strides = array<i32>} : memref<188x128xbf16, #tpu.memory_space<vmem>>, vector<18x128xbf16>,
    } else {
    }
    %c1_i32 = arith.constant 1 : i32
    %30 = arith.cmpi slt, %arg1, %c1_i32 : i32
    %31 = arith.extui %30 : i1 to i32
    %c0_i32_15 = arith.constant 0 : i32
    %32 = arith.cmpi ne, %31, %c0_i32_15 : i32
    scf.if %32 {
      %c0_92 = arith.constant 0 : index
      %c0_93 = arith.constant 0 : index
      %c0_94 = arith.constant 0 : index
      %c0_95 = arith.constant 0 : index
      %103 = vector.load %arg9[%c0_92, %c0_93, %c0_94, %c0_95] : memref<1x1x18x128xbf16, #tpu.memory_space<vmem>>, vector<1x1x18x128xbf16>
      %104 = vector.shape_cast %103 : vector<1x1x18x128xbf16> to vector<18x128xbf16>
      %105 = arith.extf %104 : vector<18x128xbf16> to vector<18x128xf32>
      %c0_96 = arith.constant 0 : index
      %c0_97 = arith.constant 0 : index
      %106 = vector.load %arg5[%c0_96, %c0_97] : memref<1x128xf32, #tpu.memory_space<vmem>>, vector<1x128xf32>
      %107 = vector.shape_cast %106 : vector<1x128xf32> to vector<128xf32>
      %108 = vector.shape_cast %107 : vector<128xf32> to vector<1x128xf32>
      %109 = vector.broadcast %108 : vector<1x128xf32> to vector<18x128xf32>
      %110 = arith.mulf %105, %109 : vector<18x128xf32>
      %c0_98 = arith.constant 0 : index
      %c0_99 = arith.constant 0 : index
      %111 = vector.load %arg6[%c0_98, %c0_99] : memref<1x128xf32, #tpu.memory_space<vmem>>, vector<1x128xf32>
      %112 = vector.shape_cast %111 : vector<1x128xf32> to vector<128xf32>
      %113 = vector.shape_cast %112 : vector<128xf32> to vector<1x128xf32>
      %114 = vector.broadcast %113 : vector<1x128xf32> to vector<18x128xf32>
      %115 = arith.addf %110, %114 : vector<18x128xf32>
      %cst_100 = arith.constant 0.000000e+00 : f32
      %116 = vector.broadcast %cst_100 : f32 to vector<18x128xf32>
      %117 = arith.cmpf oge, %115, %116 : vector<18x128xf32>
      %cst_101 = arith.constant 0.00999999977 : f32
      %118 = vector.broadcast %cst_101 : f32 to vector<18x128xf32>
      %119 = arith.mulf %118, %115 : vector<18x128xf32>
      %120 = arith.select %117, %115, %119 : vector<18x128xi1>, vector<18x128xf32>
      %121 = vector.broadcast %23 : vector<18x1xf32> to vector<18x128xf32>
      %122 = arith.mulf %120, %121 : vector<18x128xf32>
      %123 = arith.truncf %122 : vector<18x128xf32> to vector<18x128xbf16>
      %c162 = arith.constant 162 : index
      %c0_102 = arith.constant 0 : index
      %124 = vector.load %arg13[%c162, %c0_102] : memref<188x128xbf16, #tpu.memory_space<vmem>>, vector<18x128xbf16>
      tpu.vector_store %arg13[%c162, %c0_102], %123 {strides = array<i32>} : memref<188x128xbf16, #tpu.memory_space<vmem>>, vector<18x128xbf16>,
    } else {
    }
    %c1_i32_16 = arith.constant 1 : i32
    %33 = arith.cmpi eq, %arg1, %c1_i32_16 : i32
    %34 = arith.extui %33 : i1 to i32
    %c0_i32_17 = arith.constant 0 : i32
    %35 = arith.cmpi ne, %34, %c0_i32_17 : i32
    scf.if %35 {
      %cst_92 = arith.constant 0.000000e+00 : bf16
      %103 = vector.broadcast %cst_92 : bf16 to vector<18x128xbf16>
      %c162 = arith.constant 162 : index
      %c0_93 = arith.constant 0 : index
      %104 = vector.load %arg13[%c162, %c0_93] : memref<188x128xbf16, #tpu.memory_space<vmem>>, vector<18x128xbf16>
      tpu.vector_store %arg13[%c162, %c0_93], %103 {strides = array<i32>} : memref<188x128xbf16, #tpu.memory_space<vmem>>, vector<18x128xbf16>,
    } else {
    }
    %cst_18 = arith.constant 0.000000e+00 : bf16
    %36 = vector.broadcast %cst_18 : bf16 to vector<8x128xbf16>
    %c180 = arith.constant 180 : index
    %c0_19 = arith.constant 0 : index
    %37 = vector.load %arg13[%c180, %c0_19] : memref<188x128xbf16, #tpu.memory_space<vmem>>, vector<8x128xbf16>
    tpu.vector_store %arg13[%c180, %c0_19], %36 {strides = array<i32>} : memref<188x128xbf16, #tpu.memory_space<vmem>>, vector<8x128xbf16>,
    %c0_20 = arith.constant 0 : index
    %c0_21 = arith.constant 0 : index
    %38 = vector.load %arg13[%c0_20, %c0_21] : memref<188x128xbf16, #tpu.memory_space<vmem>>, vector<144x128xbf16>
    %c0_22 = arith.constant 0 : index
    %c0_23 = arith.constant 0 : index
    %c0_24 = arith.constant 0 : index
    %c0_25 = arith.constant 0 : index
    %39 = vector.load %arg10[%c0_22, %c0_23, %c0_24, %c0_25] : memref<3x3x128x128xbf16, #tpu.memory_space<vmem>>, vector<1x1x128x128xbf16>
    %40 = vector.shape_cast %39 : vector<1x1x128x128xbf16> to vector<128x128xbf16>
    %cst_26 = arith.constant dense<0.000000e+00> : vector<144x128xf32>
    %41 = tpu.matmul %38, %40, %cst_26 {dimension_numbers = #tpu.dot_dimension_numbers<[1], [0], [0], [1], [0, 0, 1, 1], [], []>} : vector<144x128xbf16>, vector<128x128xbf16>, vector<144x128xf32> -> vector<144x128xf32>
    %c1 = arith.constant 1 : index
    %c0_27 = arith.constant 0 : index
    %42 = vector.load %arg13[%c1, %c0_27] : memref<188x128xbf16, #tpu.memory_space<vmem>>, vector<144x128xbf16>
    %c0_28 = arith.constant 0 : index
    %c1_29 = arith.constant 1 : index
    %c0_30 = arith.constant 0 : index
    %c0_31 = arith.constant 0 : index
    %43 = vector.load %arg10[%c0_28, %c1_29, %c0_30, %c0_31] : memref<3x3x128x128xbf16, #tpu.memory_space<vmem>>, vector<1x1x128x128xbf16>
    %44 = vector.shape_cast %43 : vector<1x1x128x128xbf16> to vector<128x128xbf16>
    %cst_32 = arith.constant dense<0.000000e+00> : vector<144x128xf32>
    %45 = tpu.matmul %42, %44, %cst_32 {dimension_numbers = #tpu.dot_dimension_numbers<[1], [0], [0], [1], [0, 0, 1, 1], [], []>} : vector<144x128xbf16>, vector<128x128xbf16>, vector<144x128xf32> -> vector<144x128xf32>
    %46 = arith.addf %41, %45 : vector<144x128xf32>
    %c2 = arith.constant 2 : index
    %c0_33 = arith.constant 0 : index
    %47 = vector.load %arg13[%c2, %c0_33] : memref<188x128xbf16, #tpu.memory_space<vmem>>, vector<144x128xbf16>
    %c0_34 = arith.constant 0 : index
    %c2_35 = arith.constant 2 : index
    %c0_36 = arith.constant 0 : index
    %c0_37 = arith.constant 0 : index
    %48 = vector.load %arg10[%c0_34, %c2_35, %c0_36, %c0_37] : memref<3x3x128x128xbf16, #tpu.memory_space<vmem>>, vector<1x1x128x128xbf16>
    %49 = vector.shape_cast %48 : vector<1x1x128x128xbf16> to vector<128x128xbf16>
    %cst_38 = arith.constant dense<0.000000e+00> : vector<144x128xf32>
    %50 = tpu.matmul %47, %49, %cst_38 {dimension_numbers = #tpu.dot_dimension_numbers<[1], [0], [0], [1], [0, 0, 1, 1], [], []>} : vector<144x128xbf16>, vector<128x128xbf16>, vector<144x128xf32> -> vector<144x128xf32>
    %51 = arith.addf %46, %50 : vector<144x128xf32>
    %c18_39 = arith.constant 18 : index
    %c0_40 = arith.constant 0 : index
    %52 = vector.load %arg13[%c18_39, %c0_40] : memref<188x128xbf16, #tpu.memory_space<vmem>>, vector<144x128xbf16>
    %c1_41 = arith.constant 1 : index
    %c0_42 = arith.constant 0 : index
    %c0_43 = arith.constant 0 : index
    %c0_44 = arith.constant 0 : index
    %53 = vector.load %arg10[%c1_41, %c0_42, %c0_43, %c0_44] : memref<3x3x128x128xbf16, #tpu.memory_space<vmem>>, vector<1x1x128x128xbf16>
    %54 = vector.shape_cast %53 : vector<1x1x128x128xbf16> to vector<128x128xbf16>
    %cst_45 = arith.constant dense<0.000000e+00> : vector<144x128xf32>
    %55 = tpu.matmul %52, %54, %cst_45 {dimension_numbers = #tpu.dot_dimension_numbers<[1], [0], [0], [1], [0, 0, 1, 1], [], []>} : vector<144x128xbf16>, vector<128x128xbf16>, vector<144x128xf32> -> vector<144x128xf32>
    %56 = arith.addf %51, %55 : vector<144x128xf32>
    %c19 = arith.constant 19 : index
    %c0_46 = arith.constant 0 : index
    %57 = vector.load %arg13[%c19, %c0_46] : memref<188x128xbf16, #tpu.memory_space<vmem>>, vector<144x128xbf16>
    %c1_47 = arith.constant 1 : index
    %c1_48 = arith.constant 1 : index
    %c0_49 = arith.constant 0 : index
    %c0_50 = arith.constant 0 : index
    %58 = vector.load %arg10[%c1_47, %c1_48, %c0_49, %c0_50] : memref<3x3x128x128xbf16, #tpu.memory_space<vmem>>, vector<1x1x128x128xbf16>
    %59 = vector.shape_cast %58 : vector<1x1x128x128xbf16> to vector<128x128xbf16>
    %cst_51 = arith.constant dense<0.000000e+00> : vector<144x128xf32>
    %60 = tpu.matmul %57, %59, %cst_51 {dimension_numbers = #tpu.dot_dimension_numbers<[1], [0], [0], [1], [0, 0, 1, 1], [], []>} : vector<144x128xbf16>, vector<128x128xbf16>, vector<144x128xf32> -> vector<144x128xf32>
    %61 = arith.addf %56, %60 : vector<144x128xf32>
    %c20 = arith.constant 20 : index
    %c0_52 = arith.constant 0 : index
    %62 = vector.load %arg13[%c20, %c0_52] : memref<188x128xbf16, #tpu.memory_space<vmem>>, vector<144x128xbf16>
    %c1_53 = arith.constant 1 : index
    %c2_54 = arith.constant 2 : index
    %c0_55 = arith.constant 0 : index
    %c0_56 = arith.constant 0 : index
    %63 = vector.load %arg10[%c1_53, %c2_54, %c0_55, %c0_56] : memref<3x3x128x128xbf16, #tpu.memory_space<vmem>>, vector<1x1x128x128xbf16>
    %64 = vector.shape_cast %63 : vector<1x1x128x128xbf16> to vector<128x128xbf16>
    %cst_57 = arith.constant dense<0.000000e+00> : vector<144x128xf32>
    %65 = tpu.matmul %62, %64, %cst_57 {dimension_numbers = #tpu.dot_dimension_numbers<[1], [0], [0], [1], [0, 0, 1, 1], [], []>} : vector<144x128xbf16>, vector<128x128xbf16>, vector<144x128xf32> -> vector<144x128xf32>
    %66 = arith.addf %61, %65 : vector<144x128xf32>
    %c36 = arith.constant 36 : index
    %c0_58 = arith.constant 0 : index
    %67 = vector.load %arg13[%c36, %c0_58] : memref<188x128xbf16, #tpu.memory_space<vmem>>, vector<144x128xbf16>
    %c2_59 = arith.constant 2 : index
    %c0_60 = arith.constant 0 : index
    %c0_61 = arith.constant 0 : index
    %c0_62 = arith.constant 0 : index
    %68 = vector.load %arg10[%c2_59, %c0_60, %c0_61, %c0_62] : memref<3x3x128x128xbf16, #tpu.memory_space<vmem>>, vector<1x1x128x128xbf16>
    %69 = vector.shape_cast %68 : vector<1x1x128x128xbf16> to vector<128x128xbf16>
    %cst_63 = arith.constant dense<0.000000e+00> : vector<144x128xf32>
    %70 = tpu.matmul %67, %69, %cst_63 {dimension_numbers = #tpu.dot_dimension_numbers<[1], [0], [0], [1], [0, 0, 1, 1], [], []>} : vector<144x128xbf16>, vector<128x128xbf16>, vector<144x128xf32> -> vector<144x128xf32>
    %71 = arith.addf %66, %70 : vector<144x128xf32>
    %c37 = arith.constant 37 : index
    %c0_64 = arith.constant 0 : index
    %72 = vector.load %arg13[%c37, %c0_64] : memref<188x128xbf16, #tpu.memory_space<vmem>>, vector<144x128xbf16>
    %c2_65 = arith.constant 2 : index
    %c1_66 = arith.constant 1 : index
    %c0_67 = arith.constant 0 : index
    %c0_68 = arith.constant 0 : index
    %73 = vector.load %arg10[%c2_65, %c1_66, %c0_67, %c0_68] : memref<3x3x128x128xbf16, #tpu.memory_space<vmem>>, vector<1x1x128x128xbf16>
    %74 = vector.shape_cast %73 : vector<1x1x128x128xbf16> to vector<128x128xbf16>
    %cst_69 = arith.constant dense<0.000000e+00> : vector<144x128xf32>
    %75 = tpu.matmul %72, %74, %cst_69 {dimension_numbers = #tpu.dot_dimension_numbers<[1], [0], [0], [1], [0, 0, 1, 1], [], []>} : vector<144x128xbf16>, vector<128x128xbf16>, vector<144x128xf32> -> vector<144x128xf32>
    %76 = arith.addf %71, %75 : vector<144x128xf32>
    %c38 = arith.constant 38 : index
    %c0_70 = arith.constant 0 : index
    %77 = vector.load %arg13[%c38, %c0_70] : memref<188x128xbf16, #tpu.memory_space<vmem>>, vector<144x128xbf16>
    %c2_71 = arith.constant 2 : index
    %c2_72 = arith.constant 2 : index
    %c0_73 = arith.constant 0 : index
    %c0_74 = arith.constant 0 : index
    %78 = vector.load %arg10[%c2_71, %c2_72, %c0_73, %c0_74] : memref<3x3x128x128xbf16, #tpu.memory_space<vmem>>, vector<1x1x128x128xbf16>
    %79 = vector.shape_cast %78 : vector<1x1x128x128xbf16> to vector<128x128xbf16>
    %cst_75 = arith.constant dense<0.000000e+00> : vector<144x128xf32>
    %80 = tpu.matmul %77, %79, %cst_75 {dimension_numbers = #tpu.dot_dimension_numbers<[1], [0], [0], [1], [0, 0, 1, 1], [], []>} : vector<144x128xbf16>, vector<128x128xbf16>, vector<144x128xf32> -> vector<144x128xf32>
    %81 = arith.addf %76, %80 : vector<144x128xf32>
    %c0_76 = arith.constant 0 : index
    %c0_77 = arith.constant 0 : index
    %82 = vector.load %arg4[%c0_76, %c0_77] : memref<144x1xf32, #tpu.memory_space<vmem>>, vector<144x1xf32>
    %83 = vector.broadcast %82 : vector<144x1xf32> to vector<144x128xf32>
    %84 = arith.mulf %81, %83 : vector<144x128xf32>
    %cst_78 = arith.constant 0.000000e+00 : f32
    %85 = vector.broadcast %cst_78 : f32 to vector<1x128xf32>
    %86 = vector.extract_strided_slice %84 {offsets = [0, 0], sizes = [143, 128], strides = [1, 1]} : vector<144x128xf32> to vector<143x128xf32>
    %87 = tpu.concatenate %85, %86 in 0 : vector<1x128xf32>, vector<143x128xf32> -> vector<144x128xf32>
    %88 = arith.truncf %87 : vector<144x128xf32> to vector<144x128xbf16>
    %c0_79 = arith.constant 0 : index
    %c0_80 = arith.constant 0 : index
    %c0_81 = arith.constant 0 : index
    %89 = vector.load %arg11[%c0_79, %c0_80, %c0_81] : memref<1x144x128xbf16, #tpu.memory_space<vmem>>, vector<1x144x128xbf16>
    %90 = vector.shape_cast %89 : vector<1x144x128xbf16> to vector<144x128xbf16>
    %91 = vector.shape_cast %88 : vector<144x128xbf16> to vector<1x144x128xbf16>
    tpu.vector_store %arg11[%c0_79, %c0_80, %c0_81], %91 {strides = array<i32>} : memref<1x144x128xbf16, #tpu.memory_space<vmem>>, vector<1x144x128xbf16>,
    %cst_82 = arith.constant dense<0.000000e+00> : vector<128xf32>
    %92 = vector.multi_reduction <add>, %84, %cst_82 [0] : vector<144x128xf32> to vector<128xf32>
    %93 = vector.shape_cast %92 : vector<128xf32> to vector<1x128xf32>
    %c0_83 = arith.constant 0 : index
    %c0_84 = arith.constant 0 : index
    %c0_85 = arith.constant 0 : index
    %c0_86 = arith.constant 0 : index
    %94 = vector.load %arg12[%c0_83, %c0_84, %c0_85, %c0_86] : memref<1x1x2x128xf32, #tpu.memory_space<vmem>>, vector<1x1x1x128xf32>
    %95 = vector.shape_cast %94 : vector<1x1x1x128xf32> to vector<1x128xf32>
    %96 = vector.shape_cast %93 : vector<1x128xf32> to vector<1x1x1x128xf32>
    tpu.vector_store %arg12[%c0_83, %c0_84, %c0_85, %c0_86], %96 {strides = array<i32>} : memref<1x1x2x128xf32, #tpu.memory_space<vmem>>, vector<1x1x1x128xf32>,
    %97 = arith.mulf %84, %84 : vector<144x128xf32>
    %cst_87 = arith.constant dense<0.000000e+00> : vector<128xf32>
    %98 = vector.multi_reduction <add>, %97, %cst_87 [0] : vector<144x128xf32> to vector<128xf32>
    %99 = vector.shape_cast %98 : vector<128xf32> to vector<1x128xf32>
    %c0_88 = arith.constant 0 : index
    %c0_89 = arith.constant 0 : index
    %c1_90 = arith.constant 1 : index
    %c0_91 = arith.constant 0 : index
    %100 = vector.load %arg12[%c0_88, %c0_89, %c1_90, %c0_91] : memref<1x1x2x128xf32, #tpu.memory_space<vmem>>, vector<1x1x1x128xf32>
    %101 = vector.shape_cast %100 : vector<1x1x1x128xf32> to vector<1x128xf32>
    %102 = vector.shape_cast %99 : vector<1x128xf32> to vector<1x1x1x128xf32>
    tpu.vector_store %arg12[%c0_88, %c0_89, %c1_90, %c0_91], %102 {strides = array<i32>} : memref<1x1x2x128xf32, #tpu.memory_space<vmem>>, vector<1x1x1x128xf32>,
    return
  }
  func.func @transform_0(%arg0: i32, %arg1: i32, %arg2: i32) -> (i32, i32) {
    %c0_i32 = arith.constant 0 : i32
    %c0_i32_0 = arith.constant 0 : i32
    %c0_i32_1 = arith.constant 0 : i32
    return %c0_i32, %c0_i32_0 : i32, i32
  }
  func.func @transform_1(%arg0: i32, %arg1: i32, %arg2: i32) -> (i32, i32) {
    %c0_i32 = arith.constant 0 : i32
    %c0_i32_0 = arith.constant 0 : i32
    %c0_i32_1 = arith.constant 0 : i32
    return %c0_i32, %c0_i32_0 : i32, i32
  }
  func.func @transform_2(%arg0: i32, %arg1: i32, %arg2: i32) -> (i32, i32) {
    %c0_i32 = arith.constant 0 : i32
    %c0_i32_0 = arith.constant 0 : i32
    return %c0_i32, %arg2 : i32, i32
  }
  func.func @transform_3(%arg0: i32, %arg1: i32, %arg2: i32) -> (i32, i32) {
    %c0_i32 = arith.constant 0 : i32
    %c0_i32_0 = arith.constant 0 : i32
    return %c0_i32, %arg2 : i32, i32
  }
  func.func @transform_4(%arg0: i32, %arg1: i32, %arg2: i32) -> (i32, i32, i32) {
    %c0_i32 = arith.constant 0 : i32
    return %arg0, %arg1, %arg2 : i32, i32, i32
  }
  func.func @transform_5(%arg0: i32, %arg1: i32, %arg2: i32) -> (i32, i32, i32, i32) {
    %c8_i32 = arith.constant 8 : i32
    %0 = arith.muli %arg1, %c8_i32 : i32
    %c1_i32 = arith.constant 1 : i32
    %1 = arith.subi %0, %c1_i32 : i32
    %c0_i32 = arith.constant 0 : i32
    %2 = arith.maxsi %1, %c0_i32 : i32
    %c0_i32_0 = arith.constant 0 : i32
    %c0_i32_1 = arith.constant 0 : i32
    return %arg0, %2, %c0_i32_0, %arg2 : i32, i32, i32, i32
  }
  func.func @transform_6(%arg0: i32, %arg1: i32, %arg2: i32) -> (i32, i32, i32, i32) {
    %c8_i32 = arith.constant 8 : i32
    %0 = arith.muli %arg1, %c8_i32 : i32
    %c8_i32_0 = arith.constant 8 : i32
    %1 = arith.addi %0, %c8_i32_0 : i32
    %c15_i32 = arith.constant 15 : i32
    %2 = arith.minsi %1, %c15_i32 : i32
    %c0_i32 = arith.constant 0 : i32
    %c0_i32_1 = arith.constant 0 : i32
    return %arg0, %2, %c0_i32, %arg2 : i32, i32, i32, i32
  }
  func.func @transform_7(%arg0: i32, %arg1: i32, %arg2: i32) -> (i32, i32, i32, i32) {
    %c0_i32 = arith.constant 0 : i32
    %c0_i32_0 = arith.constant 0 : i32
    %c0_i32_1 = arith.constant 0 : i32
    %c0_i32_2 = arith.constant 0 : i32
    return %c0_i32, %c0_i32_0, %arg2, %c0_i32_1 : i32, i32, i32, i32
  }
  func.func @transform_8(%arg0: i32, %arg1: i32, %arg2: i32) -> (i32, i32, i32) {
    %c0_i32 = arith.constant 0 : i32
    %c0_i32_0 = arith.constant 0 : i32
    return %arg0, %arg1, %c0_i32 : i32, i32, i32
  }
  func.func @transform_9(%arg0: i32, %arg1: i32, %arg2: i32) -> (i32, i32, i32, i32) {
    %c0_i32 = arith.constant 0 : i32
    %c0_i32_0 = arith.constant 0 : i32
    %c0_i32_1 = arith.constant 0 : i32
    return %arg0, %arg1, %c0_i32, %c0_i32_0 : i32, i32, i32, i32
  }
}

</mosaic_0001>

<bundles_post_ra>
// kernel: upsample_bn_forward.5
= control target key start
LH: loop header
LB: loop body
LE: loop exit
PB: predicated region body
PF: predicated region fallthrough
CT: control target
= control target key end

     0   :  { %s608_s12 = smov 0   ;;  %s610_s13 = smov 0   ;;  %s740_s0 = inlined_call_operand.vmem [shape: bf16[2,288,128], index: 0, kind: input, shape index: {}]   ;;  %s741_s1 = inlined_call_operand.vmem [shape: f32[1,128], index: 1, kind: input, shape index: {}]   ;;  %s742_s2 = inlined_call_operand.vmem [shape: f32[1,128], index: 2, kind: input, shape index: {}]   ;;  %s743_s3 = inlined_call_operand.vmem [shape: f32[2,288,128], index: 3, kind: output, shape index: {}]  }
   0x1   :  { %s612_s14 = smov 0   ;;  %s614_s15 = smov 0  }
   0x2   :  { %s616_s16 = smov 0  }
   0x3 LB: > { %s22_s17 = sadd.s32 1, %s578_s14  ;;  %s25_s18 = sadd.s32 1, %s582_s15  ;;  %s586_s16 = sphi %s616_s16, %s13_s16   ;;  %s582_s15 = sphi %s614_s15, %s747_s15   ;;  %s578_s14 = sphi %s612_s14, %s746_s14   ;;  %s574_s13 = sphi %s610_s13, %s745_s13   ;;  %s570_s12 = sphi %s608_s12, %s744_s12  }
   0x4   : > { %p23_p0 = scmp.ge.s32.totalorder %s22_s17, 2  ;;  %p456_p1 = scmp.ge.s32.totalorder %s586_s16, 1 }
   0x5   : > { %p158_p2 = scmp.lt.s32.totalorder %s586_s16, 5 }
   0x6   : > { %s749_s17 = smov (%p23_p0, %s22_s17), 0  ;;  %s751_s18 = smov (!%p23_p0, %s25_s18), %s582_s15 }
   0x7   : > { %p159_p3 = pnand %p456_p1, %p158_p2  ;;  %p27_p4 = scmp.ge.s32.totalorder %s751_s18, 2 }
   0x8   : > { %s190_s19 = smul.u32 (!%p159_p3), 18, %s570_s12  ;;  %p191_p5 = scmp.lt.s32.totalorder (!%p159_p3), %s574_s13, 1 }
   0x9   : > { %s753_s18 = smov (%p27_p4, %s751_s18), 0  ;;  %162 = sbr.rel (%p159_p3) target bundleno = 53 (0x35), region = 32 }
   0xa   : > { %p193_p6 = scmp.lt.s32.totalorder (!%p159_p3), %s190_s19, 35 }
   0xe   : > { %s755_s13 = smov (!%p191_p5, %s574_s13), 1  ;;  %s757_s19 = smov (!%p193_p6, %s190_s19), 35  ;;  %v649_v0 = vld [vmem:[%s741_s1] ss:$0 sm:$0xff] }
   0xf   : > { %s505_s20 = smul.u32 36, %s755_s13  ;;  %v657_v5 = vld [vmem:[%s742_s2] ss:$0 sm:$0xff] }
  0x11   : > { %s638_s21 = sadd.s32 %s505_s20, %s757_s19 }
  0x12   : > { %s457_s22 = sshll.u32 %s638_s21, 2  ;;  %s458_s30 = sshll.u32 %s638_s21, 3 }
  0x13   : > { %s644_s25 = scalar_lea.vmem %s740_s0, %s457_s22  ;;  %s680_s6 = scalar_lea.vmem %s743_s3, %s458_s30 }
  0x14   : > { %v462_v1 = vld [vmem:[%s644_s25] sm:$0xff]   ;;  %v497_v2 = vld [vmem:[%s644_s25 + $0x8] sm:$0xff]   ;;  %v498_v3 = vld [vmem:[%s644_s25 + $0x10] sm:$0xff]  }
  0x15   : > { %v463_v4 = vunpack.c.l.bf16 %v462_v1  ;;  %v464_v6 = vunpack.c.h.bf16 %v462_v1  ;;  %v467_v7 = vunpack.c.l.bf16 %v497_v2  ;;  %v468_v8 = vunpack.c.h.bf16 %v497_v2  ;;  %v499_v9 = vld [vmem:[%s644_s25 + $0x18] sm:$0xff]   ;;  %v500_v37 = vld [vmem:[%s644_s25 + $0x20] sm:$0xff]   ;;  %v501_v41 = vld [vmem:[%s644_s25 + $0x28] sm:$0xff]  }
  0x16   : > { %v471_v10 = vunpack.c.l.bf16 %v498_v3  ;;  %v472_v11 = vunpack.c.h.bf16 %v498_v3  ;;  %v475_v12 = vunpack.c.l.bf16 %v499_v9  ;;  %v476_v13 = vunpack.c.h.bf16 %v499_v9  ;;  %v502_v42 = vld [vmem:[%s644_s25 + $0x30] sm:$0xff]   ;;  %v503_v49 = vld [vmem:[%s644_s25 + $0x38] sm:$0xff]  }
  0x17   : > { %v250_v14 = vmul.f32 %v649_v0, %v463_v4  ;;  %v251_v15 = vmul.f32 %v649_v0, %v464_v6  ;;  %v252_v16 = vmul.f32 %v649_v0, %v467_v7  ;;  %v253_v17 = vmul.f32 %v649_v0, %v468_v8  ;;  %v504_v8 = vld [vmem:[%s644_s25 + $0x40] sm:$0xff]  }
  0x18   : > { %v254_v18 = vmul.f32 %v649_v0, %v471_v10  ;;  %v255_v19 = vmul.f32 %v649_v0, %v472_v11  ;;  %v256_v20 = vmul.f32 %v649_v0, %v475_v12  ;;  %v257_v21 = vmul.f32 %v649_v0, %v476_v13 }
  0x19   : > { %v272_v22 = vadd.f32 %v657_v5, %v250_v14  ;;  %v273_v23 = vadd.f32 %v657_v5, %v251_v15  ;;  %v274_v24 = vadd.f32 %v657_v5, %v252_v16  ;;  %v275_v25 = vadd.f32 %v657_v5, %v253_v17 }
  0x1a   : > { %v276_v26 = vadd.f32 %v657_v5, %v254_v18  ;;  %v277_v27 = vadd.f32 %v657_v5, %v255_v19  ;;  %v278_v28 = vadd.f32 %v657_v5, %v256_v20  ;;  %v279_v29 = vadd.f32 %v657_v5, %v257_v21 }
  0x1b   : > { %vm290_vm0 = vcmp.ge.f32.partialorder %v272_v22, 0.0  ;;  %v308_v30 = vmul.f32 0.01, %v272_v22  ;;  %vm291_vm1 = vcmp.ge.f32.partialorder %v273_v23, 0.0  ;;  %v309_v31 = vmul.f32 0.01, %v273_v23 }
  0x1c   : > { %vm292_vm2 = vcmp.ge.f32.partialorder %v274_v24, 0.0  ;;  %v310_v32 = vmul.f32 0.01, %v274_v24  ;;  %vm293_vm3 = vcmp.ge.f32.partialorder %v275_v25, 0.0  ;;  %v311_v33 = vmul.f32 0.01, %v275_v25 }
  0x1d   : > { %v326_v34 = vsel %vm290_vm0, %v272_v22, %v308_v30  ;;  %v327_v35 = vsel %vm291_vm1, %v273_v23, %v309_v31  ;;  %vm294_vm4 = vcmp.ge.f32.partialorder %v276_v26, 0.0  ;;  %v312_v36 = vmul.f32 0.01, %v276_v26 }
  0x1e   : > { %344 = vst [vmem:[%s680_s6] sm:$0xff] %v326_v34  ;;  %v328_v38 = vsel %vm292_vm2, %v274_v24, %v310_v32  ;;  %v329_v39 = vsel %vm293_vm3, %v275_v25, %v311_v33  ;;  %vm295_vm5 = vcmp.ge.f32.partialorder %v277_v27, 0.0  ;;  %v313_v40 = vmul.f32 0.01, %v277_v27 }
  0x1f   : > { %345 = vst [vmem:[%s680_s6 + $0x8] sm:$0xff] %v327_v35  ;;  %v330_v43 = vsel %vm294_vm4, %v276_v26, %v312_v36  ;;  %vm296_vm6 = vcmp.ge.f32.partialorder %v278_v28, 0.0  ;;  %v314_v44 = vmul.f32 0.01, %v278_v28  ;;  %vm297_vm7 = vcmp.ge.f32.partialorder %v279_v29, 0.0 }
  0x20   : > { %346 = vst [vmem:[%s680_s6 + $0x10] sm:$0xff] %v328_v38  ;;  %v331_v45 = vsel %vm295_vm5, %v277_v27, %v313_v40  ;;  %v315_v46 = vmul.f32 0.01, %v279_v29  ;;  %v479_v47 = vunpack.c.l.bf16 %v500_v37  ;;  %v480_v48 = vunpack.c.h.bf16 %v500_v37 }
  0x21   : > { %347 = vst [vmem:[%s680_s6 + $0x18] sm:$0xff] %v329_v39  ;;  %v332_v50 = vsel %vm296_vm6, %v278_v28, %v314_v44  ;;  %v483_v51 = vunpack.c.l.bf16 %v501_v41  ;;  %v484_v52 = vunpack.c.h.bf16 %v501_v41  ;;  %v487_v53 = vunpack.c.l.bf16 %v502_v42 }
  0x22   : > { %348 = vst [vmem:[%s680_s6 + $0x20] sm:$0xff] %v330_v43  ;;  %v333_v54 = vsel %vm297_vm7, %v279_v29, %v315_v46  ;;  %v258_v55 = vmul.f32 %v649_v0, %v479_v47  ;;  %v259_v56 = vmul.f32 %v649_v0, %v480_v48  ;;  %v488_v57 = vunpack.c.h.bf16 %v502_v42 }
  0x23   : > { %349 = vst [vmem:[%s680_s6 + $0x28] sm:$0xff] %v331_v45  ;;  %v260_v58 = vmul.f32 %v649_v0, %v483_v51  ;;  %v261_v59 = vmul.f32 %v649_v0, %v484_v52  ;;  %v262_v60 = vmul.f32 %v649_v0, %v487_v53  ;;  %v491_v61 = vunpack.c.l.bf16 %v503_v49 }
  0x24   : > { %350 = vst [vmem:[%s680_s6 + $0x30] sm:$0xff] %v332_v50  ;;  %v280_v62 = vadd.f32 %v657_v5, %v258_v55  ;;  %v281_v63 = vadd.f32 %v657_v5, %v259_v56  ;;  %v263_v1 = vmul.f32 %v649_v0, %v488_v57  ;;  %v492_v2 = vunpack.c.h.bf16 %v503_v49 }
  0x25   : > { %351 = vst [vmem:[%s680_s6 + $0x38] sm:$0xff] %v333_v54  ;;  %v282_v3 = vadd.f32 %v657_v5, %v260_v58  ;;  %v283_v4 = vadd.f32 %v657_v5, %v261_v59  ;;  %v284_v6 = vadd.f32 %v657_v5, %v262_v60  ;;  %v264_v7 = vmul.f32 %v649_v0, %v491_v61 }
  0x26   : > { %vm298_vm8 = vcmp.ge.f32.partialorder %v280_v62, 0.0  ;;  %v316_v9 = vmul.f32 0.01, %v280_v62  ;;  %vm299_vm9 = vcmp.ge.f32.partialorder %v281_v63, 0.0  ;;  %v317_v10 = vmul.f32 0.01, %v281_v63 }
  0x27   : > { %vm300_vm10 = vcmp.ge.f32.partialorder %v282_v3, 0.0  ;;  %v318_v11 = vmul.f32 0.01, %v282_v3  ;;  %vm301_vm11 = vcmp.ge.f32.partialorder %v283_v4, 0.0  ;;  %v319_v12 = vmul.f32 0.01, %v283_v4 }
  0x28   : > { %v334_v13 = vsel %vm298_vm8, %v280_v62, %v316_v9  ;;  %v335_v14 = vsel %vm299_vm9, %v281_v63, %v317_v10  ;;  %vm302_vm12 = vcmp.ge.f32.partialorder %v284_v6, 0.0  ;;  %v320_v15 = vmul.f32 0.01, %v284_v6 }
  0x29   : > { %352 = vst [vmem:[%s680_s6 + $0x40] sm:$0xff] %v334_v13  ;;  %v336_v16 = vsel %vm300_vm10, %v282_v3, %v318_v11  ;;  %v337_v17 = vsel %vm301_vm11, %v283_v4, %v319_v12  ;;  %v285_v18 = vadd.f32 %v657_v5, %v263_v1  ;;  %v286_v19 = vadd.f32 %v657_v5, %v264_v7 }
  0x2a   : > { %353 = vst [vmem:[%s680_s6 + $0x48] sm:$0xff] %v335_v14  ;;  %v338_v20 = vsel %vm302_vm12, %v284_v6, %v320_v15  ;;  %v265_v21 = vmul.f32 %v649_v0, %v492_v2  ;;  %v495_v22 = vunpack.c.l.bf16 %v504_v8  ;;  %v496_v23 = vunpack.c.h.bf16 %v504_v8 }
  0x2b   : > { %354 = vst [vmem:[%s680_s6 + $0x50] sm:$0xff] %v336_v16  ;;  %vm303_vm13 = vcmp.ge.f32.partialorder %v285_v18, 0.0  ;;  %v321_v24 = vmul.f32 0.01, %v285_v18  ;;  %vm304_vm14 = vcmp.ge.f32.partialorder %v286_v19, 0.0 }
  0x2c   : > { %355 = vst [vmem:[%s680_s6 + $0x58] sm:$0xff] %v337_v17  ;;  %v322_v25 = vmul.f32 0.01, %v286_v19  ;;  %v287_v26 = vadd.f32 %v657_v5, %v265_v21  ;;  %v266_v27 = vmul.f32 %v649_v0, %v495_v22  ;;  %v267_v28 = vmul.f32 %v649_v0, %v496_v23 }
  0x2d   : > { %356 = vst [vmem:[%s680_s6 + $0x60] sm:$0xff] %v338_v20  ;;  %v339_v29 = vsel %vm303_vm13, %v285_v18, %v321_v24 }
  0x2e   : > { %357 = vst [vmem:[%s680_s6 + $0x68] sm:$0xff] %v339_v29  ;;  %v340_v30 = vsel %vm304_vm14, %v286_v19, %v322_v25  ;;  %vm305_vm15 = vcmp.ge.f32.partialorder %v287_v26, 0.0  ;;  %v323_v31 = vmul.f32 0.01, %v287_v26  ;;  %v288_v32 = vadd.f32 %v657_v5, %v266_v27 }
  0x2f   : > { %358 = vst [vmem:[%s680_s6 + $0x70] sm:$0xff] %v340_v30  ;;  %v289_v33 = vadd.f32 %v657_v5, %v267_v28 }
  0x30   : > { %v341_v34 = vsel %vm305_vm15, %v287_v26, %v323_v31  ;;  %vm306_vm0 = vcmp.ge.f32.partialorder %v288_v32, 0.0  ;;  %v324_v35 = vmul.f32 0.01, %v288_v32 }
  0x31   : > { %359 = vst [vmem:[%s680_s6 + $0x78] sm:$0xff] %v341_v34  ;;  %vm307_vm1 = vcmp.ge.f32.partialorder %v289_v33, 0.0  ;;  %v325_v36 = vmul.f32 0.01, %v289_v33 }
  0x32   : > { %v342_v0 = vsel %vm306_vm0, %v288_v32, %v324_v35 }
  0x33   : > { %360 = vst [vmem:[%s680_s6 + $0x80] sm:$0xff] %v342_v0  ;;  %v343_v37 = vsel %vm307_vm1, %v289_v33, %v325_v36 }
  0x34   : > { %361 = vst [vmem:[%s680_s6 + $0x88] sm:$0xff] %v343_v37 }
  0x35 PF: > { %s13_s16 = sadd.s32 1, %s586_s16   ;;  %s744_s12 = smov %s578_s14 }
  0x36   : > { %p10_p7 = scmp.ge.s32.totalorder %s13_s16, 6   ;;  %s745_s13 = smov %s582_s15 }
  0x37   : > { %s746_s14 = smov %s749_s17  ;;  %s747_s15 = smov %s753_s18 }
  0x38   :  { %12 = sbr.rel (!%p10_p7) target bundleno = 3 (0x3), region = 62 }

// kernel: upsample_bn_forward.3
= control target key start
LH: loop header
LB: loop body
LE: loop exit
PB: predicated region body
PF: predicated region fallthrough
CT: control target
= control target key end

     0   :  { %s4045_s28 = smov 0   ;;  %s4047_s3 = smov 0   ;;  %s4883_s0 = inlined_call_operand.vmem [shape: f32[144,1], index: 0, kind: input, shape index: {}]   ;;  %s4884_s1 = inlined_call_operand.vmem [shape: f32[144,1], index: 1, kind: input, shape index: {}]   ;;  %s4885_s2 = inlined_call_operand.vmem [shape: f32[1,128], index: 2, kind: input, shape index: {}, may-alias: {2,3}]   ;;  %s4886_s3 = inlined_call_operand.vmem [shape: f32[1,128], index: 3, kind: input, shape index: {}, may-alias: {2,3}]   ;;  %s4887_s4 = inlined_call_operand.vmem [shape: bf16[2,288,128], index: 4, kind: input, shape index: {}]   ;;  %s4888_s5 = inlined_call_operand.vmem [shape: bf16[2,16,18,128], index: 5, kind: input, shape index: {}, may-alias: {5,6}]   ;;  %s4889_s6 = inlined_call_operand.vmem [shape: bf16[2,16,18,128], index: 6, kind: input, shape index: {}, may-alias: {5,6}]   ;;  %s4890_s7 = inlined_call_operand.vmem [shape: bf16[3,3,128,128], index: 7, kind: input, shape index: {}]   ;;  %s4891_s8 = inlined_call_operand.vmem [shape: bf16[2,288,128], index: 8, kind: output, shape index: {0}]   ;;  %s4892_s9 = inlined_call_operand.vmem [shape: f32[2,2,2,128], index: 9, kind: output, shape index: {1}]  }
   0x1   :  { %s4049_s29 = smov 0   ;;  %s4051_s30 = smov 0  }
   0x2   :  { %s4053_s10 = smov 0  }
   0x3 LB: > { %s35_s11 = sadd.s32 1, %s3982_s29  ;;  %s39_s12 = sadd.s32 1, %s3986_s30  ;;  %s3990_s10 = sphi %s4053_s10, %s20_s10   ;;  %s3986_s30 = sphi %s4051_s30, %s4898_s30   ;;  %s3982_s29 = sphi %s4049_s29, %s4897_s29   ;;  %s3978_s3 = sphi %s4047_s3, %s4896_s3   ;;  %s3974_s28 = sphi %s4045_s28, %s4895_s28  }
   0x4   : > { %p37_p0 = scmp.ge.s32.totalorder %s35_s11, 2  ;;  %p3184_p1 = scmp.ge.s32.totalorder %s3990_s10, 1 }
   0x5   : > { %p426_p2 = scmp.lt.s32.totalorder %s3990_s10, 5 }
   0x6   : > { %s4900_s11 = smov (%p37_p0, %s35_s11), 0  ;;  %s4902_s12 = smov (!%p37_p0, %s39_s12), %s3986_s30 }
   0x7   : > { %p427_p3 = pnand %p3184_p1, %p426_p2  ;;  %p41_p4 = scmp.ge.s32.totalorder %s4902_s12, 2 }
   0x8   : > { %s530_s13 = smul.u32 (!%p427_p3), 18, %s3974_s28  ;;  %p531_p5 = scmp.lt.s32.totalorder (!%p427_p3), %s3978_s3, 1 }
   0x9   : > { %s4904_s12 = smov (%p41_p4, %s4902_s12), 0  ;;  %430 = sbr.rel (%p427_p3) target bundleno = 601 (0x259), region = 52 }
   0xa   : > { %s3186_s14 = sshll.u32 (!%p427_p3), %s3974_s28, 3  ;;  %p533_p6 = scmp.lt.s32.totalorder (!%p427_p3), %s530_s13, 35 }
   0xb   : > { %s3187_s15 = sadd.s32 (!%p427_p3), 4294967295, %s3186_s14  ;;  %s4088_s24 = sadd.s32 (!%p427_p3), 8, %s3186_s14 }
   0xc   : > { %p545_p7 = scmp.gt.s32.totalorder (!%p427_p3), %s3187_s15, 0  ;;  %p3188_p8 = scmp.lt.s32.totalorder (!%p427_p3), %s3187_s15, 15 }
   0xd   : > { %p565_p9 = scmp.lt.s32.totalorder (!%p427_p3), %s4088_s24, 15  ;;  %p601_p10 = scmp.lt.s32.totalorder (!%p427_p3), %s3974_s28, 1 }
   0xe   : > { %s4906_s3 = smov (!%p531_p5, %s3978_s3), 1  ;;  %s4908_s13 = smov (!%p533_p6, %s530_s13), 35  ;;  %vm644_vm0 = vcmask 1040384   ;;  %vm645_vm1 = vcmask 1044484  }
   0xf   : > { %s3902_s16 = smul.u32 36, %s4906_s3  ;;  %vm4100_vm2 = vmor %vm644_vm0, %vm645_vm1  ;;  %p3202_p11 = scmp.le.s32.totalorder %s3974_s28, 0 }
  0x10   : > { %s546_s17 = scalar_select %p545_p7, %s3187_s15, 0 }
  0x11   : > { %s539_s18 = sadd.s32 %s3902_s16, %s4908_s13  ;;  %s3904_s20 = smul.u32 48, %s4906_s3 }
  0x12   : > { %s3185_s19 = sshll.u32 %s539_s18, 2  ;;  %s4910_s17 = smov (!%p3188_p8, %s546_s17), 15 }
  0x13   : > { %s4086_s23 = scalar_lea.vmem %s4887_s4, %s3185_s19  ;;  %s4096_s26 = scalar_lea.vmem %s4891_s8, %s3185_s19 }
  0x14   : > { %v608_v0 = vld [vmem:[%s4086_s23] sm:$0xf]  ;;  %v609_v1 = vld [vmem:[%s4086_s23 + $0x4] sm:$0xf]  ;;  %v610_v4 = vld [vmem:[%s4086_s23 + $0x8] sm:$0xf] }
  0x15   : > { %v647_v2 = vrot.slane %v608_v0, 7  ;;  %v649_v3 = vrot.slane %v609_v1, 7  ;;  %s3903_s27 = smul.u32 3, %s4910_s17  ;;  %v652_v6 = vrot.slane %v610_v4, 7  ;;  %v611_v7 = vld [vmem:[%s4086_s23 + $0xc] sm:$0xf] }
  0x16   : > { %s566_s2 = scalar_select %p565_p9, %s4088_s24, 15  ;;  %v655_v10 = vrot.slane %v611_v7, 7  ;;  %v612_v12 = vld [vmem:[%s4086_s23 + $0x10] sm:$0xf]  ;;  %v613_v13 = vld [vmem:[%s4086_s23 + $0x14] sm:$0xf] }
  0x17   : > { %v648_v8 = vrot.slane %v647_v2, 4  ;;  %719 = vst [vmem:[#allocation2 + $0x8] sm:$0xe] %v647_v2  ;;  %v651_v9 = vrot.slane %v649_v3, 4  ;;  %s556_s13 = sadd.s32 %s3904_s20, %s3903_s27  ;;  %v654_v11 = vrot.slane %v652_v6, 4  ;;  %s3200_s15 = sshll.u32 %s4906_s3, 1 }
  0x18   : > { %s3193_s14 = sshll.u32 %s556_s13, 2  ;;  %v657_v16 = vrot.slane %v655_v10, 4  ;;  %v658_v17 = vrot.slane %v612_v12, 7  ;;  %v614_v18 = vld [vmem:[%s4086_s23 + $0x18] sm:$0xf]  ;;  %v661_v20 = vrot.slane %v613_v13, 7 }
  0x19   : > { %v650_v14 = vsel %vm4100_vm2, %v648_v8, %v649_v3  ;;  %v653_v15 = vsel %vm4100_vm2, %v651_v9, %v652_v6  ;;  %s4122_s18 = scalar_lea.vmem %s4888_s5, %s3193_s14  ;;  %v656_v19 = vsel %vm4100_vm2, %v654_v11, %v655_v10  ;;  %v664_v21 = vrot.slane %v614_v18, 7  ;;  %v615_v22 = vld [vmem:[%s4086_s23 + $0x1c] sm:$0xf]  ;;  %s4912_s2 = smov (!%p565_p9, %s566_s2), 15  ;;  %v616_v29 = vld [vmem:[%s4086_s23 + $0x20] sm:$0xf] }
  0x1a   : > { %720 = vst [vmem:[#allocation2 + $0xc] sm:$0xf] %v650_v14  ;;  %v659_v23 = vsel %vm4100_vm2, %v657_v16, %v658_v17  ;;  %v660_v24 = vrot.slane %v658_v17, 4  ;;  %v667_v25 = vrot.slane %v615_v22, 7  ;;  %s602_s19 = scalar_select %p601_p10, %s3974_s28, 1  ;;  %v663_v26 = vrot.slane %v661_v20, 4 }
  0x1b   : > { %721 = vst [vmem:[#allocation2 + $0x10] sm:$0xf] %v653_v15  ;;  %v666_v27 = vrot.slane %v664_v21, 4  ;;  %s3905_s21 = smul.u32 3, %s4912_s2  ;;  %v670_v33 = vrot.slane %v616_v29, 7 }
  0x1c   : > { %722 = vst [vmem:[#allocation2 + $0x14] sm:$0xf] %v656_v19  ;;  %v662_v28 = vsel %vm4100_vm2, %v660_v24, %v661_v20  ;;  %v669_v30 = vrot.slane %v667_v25, 4  ;;  %s604_s22 = sadd.s32 %s3200_s15, %s602_s19  ;;  %v665_v31 = vsel %vm4100_vm2, %v663_v26, %v664_v21  ;;  %v617_v34 = vld [vmem:[%s4086_s23 + $0x24] sm:$0xf] }
  0x1d   : > { %723 = vst [vmem:[#allocation2 + $0x18] sm:$0xf] %v659_v23  ;;  %v668_v32 = vsel %vm4100_vm2, %v666_v27, %v667_v25  ;;  %s576_s24 = sadd.s32 %s3905_s21, %s3904_s20  ;;  %s3201_s0 = sshll.u32 %s604_s22, 1  ;;  %v673_v35 = vrot.slane %v617_v34, 7  ;;  %v618_v36 = vld [vmem:[%s4086_s23 + $0x28] sm:$0xf] }
  0x1e   : > { %724 = vst [vmem:[#allocation2 + $0x1c] sm:$0xf] %v662_v28  ;;  %s3198_s25 = sshll.u32 %s576_s24, 2  ;;  %s4148_s13 = scalar_lea.vmem %s4892_s9, %s3201_s0  ;;  %v671_v37 = vsel %vm4100_vm2, %v669_v30, %v670_v33  ;;  %v672_v38 = vrot.slane %v670_v33, 4  ;;  %v676_v39 = vrot.slane %v618_v36, 7 }
  0x1f   : > { %725 = vst [vmem:[#allocation2 + $0x20] sm:$0xf] %v665_v31  ;;  %s4155_s14 = scalar_lea.vmem %s4889_s6, %s3198_s25  ;;  %v675_v40 = vrot.slane %v673_v35, 4  ;;  %v619_v41 = vld [vmem:[%s4086_s23 + $0x2c] sm:$0xf] }
  0x20   : > { %726 = vst [vmem:[#allocation2 + $0x24] sm:$0xf] %v668_v32  ;;  %v674_v42 = vsel %vm4100_vm2, %v672_v38, %v673_v35  ;;  %v678_v43 = vrot.slane %v676_v39, 4  ;;  %v679_v44 = vrot.slane %v619_v41, 7  ;;  %v620_v45 = vld [vmem:[%s4086_s23 + $0x30] sm:$0xf] }
  0x21   : > { %727 = vst [vmem:[#allocation2 + $0x28] sm:$0xf] %v671_v37  ;;  %v621_v46 = vld [vmem:[%s4086_s23 + $0x34] sm:$0xf]  ;;  %v677_v47 = vsel %vm4100_vm2, %v675_v40, %v676_v39  ;;  %v682_v48 = vrot.slane %v620_v45, 7 }
  0x22   : > { %728 = vst [vmem:[#allocation2 + $0x2c] sm:$0xf] %v674_v42  ;;  %v685_v49 = vrot.slane %v621_v46, 7  ;;  %v622_v50 = vld [vmem:[%s4086_s23 + $0x38] sm:$0xf]  ;;  %v680_v51 = vsel %vm4100_vm2, %v678_v43, %v679_v44  ;;  %v681_v52 = vrot.slane %v679_v44, 4 }
  0x23   : > { %729 = vst [vmem:[#allocation2 + $0x30] sm:$0xf] %v677_v47  ;;  %v688_v53 = vrot.slane %v622_v50, 7  ;;  %v623_v54 = vld [vmem:[%s4086_s23 + $0x3c] sm:$0xf]  ;;  %v684_v55 = vrot.slane %v682_v48, 4 }
  0x24   : > { %730 = vst [vmem:[#allocation2 + $0x34] sm:$0xf] %v680_v51  ;;  %v687_v56 = vrot.slane %v685_v49, 4  ;;  %v691_v57 = vrot.slane %v623_v54, 7  ;;  %v683_v58 = vsel %vm4100_vm2, %v681_v52, %v682_v48  ;;  %v624_v60 = vld [vmem:[%s4086_s23 + $0x40] sm:$0xf] }
  0x25   : > { %v690_v59 = vrot.slane %v688_v53, 4  ;;  %v625_v61 = vld [vmem:[%s4086_s23 + $0x44] sm:$0xf]  ;;  %731 = vst [vmem:[#allocation2 + $0x38] sm:$0xf] %v683_v58  ;;  %v686_v62 = vsel %vm4100_vm2, %v684_v55, %v685_v49  ;;  %v694_v1 = vrot.slane %v624_v60, 7 }
  0x26   : > { %v689_v63 = vsel %vm4100_vm2, %v687_v56, %v688_v53  ;;  %v693_v0 = vrot.slane %v691_v57, 4  ;;  %732 = vst [vmem:[#allocation2 + $0x3c] sm:$0xf] %v686_v62  ;;  %v697_v3 = vrot.slane %v625_v61, 7 }
  0x27   : > { %v692_v2 = vsel %vm4100_vm2, %v690_v59, %v691_v57  ;;  %733 = vst [vmem:[#allocation2 + $0x40] sm:$0xf] %v689_v63  ;;  %v696_v6 = vrot.slane %v694_v1, 4  ;;  %741 = sbr.rel (%p3202_p11) target bundleno = 47 (0x2f), region = 56 }
  0x28   : > { %v695_v4 = vsel %vm4100_vm2, %v693_v0, %v694_v1  ;;  %734 = vst [vmem:[#allocation2 + $0x44] sm:$0xf] %v692_v2  ;;  %v699_v7 = vrot.slane %v697_v3, 4 }
  0x29   : > { %735 = vst [vmem:[#allocation2 + $0x48] sm:$0xf] %v695_v4  ;;  %v698_v8 = vsel %vm4100_vm2, %v696_v6, %v697_v3 }
  0x2a   : > { %736 = vst [vmem:[#allocation2 + $0x4c] sm:$0xf] %v698_v8 }
  0x2b   : > { %737 = vst [vmem:[#allocation2 + $0x50] sm:$0x1] %v699_v7 }
  0x2c   : > { %v742_v9 = vld [vmem:[%s4122_s18] sm:$0xff]   ;;  %v744_v10 = vld [vmem:[%s4122_s18 + $0x8] sm:$0x1] }
  0x2d   : > { %745 = vst [vmem:[#allocation2] sm:$0xff] %v742_v9  }
  0x2e   : > { %747 = vst [vmem:[#allocation2 + $0x8] sm:$0x1] %v744_v10 }
  0x2f PF: > { %p3203_p12 = scmp.ne.s32.totalorder %s3974_s28, 0 }
  0x31   : > { %751 = sbr.rel (%p3203_p12) target bundleno = 58 (0x3a), region = 60 }
  0x36   : > { %v3992_v11 = vmov 0  }
  0x37   : > { %752 = vst [vmem:[#allocation2] sm:$0xf] %v3992_v11 }
  0x38   : > { %753 = vst [vmem:[#allocation2 + $0x4] sm:$0xf] %v3992_v11 }
  0x39   : > { %754 = vst [vmem:[#allocation2 + $0x8] sm:$0x1] %v3992_v11 }
  0x3a PF: > { %p3204_p13 = scmp.ge.s32.totalorder %s3974_s28, 1 }
  0x3c   : > { %758 = sbr.rel (%p3204_p13) target bundleno = 73 (0x49), region = 64 }
  0x41   : > { %v759_v12 = vld [vmem:[%s4155_s14] sm:$0xf]  ;;  %v760_v13 = vld [vmem:[%s4155_s14 + $0x4] sm:$0xf]  ;;  %v761_v14 = vld [vmem:[%s4155_s14 + $0x8] sm:$0x1] }
  0x42   : > { %v765_v15 = vrot.slane %v759_v12, 7  ;;  %v767_v16 = vrot.slane %v760_v13, 7  ;;  %v770_v17 = vrot.slane %v761_v14, 7 }
  0x44   : > { %775 = vst [vmem:[#allocation2 + $0x50] sm:$0xe] %v765_v15  ;;  %v766_v18 = vrot.slane %v765_v15, 4  ;;  %v769_v19 = vrot.slane %v767_v16, 4 }
  0x46   : > { %v768_v20 = vsel %vm4100_vm2, %v766_v18, %v767_v16  ;;  %v771_v21 = vsel %vm4100_vm2, %v769_v19, %v770_v17 }
  0x47   : > { %776 = vst [vmem:[#allocation2 + $0x54] sm:$0xf] %v768_v20 }
  0x48   : > { %777 = vst [vmem:[#allocation2 + $0x58] sm:$0x3] %v771_v21 }
  0x49 PF: > { %p3205_p0 = scmp.ne.s32.totalorder %s3974_s28, 1 }
  0x4b   : > { %781 = sbr.rel (%p3205_p0) target bundleno = 84 (0x54), region = 68 }
  0x50   : > { %v3993_v22 = vmov 0  }
  0x51   : > { %782 = vst [vmem:[#allocation2 + $0x50] sm:$0xe] %v3993_v22 }
  0x52   : > { %783 = vst [vmem:[#allocation2 + $0x54] sm:$0xf] %v3993_v22 }
  0x53   : > { %784 = vst [vmem:[#allocation2 + $0x58] sm:$0x3] %v3993_v22 }
  0x54 PF: > { %v3745_v23 = vld [vmem:[%s4890_s7 + $0x78] sm:$0xff]  ;;  %v3744_v5 = vld [vmem:[%s4890_s7 + $0x70] sm:$0xff]  ;;  %v3743_v24 = vld [vmem:[%s4890_s7 + $0x68] sm:$0xff]  ;;  %vm887_vm3 = vsmask.f32 7424  ;;  %vm1207_vm4 = vcmask 1046528  }
  0x55   : > { %3878 = vmatpush.bf16.msra.mxu1 %v3745_v23  ;;  %3879 = vmatpush.bf16.msra.mxu2 %v3745_v23  ;;  %v3742_v25 = vld [vmem:[%s4890_s7 + $0x60] sm:$0xff]  ;;  %v3741_v26 = vld [vmem:[%s4890_s7 + $0x58] sm:$0xff]  ;;  %v4210_v27 = vld [vmem:[#allocation2 + $0x10] sm:$0xff]  ;;  %vm1609_vm5 = vsmask.f32 6400  ;;  %vm2491_vm7 = vcmask 1044480  }
  0x56   : > { %3880 = vmatpush.bf16.msra.mxu3 %v3745_v23  ;;  %1021 = vmatpush.bf16.msra.mxu0 %v3745_v23  ;;  %v4212_v28 = vld [vmem:[#allocation2 + $0x28] sm:$0xff]  ;;  %v4214_v29 = vld [vmem:[#allocation2 + $0x18] sm:$0xff]  ;;  %v4216_v30 = vld [vmem:[#allocation2] sm:$0xff]   ;;  %v904_v32 = vshll.u32 %v4210_v27, 16  ;;  %v908_v38 = vshrl.u32 %v4210_v27, 16  ;;  %vm1849_vm8 = vcmask 1045504  }
  0x57   : > { %v3740_v31 = vld [vmem:[%s4890_s7 + $0x50] sm:$0xff]  ;;  %v928_v34 = vshll.u32 %v4212_v28, 16  ;;  %v4225_v35 = vld [vmem:[#allocation2 + $0x40] sm:$0xff]  ;;  %v891_v36 = vshll.u32 %v4216_v30, 16  ;;  %v821_v37 = vld [vmem:[#allocation2 + $0x48] sm:$0x1] }
  0x58   : > { %v4222_v33 = vld [vmem:[#allocation2 + $0x30] sm:$0xff]  ;;  %v912_v39 = vshll.u32 %v4214_v29, 16  ;;  %v4230_v40 = vld [vmem:[#allocation2 + $0x8] sm:$0xff]  ;;  %v876_v41 = vunpack.c.l.b16 %v821_v37  ;;  %v952_v42 = vshll.u32 %v4225_v35, 16  ;;  %v4236_v44 = vrot.slane %v904_v32, 1  ;;  %v3738_v55 = vld [vmem:[%s4890_s7 + $0x40] sm:$0xff] }
  0x59   : > { %3881 = vmatpush.bf16.msra.mxu1 %v3744_v5  ;;  %3882 = vmatpush.bf16.msra.mxu2 %v3744_v5  ;;  %v3739_v43 = vld [vmem:[%s4890_s7 + $0x48] sm:$0xff]  ;;  %v4238_v45 = vrot.slane %v928_v34, 1  ;;  %v932_v46 = vshrl.u32 %v4212_v28, 16  ;;  %v936_v47 = vshll.u32 %v4222_v33, 16  ;;  %v889_v49 = vshrl.u32 %v4216_v30, 16  ;;  %v3753_v60 = vld [vmem:[%s4890_s7 + $0xb8] sm:$0xff] }
  0x5a   : > { %3883 = vmatpush.bf16.msra.mxu3 %v3744_v5  ;;  %1022 = vmatpush.bf16.msra.mxu0 %v3744_v5  ;;  %v4242_v48 = vpack.c.b16 %v876_v41, %v876_v41  ;;  %v893_v50 = vrot.slane %v891_v36, 1  ;;  %v896_v51 = vshll.u32 %v4230_v40, 16  ;;  %v4246_v52 = vrot.slane %v952_v42, 1  ;;  %v3737_v61 = vld [vmem:[%s4890_s7 + $0x38] sm:$0xff]  ;;  %v3752_v7 = vld [vmem:[%s4890_s7 + $0xb0] sm:$0xff]  ;;  %v4281_v12 = vld [vmem:[#allocation2 + $0x20] sm:$0xff] }
  0x5b   : > { %v956_v53 = vshrl.u32 %v4225_v35, 16  ;;  %v910_v56 = vor.u32 %v908_v38, %v4236_v44  ;;  %v914_v57 = vrot.slane %v912_v39, 1  ;;  %v934_v58 = vor.u32 %v932_v46, %v4238_v45  ;;  %v3769_v4 = vld [vmem:[%s4890_s7 + $0xf8] sm:$0xff]  ;;  %v3736_v8 = vld [vmem:[%s4890_s7 + $0x30] sm:$0xff]  ;;  %v3751_v15 = vld [vmem:[%s4890_s7 + $0xa8] sm:$0xff] }
  0x5c   : > { %v960_v54 = vshll.u32 %v4242_v48, 16  ;;  %v938_v59 = vrot.slane %v936_v47, 1  ;;  %v894_v62 = vor.u32 %v893_v50, %v889_v49  ;;  %v898_v63 = vrot.slane %v896_v51, 1  ;;  %v3777_v6 = vld [vmem:[%s4890_s7 + $0x138] sm:$0xff]  ;;  %v3768_v9 = vld [vmem:[%s4890_s7 + $0xf0] sm:$0xff]  ;;  %v3735_v16 = vld [vmem:[%s4890_s7 + $0x28] sm:$0xff] }
  0x5d   : > { %3884 = vmatpush.bf16.msra.mxu1 %v3743_v24  ;;  %3885 = vmatpush.bf16.msra.mxu2 %v3743_v24  ;;  %v958_v0 = vor.u32 %v956_v53, %v4246_v52  ;;  %v915_v2 = vsel %vm887_vm3, %v910_v56, %v914_v57  ;;  %v4283_v13 = vld [vmem:[#allocation2 + $0x38] sm:$0xff]  ;;  %v3776_v14 = vld [vmem:[%s4890_s7 + $0x130] sm:$0xff]  ;;  %v916_v17 = vshrl.u32 %v4214_v29, 16  ;;  %v920_v18 = vshll.u32 %v4281_v12, 16  ;;  %v3767_v21 = vld [vmem:[%s4890_s7 + $0xe8] sm:$0xff] }
  0x5e   : > { %3886 = vmatpush.bf16.msra.mxu3 %v3743_v24  ;;  %1023 = vmatpush.bf16.msra.mxu0 %v3743_v24  ;;  %v962_v1 = vrot.slane %v960_v54, 1  ;;  %v939_v3 = vsel %vm887_vm3, %v934_v58, %v938_v59  ;;  %v899_v10 = vsel %vm887_vm3, %v894_v62, %v898_v63  ;;  %v940_v19 = vshrl.u32 %v4222_v33, 16  ;;  %v3775_v22 = vld [vmem:[%s4890_s7 + $0x128] sm:$0xff]  ;;  %v3750_v23 = vld [vmem:[%s4890_s7 + $0xa0] sm:$0xff]  ;;  %v3749_v37 = vld [vmem:[%s4890_s7 + $0x98] sm:$0xff] }
  0x5f   : > { %v944_v20 = vshll.u32 %v4283_v13, 16  ;;  %v3734_v5 = vld [vmem:[%s4890_s7 + $0x20] sm:$0xff]  ;;  %v900_v24 = vshrl.u32 %v4230_v40, 16  ;;  %v3733_v38 = vld [vmem:[%s4890_s7 + $0x18] sm:$0xff]  ;;  %v1356_v39 = vld [vmem:[#allocation2 + $0x8] sm:$0xe] }
  0x60   : > { %v963_v11 = vsel %vm887_vm3, %v958_v0, %v962_v1  ;;  %v3766_v34 = vld [vmem:[%s4890_s7 + $0xe0] sm:$0xff]  ;;  %v4323_v41 = vld [vmem:[#allocation2 + $0xc] sm:$0xf]  ;;  %v3765_v47 = vld [vmem:[%s4890_s7 + $0xd8] sm:$0xff]  ;;  %v1411_v53 = vunpack.c.l.b16 %v1356_v39  ;;  %v924_v1 = vshrl.u32 %v4281_v12, 16 }
  0x61   : > { %3887 = vmatpush.bf16.msra.mxu1 %v3742_v25  ;;  %3888 = vmatpush.bf16.msra.mxu2 %v3742_v25  ;;  %v946_v32 = vrot.slane %v944_v20, 1  ;;  %v3774_v36 = vld [vmem:[%s4890_s7 + $0x120] sm:$0xff]  ;;  %v902_v42 = vor.u32 %v900_v24, %v898_v63  ;;  %v3773_v49 = vld [vmem:[%s4890_s7 + $0x118] sm:$0xff]  ;;  %v3748_v50 = vld [vmem:[%s4890_s7 + $0x90] sm:$0xff]  ;;  %v1412_v54 = vunpack.c.l.b16 %v4323_v41  ;;  %vm2251_vm6 = vsmask.f32 5376 }
  0x62   : > { %3889 = vmatpush.bf16.msra.mxu3 %v3742_v25  ;;  %1024 = vmatpush.bf16.msra.mxu0 %v3742_v25  ;;  %v918_v25 = vor.u32 %v916_v17, %v914_v57  ;;  %v3732_v51 = vld [vmem:[%s4890_s7 + $0x10] sm:$0xff]  ;;  %v3747_v58 = vld [vmem:[%s4890_s7 + $0x88] sm:$0xff]  ;;  %v4411_v39 = vld [vmem:[#allocation2 + $0x18] sm:$0xff] }
  0x63   : > { %v3764_v56 = vld [vmem:[%s4890_s7 + $0xd0] sm:$0xff] }
  0x64   : > { %v3772_v57 = vld [vmem:[%s4890_s7 + $0x110] sm:$0xff] }
  0x65   : > { %3890 = vmatpush.bf16.msra.mxu1 %v3741_v26  ;;  %3891 = vmatpush.bf16.msra.mxu2 %v3741_v26 }
  0x66   : > { %3892 = vmatpush.bf16.msra.mxu3 %v3741_v26  ;;  %1025 = vmatpush.bf16.msra.mxu0 %v3741_v26  ;;  %v922_v26 = vrot.slane %v920_v18, 1  ;;  %v3762_v18 = vld [vmem:[%s4890_s7 + $0xc0] sm:$0xff] }
  0x69   : > { %3893 = vmatpush.bf16.msra.mxu1 %v3740_v31  ;;  %3894 = vmatpush.bf16.msra.mxu2 %v3740_v31 }
  0x6a   : > { %3895 = vmatpush.bf16.msra.mxu3 %v3740_v31  ;;  %1026 = vmatpush.bf16.msra.mxu0 %v3740_v31  ;;  %v942_v31 = vor.u32 %v940_v19, %v938_v59  ;;  %v4354_v59 = vld [vmem:[#allocation2 + $0x10] sm:$0xff]  ;;  %v3770_v19 = vld [vmem:[%s4890_s7 + $0x100] sm:$0xff] }
  0x6b   : > { %v1619_v63 = vshrl.u32 %v4354_v59, 16  ;;  %v1622_v0 = vshll.u32 %v4354_v59, 16 }
  0x6c   : > { %v947_v46 = vsel %vm887_vm3, %v942_v31, %v946_v32 }
  0x6d   : > { %3896 = vmatpush.bf16.msra.mxu1 %v3739_v43  ;;  %3897 = vmatpush.bf16.msra.mxu2 %v3739_v43 }
  0x6e   : > { %3898 = vmatpush.bf16.msra.mxu3 %v3739_v43  ;;  %1027 = vmatpush.bf16.msra.mxu0 %v3739_v43  ;;  %v923_v43 = vsel %vm887_vm3, %v918_v25, %v922_v26 }
  0x71   : > { %3899 = vmatpush.bf16.msra.mxu1 %v3738_v55  ;;  %3900 = vmatpush.bf16.msra.mxu2 %v3738_v55 }
  0x72   : > { %3901 = vmatpush.bf16.msra.mxu3 %v3738_v55  ;;  %1028 = vmatpush.bf16.msra.mxu0 %v3738_v55  ;;  %v907_v55 = vsel %vm887_vm3, %v902_v42, %v4236_v44  ;;  %v3731_v44 = vld [vmem:[%s4890_s7 + $0x8] sm:$0xff]  ;;  %v1628_v42 = vshrl.u32 %v4411_v39, 16 }
  0x74   : > { %1039 = vmatmul.bf16.vlgmr.msra.gmra.mxu1 %v915_v2  ;;  %1054 = vmatmul.bf16.vlgmr.msra.gmra.mxu2 %v939_v3  ;;  %v948_v2 = vshrl.u32 %v4283_v13, 16  ;;  %v3763_v3 = vld [vmem:[%s4890_s7 + $0xc8] sm:$0xff] }
  0x75   : > { %1284 = vmatpush.bf16.msrb.mxu2 %v3753_v60  ;;  %1132 = vmatpush.bf16.msrb.mxu1 %v3737_v61  ;;  %v1430_v60 = vpack.c.b16 %v1412_v54, %v1411_v53  ;;  %v1443_v53 = vrot.slane %v4411_v39, 1 }
  0x76   : > { %1516 = vmatpush.bf16.msrb.mxu3 %v3769_v4  ;;  %1756 = vmatpush.bf16.msrb.mxu0 %v3777_v6  ;;  %v3771_v4 = vld [vmem:[%s4890_s7 + $0x108] sm:$0xff]  ;;  %v3746_v6 = vld [vmem:[%s4890_s7 + $0x80] sm:$0xff]  ;;  %v950_v17 = vor.u32 %v948_v2, %v946_v32 }
  0x77   : > { %1029 = vmatmul.bf16.vlgmr.msra.gmra.mxu0 %v899_v10  ;;  %1069 = vmatmul.bf16.vlgmr.msra.gmra.mxu3 %v963_v11  ;;  %v1611_v61 = vshrl.u32 %v1430_v60, 16  ;;  %v1614_v62 = vshll.u32 %v1430_v60, 16  ;;  %v1440_v20 = vrot.slane %v1430_v60, 1  ;;  %v3807_v60 = vld [vmem:[%s4890_s7 + $0x1e8] sm:$0xff] }
  0x79   : > { %1285 = vmatpush.bf16.msrb.mxu2 %v3752_v7  ;;  %1133 = vmatpush.bf16.msrb.mxu1 %v3736_v8  ;;  %v3730_v7 = vld [vmem:[%s4890_s7] sm:$0xff]  ;;  %v3801_v8 = vld [vmem:[%s4890_s7 + $0x1b8] sm:$0xff]  ;;  %v1613_v10 = vrot.slane %v1611_v61, 1  ;;  %v1616_v11 = vrot.slane %v1614_v62, 2  ;;  %v3783_v61 = vld [vmem:[%s4890_s7 + $0x168] sm:$0xff] }
  0x7a   : > { %1517 = vmatpush.bf16.msrb.mxu3 %v3768_v9  ;;  %1757 = vmatpush.bf16.msrb.mxu0 %v3776_v14  ;;  %v3785_v9 = vld [vmem:[%s4890_s7 + $0x178] sm:$0xff]  ;;  %v1621_v14 = vrot.slane %v1619_v63, 1  ;;  %v4433_v62 = vld [vmem:[#allocation2 + $0x20] sm:$0xff] }
  0x7b   : > { %v1637_v63 = vshrl.u32 %v4433_v62, 16 }
  0x7d   : > { %1286 = vmatpush.bf16.msrb.mxu2 %v3751_v15  ;;  %1134 = vmatpush.bf16.msrb.mxu1 %v3735_v16  ;;  %v1624_v15 = vrot.slane %v1622_v0, 2  ;;  %v926_v16 = vor.u32 %v924_v1, %v922_v26  ;;  %v955_v26 = vsel %vm887_vm3, %v950_v17, %v4246_v52  ;;  %v3784_v52 = vld [vmem:[%s4890_s7 + $0x170] sm:$0xff]  ;;  %v1640_v0 = vshll.u32 %v4433_v62, 16 }
  0x7e   : > { %1518 = vmatpush.bf16.msrb.mxu3 %v3767_v21  ;;  %1758 = vmatpush.bf16.msrb.mxu0 %v3775_v22  ;;  %v1441_v21 = vrot.slane %v4354_v59, 1  ;;  %v3809_v22 = vld [vmem:[%s4890_s7 + $0x1f8] sm:$0xff]  ;;  %v1639_v1 = vrot.slane %v1637_v63, 1 }
  0x7f   : > { %v1625_v24 = vor.u32 %v1624_v15, %v1621_v14  ;;  %v931_v25 = vsel %vm887_vm3, %v926_v16, %v4238_v45  ;;  %v3808_v45 = vld [vmem:[%s4890_s7 + $0x1f0] sm:$0xff]  ;;  %v1642_v2 = vrot.slane %v1640_v0, 2  ;;  %v3782_v14 = vld [vmem:[%s4890_s7 + $0x160] sm:$0xff]  ;;  %v4452_v15 = vld [vmem:[#allocation2 + $0x28] sm:$0xff] }
  0x80   : > { %v1442_v31 = vsel %vm1207_vm4, %v1440_v20, %v1441_v21  ;;  %v1649_v16 = vshll.u32 %v4452_v15, 16  ;;  %v1447_v20 = vrot.slane %v4452_v15, 1  ;;  %v4506_v0 = vld [vmem:[#allocation2 + $0x40] sm:$0xff] }
  0x81   : > { %1287 = vmatpush.bf16.msrb.mxu2 %v3750_v23  ;;  %1135 = vmatpush.bf16.msrb.mxu1 %v3734_v5  ;;  %v3817_v23 = vld [vmem:[%s4890_s7 + $0x238] sm:$0xff]  ;;  %v1617_v5 = vor.u32 %v1616_v11, %v1613_v10  ;;  %v3798_v10 = vld [vmem:[%s4890_s7 + $0x1a0] sm:$0xff] }
  0x82   : > { %1519 = vmatpush.bf16.msrb.mxu3 %v3766_v34  ;;  %1759 = vmatpush.bf16.msrb.mxu0 %v3774_v36  ;;  %v3800_v34 = vld [vmem:[%s4890_s7 + $0x1b0] sm:$0xff]  ;;  %v3806_v11 = vld [vmem:[%s4890_s7 + $0x1e0] sm:$0xff] }
  0x83   : > { %v1626_v32 = vsel %vm1609_vm5, %v1617_v5, %v1625_v24  ;;  %v3816_v36 = vld [vmem:[%s4890_s7 + $0x230] sm:$0xff] }
  0x84   : > { %1044 = vmatmul.bf16.gmra.mxu1 %v923_v43  ;;  %1059 = vmatmul.bf16.gmra.mxu2 %v947_v46  ;;  %v1631_v43 = vshll.u32 %v4411_v39, 16 }
  0x85   : > { %1288 = vmatpush.bf16.msrb.mxu2 %v3749_v37  ;;  %1136 = vmatpush.bf16.msrb.mxu1 %v3733_v38  ;;  %v3867_v37 = vld [vmem:[#allocation2] sm:$0xf0]  ;;  %v3868_v38 = vld [vmem:[#allocation2] sm:$0xe] }
  0x86   : > { %1520 = vmatpush.bf16.msrb.mxu3 %v3765_v47  ;;  %1760 = vmatpush.bf16.msrb.mxu0 %v3773_v49  ;;  %v3869_v46 = vor.u32 %v3868_v38, %v3867_v37  ;;  %v1630_v47 = vrot.slane %v1628_v42, 1  ;;  %v1633_v49 = vrot.slane %v1631_v43, 2 }
  0x87   : > { %1034 = vmatmul.bf16.gmra.mxu0 %v907_v55 }
  0x88   : > { %v1634_v55 = vor.u32 %v1633_v49, %v1630_v47  ;;  %v3813_v47 = vld [vmem:[%s4890_s7 + $0x218] sm:$0xff] }
  0x89   : > { %1289 = vmatpush.bf16.msrb.mxu2 %v3748_v50  ;;  %1137 = vmatpush.bf16.msrb.mxu1 %v3732_v51  ;;  %v1208_v50 = vrot.slane %v3869_v46, 1  ;;  %v1209_v51 = vrot.slane %v4230_v40, 1  ;;  %v4487_v49 = vld [vmem:[#allocation2 + $0x38] sm:$0xff] }
  0x8a   : > { %1521 = vmatpush.bf16.msrb.mxu3 %v3764_v56  ;;  %1761 = vmatpush.bf16.msrb.mxu0 %v3772_v57  ;;  %v1444_v57 = vsel %vm1207_vm4, %v1441_v21, %v1443_v53 }
  0x8b   : > { %v1210_v56 = vsel %vm1207_vm4, %v1208_v50, %v1209_v51  ;;  %v1664_v50 = vshrl.u32 %v4487_v49, 16 }
  0x8d   : > { %1290 = vmatpush.bf16.msrb.mxu2 %v3747_v58  ;;  %1138 = vmatpush.bf16.msrb.mxu1 %v3731_v44  ;;  %v1635_v58 = vsel %vm1609_vm5, %v1625_v24, %v1634_v55  ;;  %v3799_v44 = vld [vmem:[%s4890_s7 + $0x1a8] sm:$0xff]  ;;  %v3814_v24 = vld [vmem:[%s4890_s7 + $0x220] sm:$0xff] }
  0x8e   : > { %1522 = vmatpush.bf16.msrb.mxu3 %v3763_v3  ;;  %1762 = vmatpush.bf16.msrb.mxu0 %v3771_v4  ;;  %v1211_v3 = vrot.slane %v4210_v27, 1  ;;  %v1445_v4 = vrot.slane %v4433_v62, 1 }
  0x91   : > { %1291 = vmatpush.bf16.msrb.mxu2 %v3746_v6  ;;  %1139 = vmatpush.bf16.msrb.mxu1 %v3730_v7  ;;  %v1643_v6 = vor.u32 %v1642_v2, %v1639_v1  ;;  %v1212_v7 = vsel %vm1207_vm4, %v1209_v51, %v1211_v3  ;;  %v1667_v51 = vshll.u32 %v4487_v49, 16  ;;  %v3812_v1 = vld [vmem:[%s4890_s7 + $0x210] sm:$0xff]  ;;  %v1673_v2 = vshrl.u32 %v4506_v0, 16 }
  0x92   : > { %1523 = vmatpush.bf16.msrb.mxu3 %v3762_v18  ;;  %1763 = vmatpush.bf16.msrb.mxu0 %v3770_v19  ;;  %v1651_v18 = vrot.slane %v1649_v16, 2  ;;  %v1213_v19 = vrot.slane %v4214_v29, 1 }
  0x94   : > { %1049 = vmatmul.bf16.gmra.mxu1 %v931_v25  ;;  %1064 = vmatmul.bf16.gmra.mxu2 %v955_v26  ;;  %v3797_v25 = vld [vmem:[%s4890_s7 + $0x198] sm:$0xff] }
  0x95   : > { %2158 = vmatpush.bf16.msra.mxu2 %v3801_v8  ;;  %1926 = vmatpush.bf16.msra.mxu1 %v3785_v9  ;;  %v1446_v8 = vsel %vm1207_vm4, %v1443_v53, %v1445_v4  ;;  %v1644_v9 = vsel %vm1609_vm5, %v1634_v55, %v1643_v6  ;;  %v3805_v26 = vld [vmem:[%s4890_s7 + $0x1d8] sm:$0xff]  ;;  %v1666_v53 = vrot.slane %v1664_v50, 1  ;;  %v1669_v55 = vrot.slane %v1667_v51, 2  ;;  %v3802_v51 = vld [vmem:[%s4890_s7 + $0x1c0] sm:$0xff] }
  0x96   : > { %2398 = vmatpush.bf16.msra.mxu3 %v3809_v22  ;;  %2568 = vmatpush.bf16.msra.mxu0 %v3817_v23  ;;  %v1214_v22 = vsel %vm1207_vm4, %v1211_v3, %v1213_v19  ;;  %v1448_v23 = vsel %vm1207_vm4, %v1445_v4, %v1447_v20  ;;  %v1676_v3 = vshll.u32 %v4506_v0, 16  ;;  %v1675_v4 = vrot.slane %v1673_v2, 1 }
  0x97   : > { %1524 = vmatmul.bf16.vlgmr.msrb.gmra.mxu3 %v1442_v31  ;;  %1764 = vmatmul.bf16.vlgmr.msrb.gmra.mxu0 %v1626_v32  ;;  %v4474_v31 = vld [vmem:[#allocation2 + $0x30] sm:$0xff] }
  0x98   : > { %v1655_v32 = vshrl.u32 %v4474_v31, 16  ;;  %v1449_v37 = vrot.slane %v4474_v31, 1 }
  0x99   : > { %2159 = vmatpush.bf16.msra.mxu2 %v3800_v34  ;;  %1927 = vmatpush.bf16.msra.mxu1 %v3784_v52  ;;  %v1658_v34 = vshll.u32 %v4474_v31, 16 }
  0x9a   : > { %2399 = vmatpush.bf16.msra.mxu3 %v3808_v45  ;;  %2569 = vmatpush.bf16.msra.mxu0 %v3816_v36  ;;  %v1657_v45 = vrot.slane %v1655_v32, 1  ;;  %v1215_v36 = vrot.slane %v4281_v12, 1  ;;  %v1450_v43 = vsel %vm1207_vm4, %v1447_v20, %v1449_v37 }
  0x9b   : > { %v1660_v52 = vrot.slane %v1658_v34, 2 }
  0x9c   : > { %v1216_v42 = vsel %vm1207_vm4, %v1213_v19, %v1215_v36  ;;  %v4532_v19 = vld [vmem:[#allocation2 + $0x48] sm:$0xff] }
  0x9d   : > { %2160 = vmatpush.bf16.msra.mxu2 %v3799_v44  ;;  %1928 = vmatpush.bf16.msra.mxu1 %v3783_v61  ;;  %v1661_v38 = vor.u32 %v1660_v52, %v1657_v45  ;;  %v1670_v44 = vor.u32 %v1669_v55, %v1666_v53  ;;  %v3780_v61 = vld [vmem:[%s4890_s7 + $0x150] sm:$0xff]  ;;  %v1455_v32 = vrot.slane %v4532_v19, 1  ;;  %v3778_v53 = vld [vmem:[%s4890_s7 + $0x140] sm:$0xff] }
  0x9e   : > { %2400 = vmatpush.bf16.msra.mxu3 %v3807_v60 }
  0x9f   : > { %v1671_v63 = vsel %vm1609_vm5, %v1661_v38, %v1670_v44 }
  0xa1   : > { %2161 = vmatpush.bf16.msra.mxu2 %v3798_v10  ;;  %1929 = vmatpush.bf16.msra.mxu1 %v3782_v14  ;;  %v3803_v14 = vld [vmem:[%s4890_s7 + $0x1c8] sm:$0xff] }
  0xa2   : > { %2401 = vmatpush.bf16.msra.mxu3 %v3806_v11 }
  0xa4   : > { %1140 = vmatmul.bf16.vlgmr.msrb.gmra.mxu1 %v4216_v30  ;;  %1292 = vmatmul.bf16.vlgmr.msrb.gmra.mxu2 %v1210_v56  ;;  %v3815_v30 = vld [vmem:[%s4890_s7 + $0x228] sm:$0xff]  ;;  %v1217_v56 = vrot.slane %v4212_v28, 1 }
  0xa5   : > { %2570 = vmatpush.bf16.msra.mxu0 %v3815_v30  ;;  %2162 = vmatpush.bf16.msra.mxu2 %v3797_v25 }
  0xa6   : > { %2402 = vmatpush.bf16.msra.mxu3 %v3805_v26  ;;  %v1218_v60 = vsel %vm1207_vm4, %v1215_v36, %v1217_v56  ;;  %v1221_v26 = vrot.slane %v4283_v13, 1 }
  0xa7   : > { %1529 = vmatmul.bf16.gmra.mxu3 %v1444_v57  ;;  %1769 = vmatmul.bf16.gmra.mxu0 %v1635_v58  ;;  %v1451_v57 = vrot.slane %v4487_v49, 1  ;;  %v3804_v58 = vld [vmem:[%s4890_s7 + $0x1d0] sm:$0xff] }
  0xa9   : > { %2571 = vmatpush.bf16.msra.mxu0 %v3814_v24  ;;  %v1452_v30 = vsel %vm1207_vm4, %v1449_v37, %v1451_v57 }
  0xaa   : > { %2403 = vmatpush.bf16.msra.mxu3 %v3804_v58 }
  0xad   : > { %2572 = vmatpush.bf16.msra.mxu0 %v3813_v47 }
  0xae   : > { %2404 = vmatpush.bf16.msra.mxu3 %v3803_v14 }
  0xb1   : > { %2573 = vmatpush.bf16.msra.mxu0 %v3812_v1 }
  0xb2   : > { %2405 = vmatpush.bf16.msra.mxu3 %v3802_v51 }
  0xb4   : > { %1145 = vmatmul.bf16.gmra.mxu1 %v4230_v40  ;;  %1297 = vmatmul.bf16.gmra.mxu2 %v1212_v7  ;;  %v1646_v40 = vshrl.u32 %v4452_v15, 16  ;;  %v1453_v7 = vrot.slane %v4506_v0, 1 }
  0xb6   : > { %v1648_v17 = vrot.slane %v1646_v40, 1  ;;  %v1454_v40 = vsel %vm1207_vm4, %v1451_v57, %v1453_v7 }
  0xb7   : > { %1534 = vmatmul.bf16.gmra.mxu3 %v1446_v8  ;;  %1774 = vmatmul.bf16.gmra.mxu0 %v1644_v9  ;;  %v3795_v8 = vld [vmem:[%s4890_s7 + $0x188] sm:$0xff] }
  0xb8   : > { %v1652_v21 = vor.u32 %v1651_v18, %v1648_v17  ;;  %v3779_v18 = vld [vmem:[%s4890_s7 + $0x148] sm:$0xff] }
  0xba   : > { %v1653_v5 = vsel %vm1609_vm5, %v1643_v6, %v1652_v21  ;;  %v1662_v46 = vsel %vm1609_vm5, %v1652_v21, %v1661_v38  ;;  %v1678_v6 = vrot.slane %v1676_v3, 2  ;;  %v1682_v21 = vshrl.u32 %v4532_v19, 16 }
  0xbb   : > { %v1456_v38 = vsel %vm1207_vm4, %v1453_v7, %v1455_v32  ;;  %v1223_v3 = vrot.slane %v4225_v35, 1 }
  0xbc   : > { %v1679_v9 = vor.u32 %v1678_v6, %v1675_v4  ;;  %v1684_v24 = vrot.slane %v1682_v21, 1 }
  0xbd   : > { %v1224_v14 = vsel %vm1207_vm4, %v1221_v26, %v1223_v3 }
  0xbe   : > { %v1680_v17 = vsel %vm1609_vm5, %v1670_v44, %v1679_v9 }
  0xc4   : > { %1150 = vmatmul.bf16.gmra.mxu1 %v4210_v27  ;;  %1302 = vmatmul.bf16.gmra.mxu2 %v1214_v22  ;;  %v3781_v27 = vld [vmem:[%s4890_s7 + $0x158] sm:$0xff] }
  0xc5   : > { %1930 = vmatpush.bf16.msra.mxu1 %v3781_v27  ;;  %v1588_v27 = vld [vmem:[#allocation2 + $0x50] sm:$0x3] }
  0xc6   : > { %v1607_v52 = vunpack.c.l.b16 %v1588_v27 }
  0xc7   : > { %1539 = vmatmul.bf16.gmra.mxu3 %v1448_v23  ;;  %1779 = vmatmul.bf16.gmra.mxu0 %v1653_v5  ;;  %v3811_v23 = vld [vmem:[%s4890_s7 + $0x208] sm:$0xff] }
  0xc8   : > { %2574 = vmatpush.bf16.msra.mxu0 %v3811_v23  ;;  %v2470_v23 = vld [vmem:[#allocation2 + $0x10] sm:$0x8] }
  0xc9   : > { %1931 = vmatpush.bf16.msra.mxu1 %v3780_v61  ;;  %v1998_v61 = vld [vmem:[#allocation2 + $0x10] sm:$0xc] }
  0xcd   : > { %1932 = vmatpush.bf16.msra.mxu1 %v3779_v18 }
  0xd1   : > { %1933 = vmatpush.bf16.msra.mxu1 %v3778_v53  ;;  %v1225_v53 = vrot.slane %v4242_v48, 1 }
  0xd4   : > { %1155 = vmatmul.bf16.gmra.mxu1 %v4214_v29  ;;  %1307 = vmatmul.bf16.gmra.mxu2 %v1216_v42  ;;  %v3796_v29 = vld [vmem:[%s4890_s7 + $0x190] sm:$0xff]  ;;  %v3794_v42 = vld [vmem:[%s4890_s7 + $0x180] sm:$0xff] }
  0xd5   : > { %2163 = vmatpush.bf16.msra.mxu2 %v3796_v29  ;;  %v4565_v29 = vpack.c.b16 %v1607_v52, %v1607_v52 }
  0xd7   : > { %1544 = vmatmul.bf16.gmra.mxu3 %v1450_v43  ;;  %1784 = vmatmul.bf16.gmra.mxu0 %v1662_v46  ;;  %v1374_v43 = vld [vmem:[#allocation2 + $0x50] sm:$0x1]  ;;  %v1694_v57 = vshll.u32 %v4565_v29, 16 }
  0xd9   : > { %2164 = vmatpush.bf16.msra.mxu2 %v3795_v8  ;;  %v1696_v2 = vrot.slane %v1694_v57, 2 }
  0xdd   : > { %2165 = vmatpush.bf16.msra.mxu2 %v3794_v42 }
  0xe4   : > { %1160 = vmatmul.bf16.gmra.mxu1 %v4281_v12  ;;  %1312 = vmatmul.bf16.gmra.mxu2 %v1218_v60  ;;  %v1219_v12 = vrot.slane %v4222_v33, 1  ;;  %v3810_v60 = vld [vmem:[%s4890_s7 + $0x200] sm:$0xff] }
  0xe5   : > { %2575 = vmatpush.bf16.msra.mxu0 %v3810_v60 }
  0xe6   : > { %v1220_v11 = vsel %vm1207_vm4, %v1217_v56, %v1219_v12  ;;  %v1222_v37 = vsel %vm1207_vm4, %v1219_v12, %v1221_v26  ;;  %v1691_v56 = vshrl.u32 %v4565_v29, 16  ;;  %v2053_v12 = vunpack.c.l.b16 %v1998_v61 }
  0xe7   : > { %1549 = vmatmul.bf16.gmra.mxu3 %v1452_v30  ;;  %1789 = vmatmul.bf16.gmra.mxu0 %v1671_v63  ;;  %v1999_v30 = vld [vmem:[#allocation2 + $0x14] sm:$0xf] }
  0xe8   : > { %v1693_v1 = vrot.slane %v1691_v56, 1  ;;  %v2054_v7 = vunpack.c.l.b16 %v1999_v30 }
  0xea   : > { %v4592_v18 = vpack.c.b16 %v2054_v7, %v2053_v12  ;;  %v1828_v12 = vld [vmem:[#allocation2 + $0x8] sm:$0xc] }
  0xf1   : > { %v4518_v10 = vpop.f32.mrf.mxu1 }
  0xf4   : > { %1165 = vmatmul.bf16.gmra.mxu1 %v4212_v28  ;;  %1317 = vmatmul.bf16.gmra.mxu2 %v1220_v11  ;;  %v4526_v16 = vpop.f32.mrf.mxu0  ;;  %v1685_v28 = vshll.u32 %v4532_v19, 16 }
  0xf6   : > { %v1687_v25 = vrot.slane %v1685_v28, 2 }
  0xf7   : > { %1554 = vmatmul.bf16.gmra.mxu3 %v1454_v40  ;;  %v4534_v20 = vpop.f32.mrf.mxu2  ;;  %1794 = vmatmul.bf16.gmra.mxu0 %v1680_v17  ;;  %v4590_v17 = vld [vmem:[#allocation2 + $0x18] sm:$0xff] }
  0xf8   : > { %v1688_v45 = vor.u32 %v1687_v25, %v1684_v24  ;;  %v2253_v24 = vshrl.u32 %v4592_v18, 16  ;;  %v2256_v25 = vshll.u32 %v4592_v18, 16  ;;  %v2261_v26 = vshrl.u32 %v4590_v17, 16 }
  0xf9   : > { %v4538_v22 = vpop.f32.mrf.mxu1  ;;  %v2264_v27 = vshll.u32 %v4590_v17, 16  ;;  %v2493_v61 = vrot.slane %v4590_v17, 3 }
  0xfa   : > { %v4557_v46 = vpop.f32.mrf.mxu3  ;;  %v1689_v50 = vsel %vm1609_vm5, %v1679_v9, %v1688_v45  ;;  %v1697_v9 = vor.u32 %v1696_v2, %v1693_v1  ;;  %v2258_v42 = vrot.slane %v2256_v25, 3  ;;  %v1226_v1 = vsel %vm1207_vm4, %v1223_v3, %v1225_v53 }
  0xfc   : > { %v4543_v5 = vpop.f32.mrf.mxu0  ;;  %v1698_v28 = vsel %vm1609_vm5, %v1688_v45, %v1697_v9  ;;  %v2263_v45 = vrot.slane %v2261_v26, 2 }
  0xff   : > { %v4547_v34 = vpop.f32.mrf.mxu2 }
 0x101   : > { %v4549_v36 = vpop.f32.mrf.mxu1 }
 0x102   : > { %v4582_v4 = vpop.f32.mrf.mxu3 }
 0x104   : > { %1170 = vmatmul.bf16.gmra.mxu1 %v4222_v33  ;;  %1322 = vmatmul.bf16.gmra.mxu2 %v1222_v37  ;;  %v4559_v47 = vpop.f32.mrf.mxu0  ;;  %v1429_v33 = vunpack.c.l.b16 %v1374_v43  ;;  %v2489_v37 = vunpack.c.l.b16 %v2470_v23  ;;  %v2266_v43 = vrot.slane %v2264_v27, 3 }
 0x106   : > { %v1439_v44 = vpack.c.b16 %v1429_v33, %v1429_v33  ;;  %v2490_v51 = vpack.c.b16 %v2054_v7, %v2489_v37  ;;  %v2267_v56 = vor.u32 %v2266_v43, %v2263_v45  ;;  %v4613_v7 = vld [vmem:[#allocation2 + $0x20] sm:$0xff] }
 0x107   : > { %1559 = vmatmul.bf16.gmra.mxu3 %v1456_v38  ;;  %v4570_v55 = vpop.f32.mrf.mxu2  ;;  %1799 = vmatmul.bf16.gmra.mxu0 %v1689_v50  ;;  %v2255_v38 = vrot.slane %v2253_v24, 2  ;;  %v2273_v3 = vshll.u32 %v4613_v7, 16 }
 0x108   : > { %v1457_v6 = vrot.slane %v1439_v44, 1  ;;  %v2492_v60 = vrot.slane %v2490_v51, 3 }
 0x109   : > { %v4574_v58 = vpop.f32.mrf.mxu1  ;;  %v2259_v33 = vor.u32 %v2258_v42, %v2255_v38  ;;  %v2275_v37 = vrot.slane %v2273_v3, 3  ;;  %v3994_v38 = vmov 0   ;;  %v2640_v42 = vld [vmem:[%s4884_s1] sm:$0xff] }
 0x10a   : > { %v1458_v40 = vsel %vm1207_vm4, %v1455_v32, %v1457_v6  ;;  %v2494_v9 = vsel %vm2491_vm7, %v2492_v60, %v2493_v61  ;;  %3949 = vset.pattern.permute.xlu0 %v3994_v38  ;;  %785 = vst [vmem:[#allocation2 + $0x58] sm:$0xc] %v3994_v38  ;;  %3950 = vset.pattern.permute.xlu1 %v3994_v38 }
 0x10b   : > { %v2268_v6 = vsel %vm2251_vm6, %v2259_v33, %v2267_v56  ;;  %2660 = vperm.xlu0 %3949, %v2640_v42   ;;  %3951 = vset.pattern.permute.xlu2 %v3994_v38  ;;  %v2085_v38 = vrot.slane %v4613_v7, 2 }
 0x10c   : > { %v4579_v63 = vpop.f32.mrf.mxu0 }
 0x10f   : > { %v4584_v8 = vpop.f32.mrf.mxu2 }
 0x111   : > { %v4586_v11 = vpop.f32.mrf.mxu1 }
 0x114   : > { %1175 = vmatmul.bf16.gmra.mxu1 %v4283_v13  ;;  %1327 = vmatmul.bf16.gmra.mxu2 %v1224_v14  ;;  %v1765_v21 = vpop.f32.mrf.mxu0  ;;  %v1847_v14 = vunpack.c.l.b16 %v1828_v12 }
 0x116   : > { %v1848_v25 = vpack.c.b16 %v1412_v54, %v1847_v14  ;;  %v1851_v54 = vrot.slane %v4354_v59, 2 }
 0x117   : > { %1564 = vmatmul.bf16.gmra.mxu3 %v1458_v40  ;;  %v4600_v32 = vpop.f32.mrf.mxu2  ;;  %1804 = vmatmul.bf16.gmra.mxu0 %v1698_v28  ;;  %v2270_v40 = vshrl.u32 %v4613_v7, 16 }
 0x118   : > { %v1850_v41 = vrot.slane %v1848_v25, 2 }
 0x119   : > { %v4602_v13 = vpop.f32.mrf.mxu1  ;;  %v2272_v27 = vrot.slane %v2270_v40, 2 }
 0x11a   : > { %v1525_v52 = vpop.f32.mrf.mxu3 }
 0x11b   : > { %v2276_v51 = vor.u32 %v2275_v37, %v2272_v27  ;;  %v1853_v37 = vrot.slane %v4411_v39, 2  ;;  %v2643_v39 = vld [vmem:[%s4884_s1 + $0x18] sm:$0xff] }
 0x11c   : > { %v4604_v50 = vpop.f32.mrf.mxu0 }
 0x11d   : > { %v2277_v59 = vsel %vm2251_vm6, %v2267_v56, %v2276_v51 }
 0x11f   : > { %v4607_v57 = vpop.f32.mrf.mxu2 }
 0x121   : > { %v1141_v30 = vpop.f32.mrf.mxu1 }
 0x122   : > { %v1527_v44 = vpop.f32.mrf.mxu3  ;;  %v1142_v2 = vadd.f32 %v1141_v30, %v4526_v16  ;;  %v2495_v30 = vrot.slane %v4613_v7, 3 }
 0x124   : > { %1180 = vmatmul.bf16.gmra.mxu1 %v4225_v35  ;;  %1332 = vmatmul.bf16.gmra.mxu2 %v1226_v1  ;;  %v4616_v48 = vpop.f32.mrf.mxu0  ;;  %v2496_v14 = vsel %vm2491_vm7, %v2493_v61, %v2495_v30 }
 0x127   : > { %2406 = vmatmul.bf16.vlgmr.msra.gmra.mxu3 %v2268_v6  ;;  %v1293_v28 = vpop.f32.mrf.mxu2  ;;  %2576 = vmatmul.bf16.vlgmr.msra.gmra.mxu0 %v2494_v9 }
 0x128   : > { %v1338_v16 = vadd.f32 %v1293_v28, %v1142_v2  ;;  %v1852_v2 = vsel %vm1849_vm8, %v1850_v41, %v1851_v54 }
 0x129   : > { %v1143_v24 = vpop.f32.mrf.mxu1 }
 0x12a   : > { %v1530_v23 = vpop.f32.mrf.mxu3  ;;  %v1570_v35 = vadd.f32 %v1525_v52, %v1338_v16  ;;  %v1144_v26 = vadd.f32 %v1143_v24, %v4543_v5  ;;  %v2082_v5 = vrot.slane %v4592_v18, 2  ;;  %v2083_v52 = vrot.slane %v4590_v17, 2  ;;  %v4637_v18 = vld [vmem:[#allocation2 + $0x28] sm:$0xff] }
 0x12b   : > { %v2641_v17 = vld [vmem:[%s4884_s1 + $0x8] sm:$0xff]  ;;  %v2282_v56 = vshll.u32 %v4637_v18, 16 }
 0x12c   : > { %v1772_v45 = vpop.f32.mrf.mxu0  ;;  %v4627_v43 = vadd.f32 %v1765_v21, %v1570_v35  ;;  %v2084_v21 = vsel %vm1849_vm8, %v2082_v5, %v2083_v52  ;;  %2665 = vperm.xlu0 %3949, %v2641_v17  }
 0x12f   : > { %v1295_v53 = vpop.f32.mrf.mxu2 }
 0x130   : > { %v1339_v33 = vadd.f32 %v1295_v53, %v1144_v26  ;;  %v2284_v26 = vrot.slane %v2282_v56, 3 }
 0x131   : > { %v1146_v1 = vpop.f32.mrf.mxu1 }
 0x132   : > { %v1532_v60 = vpop.f32.mrf.mxu3  ;;  %v1571_v6 = vadd.f32 %v1527_v44, %v1339_v33  ;;  %v1147_v12 = vadd.f32 %v1146_v1, %v4559_v47  ;;  %v2279_v47 = vshrl.u32 %v4637_v18, 16  ;;  %v1854_v33 = vsel %vm1849_vm8, %v1851_v54, %v1853_v37 }
 0x133   : > { %v2086_v1 = vsel %vm1849_vm8, %v2083_v52, %v2085_v38 }
 0x134   : > { %1934 = vmatmul.bf16.vlgmr.msra.gmra.mxu1 %v1852_v2  ;;  %2166 = vmatmul.bf16.vlgmr.msra.gmra.mxu2 %v2084_v21  ;;  %v1775_v9 = vpop.f32.mrf.mxu0  ;;  %v4644_v40 = vadd.f32 %v4604_v50, %v1571_v6  ;;  %v2281_v35 = vrot.slane %v2279_v47, 2  ;;  %v2642_v50 = vld [vmem:[%s4884_s1 + $0x10] sm:$0xff] }
 0x135   : > { %2670 = vperm.xlu1 %3950, %v2642_v50  }
 0x136   : > { %v2285_v42 = vor.u32 %v2284_v26, %v2281_v35 }
 0x137   : > { %2411 = vmatmul.bf16.gmra.mxu3 %v2277_v59  ;;  %v1298_v44 = vpop.f32.mrf.mxu2  ;;  %2581 = vmatmul.bf16.gmra.mxu0 %v2496_v14 }
 0x138   : > { %v1340_v3 = vadd.f32 %v1298_v44, %v1147_v12  ;;  %v2286_v21 = vsel %vm2251_vm6, %v2276_v51, %v2285_v42 }
 0x139   : > { %v1148_v16 = vpop.f32.mrf.mxu1 }
 0x13a   : > { %v1535_v28 = vpop.f32.mrf.mxu3  ;;  %v1572_v24 = vadd.f32 %v1530_v23, %v1340_v3  ;;  %v1149_v25 = vadd.f32 %v1148_v16, %v4579_v63  ;;  %v2497_v63 = vrot.slane %v4637_v18, 3 }
 0x13c   : > { %v1777_v61 = vpop.f32.mrf.mxu0  ;;  %v4653_v27 = vadd.f32 %v4616_v48, %v1572_v24  ;;  %v4661_v48 = vld [vmem:[#allocation2 + $0x30] sm:$0xff]  ;;  %v2498_v6 = vsel %vm2491_vm7, %v2495_v30, %v2497_v63  ;;  %v2087_v30 = vrot.slane %v4637_v18, 2 }
 0x13d   : > { %2675 = vperm.xlu1 %3950, %v2643_v39   ;;  %v2288_v52 = vshrl.u32 %v4661_v48, 16  ;;  %v2291_v51 = vshll.u32 %v4661_v48, 16  ;;  %v2499_v50 = vrot.slane %v4661_v48, 3 }
 0x13f   : > { %v1300_v41 = vpop.f32.mrf.mxu2  ;;  %v2290_v56 = vrot.slane %v2288_v52, 2  ;;  %v2293_v44 = vrot.slane %v2291_v51, 3  ;;  %v2089_v51 = vrot.slane %v4661_v48, 2 }
 0x140   : > { %v1341_v23 = vadd.f32 %v1300_v41, %v1149_v25 }
 0x141   : > { %v1151_v53 = vpop.f32.mrf.mxu1  ;;  %v2294_v24 = vor.u32 %v2293_v44, %v2290_v56 }
 0x142   : > { %v1537_v5 = vpop.f32.mrf.mxu3  ;;  %v1573_v2 = vadd.f32 %v1532_v60, %v1341_v23  ;;  %v1152_v54 = vadd.f32 %v1151_v53, %v4518_v10  ;;  %v2088_v23 = vsel %vm1849_vm8, %v2085_v38, %v2087_v30 }
 0x144   : > { %1939 = vmatmul.bf16.gmra.mxu1 %v1854_v33  ;;  %2171 = vmatmul.bf16.gmra.mxu2 %v2086_v1  ;;  %v1780_v7 = vpop.f32.mrf.mxu0  ;;  %v4667_v12 = vadd.f32 %v1772_v45, %v1573_v2  ;;  %v1855_v45 = vrot.slane %v4433_v62, 2  ;;  %v4681_v33 = vld [vmem:[#allocation2 + $0x38] sm:$0xff] }
 0x145   : > { %v2297_v2 = vshrl.u32 %v4681_v33, 16  ;;  %v2501_v56 = vrot.slane %v4681_v33, 3 }
 0x147   : > { %2416 = vmatmul.bf16.gmra.mxu3 %v2286_v21  ;;  %v1303_v60 = vpop.f32.mrf.mxu2  ;;  %2586 = vmatmul.bf16.gmra.mxu0 %v2498_v6  ;;  %v2299_v6 = vrot.slane %v2297_v2, 2 }
 0x148   : > { %v1342_v59 = vadd.f32 %v1303_v60, %v1152_v54 }
 0x149   : > { %v1153_v14 = vpop.f32.mrf.mxu1 }
 0x14a   : > { %v1540_v17 = vpop.f32.mrf.mxu3  ;;  %v1574_v47 = vadd.f32 %v1535_v28, %v1342_v59  ;;  %v1154_v10 = vadd.f32 %v1153_v14, %v4538_v22  ;;  %v1856_v28 = vsel %vm1849_vm8, %v1853_v37, %v1855_v45  ;;  %v2500_v22 = vsel %vm2491_vm7, %v2497_v63, %v2499_v50 }
 0x14b   : > { %v2300_v37 = vshll.u32 %v4681_v33, 16 }
 0x14c   : > { %v1782_v3 = vpop.f32.mrf.mxu0  ;;  %v4672_v16 = vadd.f32 %v1775_v9, %v1574_v47  ;;  %v2295_v9 = vsel %vm2251_vm6, %v2285_v42, %v2294_v24 }
 0x14d   : > { %v2302_v54 = vrot.slane %v2300_v37, 3 }
 0x14f   : > { %v1305_v25 = vpop.f32.mrf.mxu2  ;;  %v2303_v59 = vor.u32 %v2302_v54, %v2299_v6 }
 0x150   : > { %v1343_v35 = vadd.f32 %v1305_v25, %v1154_v10  ;;  %v2090_v25 = vsel %vm1849_vm8, %v2087_v30, %v2089_v51 }
 0x151   : > { %v1156_v41 = vpop.f32.mrf.mxu1 }
 0x152   : > { %v1542_v26 = vpop.f32.mrf.mxu3  ;;  %v1575_v53 = vadd.f32 %v1537_v5, %v1343_v35  ;;  %v1157_v1 = vadd.f32 %v1156_v41, %v4549_v36  ;;  %v1857_v36 = vrot.slane %v4452_v15, 2  ;;  %v4701_v41 = vld [vmem:[#allocation2 + $0x40] sm:$0xff] }
 0x153   : > { %v2644_v15 = vld [vmem:[%s4884_s1 + $0x20] sm:$0xff] }
 0x154   : > { %1944 = vmatmul.bf16.gmra.mxu1 %v1856_v28  ;;  %2176 = vmatmul.bf16.gmra.mxu2 %v2088_v23  ;;  %v1785_v62 = vpop.f32.mrf.mxu0  ;;  %v4684_v18 = vadd.f32 %v1777_v61, %v1575_v53  ;;  %v2646_v61 = vld [vmem:[%s4884_s1 + $0x30] sm:$0xff]  ;;  %v1858_v10 = vsel %vm1849_vm8, %v1855_v45, %v1857_v36  ;;  %v2502_v45 = vsel %vm2491_vm7, %v2499_v50, %v2501_v56  ;;  %v2309_v28 = vshll.u32 %v4701_v41, 16 }
 0x155   : > { %2690 = vperm.xlu0 %3949, %v2646_v61   ;;  %2680 = vperm.xlu2 %3951, %v2644_v15   ;;  %v2503_v61 = vrot.slane %v4701_v41, 3  ;;  %v2650_v15 = vld [vmem:[%s4884_s1 + $0x50] sm:$0xff] }
 0x156   : > { %v2311_v37 = vrot.slane %v2309_v28, 3  ;;  %v2093_v28 = vrot.slane %v4701_v41, 2 }
 0x157   : > { %2421 = vmatmul.bf16.gmra.mxu3 %v2295_v9  ;;  %v1308_v38 = vpop.f32.mrf.mxu2  ;;  %2591 = vmatmul.bf16.gmra.mxu0 %v2500_v22 }
 0x158   : > { %v1344_v5 = vadd.f32 %v1308_v38, %v1157_v1  ;;  %v1859_v38 = vrot.slane %v4474_v31, 2  ;;  %v2649_v31 = vld [vmem:[%s4884_s1 + $0x48] sm:$0xff] }
 0x159   : > { %v1158_v21 = vpop.f32.mrf.mxu1 }
 0x15a   : > { %v1545_v42 = vpop.f32.mrf.mxu3  ;;  %v1576_v39 = vadd.f32 %v1540_v17, %v1344_v5  ;;  %v1159_v60 = vadd.f32 %v1158_v21, %v4574_v58  ;;  %v2647_v58 = vld [vmem:[%s4884_s1 + $0x38] sm:$0xff]  ;;  %v2091_v5 = vrot.slane %v4681_v33, 2  ;;  %v2504_v33 = vsel %vm2491_vm7, %v2501_v56, %v2503_v61 }
 0x15b   : > { %2695 = vperm.xlu1 %3950, %v2647_v58  }
 0x15c   : > { %v1787_v63 = vpop.f32.mrf.mxu0  ;;  %v4692_v52 = vadd.f32 %v1780_v7, %v1576_v39  ;;  %v2304_v7 = vsel %vm2251_vm6, %v2294_v24, %v2303_v59 }
 0x15d   : > { %2705 = vperm.xlu0 %3949, %v2649_v31  }
 0x15f   : > { %v1310_v14 = vpop.f32.mrf.mxu2 }
 0x160   : > { %v1345_v47 = vadd.f32 %v1310_v14, %v1159_v60  ;;  %v1860_v14 = vsel %vm1849_vm8, %v1857_v36, %v1859_v38 }
 0x161   : > { %v1161_v44 = vpop.f32.mrf.mxu1 }
 0x162   : > { %v1547_v17 = vpop.f32.mrf.mxu3  ;;  %v1577_v35 = vadd.f32 %v1542_v26, %v1345_v47  ;;  %v1162_v24 = vadd.f32 %v1161_v44, %v4586_v11  ;;  %v2306_v26 = vshrl.u32 %v4701_v41, 16  ;;  %v2092_v47 = vsel %vm1849_vm8, %v2089_v51, %v2091_v5 }
 0x163   : > { %2710 = vperm.xlu1 %3950, %v2650_v15  }
 0x164   : > { %1949 = vmatmul.bf16.gmra.mxu1 %v1858_v10  ;;  %2181 = vmatmul.bf16.gmra.mxu2 %v2090_v25  ;;  %v1790_v48 = vpop.f32.mrf.mxu0  ;;  %v4710_v30 = vadd.f32 %v1782_v3, %v1577_v35  ;;  %v2308_v2 = vrot.slane %v2306_v26, 2  ;;  %v2645_v3 = vld [vmem:[%s4884_s1 + $0x28] sm:$0xff]  ;;  %v1861_v26 = vrot.slane %v4487_v49, 2 }
 0x165   : > { %2685 = vperm.xlu2 %3951, %v2645_v3   ;;  %v4729_v10 = vld [vmem:[#allocation2 + $0x48] sm:$0xff] }
 0x166   : > { %v2312_v39 = vor.u32 %v2311_v37, %v2308_v2  ;;  %v2315_v51 = vshrl.u32 %v4729_v10, 16  ;;  %v2505_v37 = vrot.slane %v4729_v10, 3  ;;  %v1862_v41 = vsel %vm1849_vm8, %v1859_v38, %v1861_v26 }
 0x167   : > { %2426 = vmatmul.bf16.gmra.mxu3 %v2304_v7  ;;  %v1313_v23 = vpop.f32.mrf.mxu2  ;;  %2596 = vmatmul.bf16.gmra.mxu0 %v2502_v45  ;;  %v2095_v15 = vrot.slane %v4729_v10, 2 }
 0x168   : > { %v1346_v53 = vadd.f32 %v1313_v23, %v1162_v24 }
 0x169   : > { %v1163_v22 = vpop.f32.mrf.mxu1 }
 0x16a   : > { %v1550_v9 = vpop.f32.mrf.mxu3  ;;  %v1578_v1 = vadd.f32 %v1545_v42, %v1346_v53  ;;  %v1164_v21 = vadd.f32 %v1163_v22, %v4602_v13  ;;  %v2652_v22 = vld [vmem:[%s4884_s1 + $0x60] sm:$0xff] }
 0x16b   : > { %2720 = vperm.xlu0 %3949, %v2652_v22  }
 0x16c   : > { %v4718_v50 = vpop.f32.mrf.mxu0  ;;  %v4720_v11 = vadd.f32 %v1785_v62, %v1578_v1  ;;  %v2313_v62 = vsel %vm2251_vm6, %v2303_v59, %v2312_v39  ;;  %v2318_v59 = vshll.u32 %v4729_v10, 16 }
 0x16e   : > { %v2320_v45 = vrot.slane %v2318_v59, 3 }
 0x16f   : > { %v1315_v6 = vpop.f32.mrf.mxu2 }
 0x170   : > { %v1347_v42 = vadd.f32 %v1315_v6, %v1164_v21  ;;  %v4760_v6 = vld [vmem:[#allocation2 + $0x50] sm:$0xff] }
 0x171   : > { %v1166_v60 = vpop.f32.mrf.mxu1 }
 0x172   : > { %v1552_v54 = vpop.f32.mrf.mxu3  ;;  %v1579_v44 = vadd.f32 %v1547_v17, %v1347_v42  ;;  %v1167_v36 = vadd.f32 %v1166_v60, %v4534_v20  ;;  %v2648_v42 = vld [vmem:[%s4884_s1 + $0x40] sm:$0xff] }
 0x173   : > { %2700 = vperm.xlu2 %3951, %v2648_v42  }
 0x174   : > { %1954 = vmatmul.bf16.gmra.mxu1 %v1860_v14  ;;  %2186 = vmatmul.bf16.gmra.mxu2 %v2092_v47  ;;  %v1795_v13 = vpop.f32.mrf.mxu0  ;;  %v4735_v25 = vadd.f32 %v1787_v63, %v1579_v44  ;;  %v2317_v63 = vrot.slane %v2315_v51, 2  ;;  %v2506_v14 = vsel %vm2491_vm7, %v2503_v61, %v2505_v37  ;;  %v2655_v47 = vld [vmem:[%s4884_s1 + $0x78] sm:$0xff] }
 0x175   : > { %2735 = vperm.xlu0 %3949, %v2655_v47   ;;  %v2230_v51 = vld [vmem:[#allocation2 + $0x58] sm:$0x7]  ;;  %v2097_v47 = vrot.slane %v4760_v6, 2 }
 0x176   : > { %v2321_v53 = vor.u32 %v2320_v45, %v2317_v63  ;;  %v2249_v63 = vunpack.c.l.b16 %v2230_v51 }
 0x177   : > { %2431 = vmatmul.bf16.gmra.mxu3 %v2313_v62  ;;  %v1318_v17 = vpop.f32.mrf.mxu2  ;;  %2601 = vmatmul.bf16.gmra.mxu0 %v2504_v33  ;;  %v2098_v51 = vsel %vm1849_vm8, %v2095_v15, %v2097_v47 }
 0x178   : > { %v1348_v35 = vadd.f32 %v1318_v17, %v1167_v36  ;;  %v2322_v21 = vsel %vm2251_vm6, %v2312_v39, %v2321_v53  ;;  %v2324_v39 = vshrl.u32 %v4760_v6, 16 }
 0x179   : > { %v1168_v58 = vpop.f32.mrf.mxu1 }
 0x17a   : > { %v1555_v7 = vpop.f32.mrf.mxu3  ;;  %v1580_v56 = vadd.f32 %v1550_v9, %v1348_v35  ;;  %v1169_v23 = vadd.f32 %v1168_v58, %v4547_v34  ;;  %v2094_v34 = vsel %vm1849_vm8, %v2091_v5, %v2093_v28  ;;  %v2326_v33 = vrot.slane %v2324_v39, 2 }
 0x17b   : > { %v1863_v35 = vrot.slane %v4506_v0, 2  ;;  %v2250_v0 = vpack.c.b16 %v2249_v63, %v2249_v63  ;;  %v2016_v63 = vld [vmem:[#allocation2 + $0x58] sm:$0x3] }
 0x17c   : > { %v4743_v24 = vpop.f32.mrf.mxu0  ;;  %v4745_v20 = vadd.f32 %v1790_v48, %v1580_v56  ;;  %v2653_v48 = vld [vmem:[%s4884_s1 + $0x68] sm:$0xff] }
 0x17d   : > { %2725 = vperm.xlu1 %3950, %v2653_v48   ;;  %v2096_v48 = vsel %vm1849_vm8, %v2093_v28, %v2095_v15  ;;  %v2333_v28 = vshrl.u32 %v2250_v0, 16 }
 0x17f   : > { %v1320_v1 = vpop.f32.mrf.mxu2 }
 0x180   : > { %v1349_v9 = vadd.f32 %v1320_v1, %v1169_v23  ;;  %v2507_v1 = vrot.slane %v4760_v6, 3 }
 0x181   : > { %v1171_v49 = vpop.f32.mrf.mxu1 }
 0x182   : > { %v1557_v2 = vpop.f32.mrf.mxu3  ;;  %v1581_v3 = vadd.f32 %v1552_v54, %v1349_v9  ;;  %v1172_v5 = vadd.f32 %v1171_v49, %v4570_v55  ;;  %v2327_v54 = vshll.u32 %v4760_v6, 16  ;;  %v1864_v9 = vsel %vm1849_vm8, %v1861_v26, %v1863_v35 }
 0x184   : > { %1959 = vmatmul.bf16.gmra.mxu1 %v1862_v41  ;;  %2191 = vmatmul.bf16.gmra.mxu2 %v2094_v34  ;;  %v1800_v60 = vpop.f32.mrf.mxu0  ;;  %v4767_v38 = vadd.f32 %v4718_v50, %v1581_v3  ;;  %v2656_v50 = vld [vmem:[%s4884_s1 + $0x80] sm:$0xff]  ;;  %v2329_v36 = vrot.slane %v2327_v54, 3  ;;  %v2508_v41 = vsel %vm2491_vm7, %v2505_v37, %v2507_v1  ;;  %v2654_v37 = vld [vmem:[%s4884_s1 + $0x70] sm:$0xff] }
 0x185   : > { %2740 = vperm.xlu1 %3950, %v2656_v50  }
 0x186   : > { %v2330_v56 = vor.u32 %v2329_v36, %v2326_v33 }
 0x187   : > { %2436 = vmatmul.bf16.gmra.mxu3 %v2322_v21  ;;  %v1323_v44 = vpop.f32.mrf.mxu2  ;;  %2606 = vmatmul.bf16.gmra.mxu0 %v2506_v14 }
 0x188   : > { %v1350_v62 = vadd.f32 %v1323_v44, %v1172_v5  ;;  %v2331_v49 = vsel %vm2251_vm6, %v2321_v53, %v2330_v56  ;;  %v2335_v5 = vrot.slane %v2333_v28, 2 }
 0x189   : > { %v1173_v61 = vpop.f32.mrf.mxu1 }
 0x18a   : > { %v1560_v31 = vpop.f32.mrf.mxu3  ;;  %v1582_v55 = vadd.f32 %v1555_v7, %v1350_v62  ;;  %v1174_v58 = vadd.f32 %v1173_v61, %v4584_v8  ;;  %v2651_v8 = vld [vmem:[%s4884_s1 + $0x58] sm:$0xff] }
 0x18b   : > { %2715 = vperm.xlu2 %3951, %v2651_v8  }
 0x18c   : > { %v1802_v59 = vpop.f32.mrf.mxu0  ;;  %v4778_v17 = vadd.f32 %v1795_v13, %v1582_v55  ;;  %v2509_v55 = vrot.slane %v2250_v0, 3 }
 0x18e   : > { %v2510_v6 = vsel %vm2491_vm7, %v2507_v1, %v2509_v55 }
 0x18f   : > { %v1325_v45 = vpop.f32.mrf.mxu2 }
 0x190   : > { %v1351_v23 = vadd.f32 %v1325_v45, %v1174_v58 }
 0x191   : > { %v1176_v7 = vpop.f32.mrf.mxu1 }
 0x192   : > { %v1562_v22 = vpop.f32.mrf.mxu3  ;;  %v1583_v13 = vadd.f32 %v1557_v2, %v1351_v23  ;;  %v1177_v26 = vadd.f32 %v1176_v7, %v4600_v32  ;;  %v2336_v2 = vshll.u32 %v2250_v0, 16  ;;  %v1865_v32 = vrot.slane %v4532_v19, 2  ;;  %v2657_v19 = vld [vmem:[%s4884_s1 + $0x88] sm:$0xff] }
 0x193   : > { %2730 = vperm.xlu2 %3951, %v2654_v37   ;;  %v1867_v0 = vrot.slane %v4565_v29, 2 }
 0x194   : > { %1964 = vmatmul.bf16.gmra.mxu1 %v1864_v9  ;;  %2196 = vmatmul.bf16.gmra.mxu2 %v2096_v48  ;;  %v1805_v10 = vpop.f32.mrf.mxu0  ;;  %v4792_v34 = vadd.f32 %v4743_v24, %v1583_v13  ;;  %v2338_v39 = vrot.slane %v2336_v2, 3  ;;  %v1866_v36 = vsel %vm1849_vm8, %v1863_v35, %v1865_v32  ;;  %v2071_v35 = vunpack.c.l.b16 %v2016_v63 }
 0x196   : > { %v2339_v62 = vor.u32 %v2338_v39, %v2335_v5  ;;  %v2081_v9 = vpack.c.b16 %v2071_v35, %v2071_v35  ;;  %v2661_v5 = vpop.permute.xlu0 %2660 }
 0x197   : > { %2441 = vmatmul.bf16.gmra.mxu3 %v2331_v49  ;;  %v1328_v53 = vpop.f32.mrf.mxu2  ;;  %2611 = vmatmul.bf16.gmra.mxu0 %v2508_v41 }
 0x198   : > { %v1352_v3 = vadd.f32 %v1328_v53, %v1177_v26  ;;  %v2099_v8 = vrot.slane %v2081_v9, 2 }
 0x199   : > { %v1178_v42 = vpop.f32.mrf.mxu1 }
 0x19a   : > { %v1565_v21 = vpop.f32.mrf.mxu3  ;;  %v1584_v14 = vadd.f32 %v1560_v31, %v1352_v3  ;;  %v1179_v44 = vadd.f32 %v1178_v42, %v4607_v57  ;;  %v2100_v2 = vsel %vm1849_vm8, %v2097_v47, %v2099_v8 }
 0x19b   : > { %2745 = vperm.xlu2 %3951, %v2657_v19  }
 0x19c   : > { %v1807_v24 = vpop.f32.mrf.mxu0  ;;  %v4798_v54 = vadd.f32 %v1800_v60, %v1584_v14  ;;  %v2340_v60 = vsel %vm2251_vm6, %v2330_v56, %v2339_v62 }
 0x19f   : > { %v1330_v50 = vpop.f32.mrf.mxu2 }
 0x1a0   : > { %v1353_v61 = vadd.f32 %v1330_v50, %v1179_v44 }
 0x1a1   : > { %v1181_v33 = vpop.f32.mrf.mxu1 }
 0x1a2   : > { %v1567_v31 = vpop.f32.mrf.mxu3  ;;  %v1585_v58 = vadd.f32 %v1562_v22, %v1353_v61  ;;  %v1182_v15 = vadd.f32 %v1181_v33, %v4557_v46  ;;  %v1868_v46 = vsel %vm1849_vm8, %v1865_v32, %v1867_v0 }
 0x1a4   : > { %1969 = vmatmul.bf16.gmra.mxu1 %v1866_v36  ;;  %2201 = vmatmul.bf16.gmra.mxu2 %v2098_v51  ;;  %v2577_v57 = vpop.f32.mrf.mxu0  ;;  %v4810_v45 = vadd.f32 %v1802_v59, %v1585_v58 }
 0x1a7   : > { %2446 = vmatmul.bf16.gmra.mxu3 %v2340_v60  ;;  %v1333_v23 = vpop.f32.mrf.mxu2  ;;  %2616 = vmatmul.bf16.gmra.mxu0 %v2510_v6 }
 0x1a8   : > { %v1354_v56 = vadd.f32 %v1333_v23, %v1182_v15  ;;  %v2671_v23 = vpop.permute.xlu1 %2670 }
 0x1a9   : > { %v1183_v7 = vpop.f32.mrf.mxu1 }
 0x1aa   : > { %v2407_v22 = vpop.f32.mrf.mxu3  ;;  %v1586_v48 = vadd.f32 %v1565_v21, %v1354_v56  ;;  %v1184_v59 = vadd.f32 %v1183_v7, %v4582_v4 }
 0x1ac   : > { %v2579_v13 = vpop.f32.mrf.mxu0  ;;  %v4813_v49 = vadd.f32 %v1805_v10, %v1586_v48 }
 0x1af   : > { %v1335_v1 = vpop.f32.mrf.mxu2 }
 0x1b0   : > { %v1355_v41 = vadd.f32 %v1335_v1, %v1184_v59 }
 0x1b1   : > { %v1935_v28 = vpop.f32.mrf.mxu1 }
 0x1b2   : > { %v2409_v26 = vpop.f32.mrf.mxu3  ;;  %v1587_v53 = vadd.f32 %v1567_v31, %v1355_v41  ;;  %v1980_v10 = vadd.f32 %v1935_v28, %v4627_v43 }
 0x1b4   : > { %1974 = vmatmul.bf16.gmra.mxu1 %v1868_v46  ;;  %2206 = vmatmul.bf16.gmra.mxu2 %v2100_v2  ;;  %v2582_v3 = vpop.f32.mrf.mxu0  ;;  %v4819_v21 = vadd.f32 %v1807_v24, %v1587_v53  ;;  %v2666_v24 = vpop.permute.xlu0 %2665 }
 0x1b7   : > { %v2167_v29 = vpop.f32.mrf.mxu2 }
 0x1b8   : > { %v2212_v42 = vadd.f32 %v2167_v29, %v1980_v10 }
 0x1b9   : > { %v1937_v4 = vpop.f32.mrf.mxu1 }
 0x1ba   : > { %v2412_v14 = vpop.f32.mrf.mxu3  ;;  %v2452_v39 = vadd.f32 %v2407_v22, %v2212_v42  ;;  %v1981_v44 = vadd.f32 %v1937_v4, %v4644_v40  ;;  %v2676_v42 = vpop.permute.xlu1 %2675 }
 0x1bc   : > { %v2584_v37 = vpop.f32.mrf.mxu0  ;;  %v2622_v32 = vadd.f32 %v2577_v57, %v2452_v39 }
 0x1be   : > { %v2748_v31 = vmul.f32 %v2661_v5, %v2622_v32 }
 0x1bf   : > { %v2169_v62 = vpop.f32.mrf.mxu2 }
 0x1c0   : > { %v2213_v47 = vadd.f32 %v2169_v62, %v1981_v44  ;;  %v2785_v43 = vrot.slane %v2748_v31, 7  ;;  %v2899_v60 = vmul.f32 %v2748_v31, %v2748_v31 }
 0x1c1   : > { %v1940_v61 = vpop.f32.mrf.mxu1 }
 0x1c2   : > { %v2414_v50 = vpop.f32.mrf.mxu3  ;;  %v2453_v55 = vadd.f32 %v2409_v26, %v2213_v47  ;;  %v1982_v51 = vadd.f32 %v1940_v61, %v4653_v27  ;;  %v2838_v56 = vsel %vm644_vm0, 0.0, %v2785_v43 }
 0x1c4   : > { %v2623_v33 = vadd.f32 %v2579_v13, %v2453_v55  ;;  %v2587_v36 = vpop.f32.mrf.mxu0 }
 0x1c6   : > { %v2749_v58 = vmul.f32 %v2666_v24, %v2623_v33 }
 0x1c7   : > { %v2172_v63 = vpop.f32.mrf.mxu2 }
 0x1c8   : > { %v2786_v19 = vrot.slane %v2749_v58, 7  ;;  %v2875_v6 = vadd.f32 %v2749_v58, %v2748_v31  ;;  %v2900_v40 = vmul.f32 %v2749_v58, %v2749_v58  ;;  %v2214_v57 = vadd.f32 %v2172_v63, %v1982_v51  ;;  %v2681_v31 = vpop.permute.xlu2 %2680 }
 0x1c9   : > { %v1942_v15 = vpop.f32.mrf.mxu1 }
 0x1ca   : > { %v2417_v35 = vpop.f32.mrf.mxu3  ;;  %v2787_v22 = vsel %vm644_vm0, %v2785_v43, %v2786_v19  ;;  %v2917_v7 = vadd.f32 %v2900_v40, %v2899_v60  ;;  %v2454_v9 = vadd.f32 %v2412_v14, %v2214_v57  ;;  %v1983_v0 = vadd.f32 %v1942_v15, %v4667_v12 }
 0x1cb   : > { %v3825_v48 = vpack.c.bf16 %v2787_v22, %v2838_v56 }
 0x1cc   : > { %v2624_v13 = vadd.f32 %v2582_v3, %v2454_v9  ;;  %v2589_v27 = vpop.f32.mrf.mxu0 }
 0x1cd   : > { %3826 = vst [vmem:[%s4096_s26] sm:$0xff] %v3825_v48  }
 0x1ce   : > { %v2750_v8 = vmul.f32 %v2671_v23, %v2624_v13 }
 0x1cf   : > { %v2174_v59 = vpop.f32.mrf.mxu2 }
 0x1d0   : > { %v2788_v1 = vrot.slane %v2750_v8, 7  ;;  %v2876_v41 = vadd.f32 %v2875_v6, %v2750_v8  ;;  %v2901_v26 = vmul.f32 %v2750_v8, %v2750_v8  ;;  %v2215_v28 = vadd.f32 %v2174_v59, %v1983_v0  ;;  %v2686_v22 = vpop.permute.xlu2 %2685 }
 0x1d1   : > { %v1945_v2 = vpop.f32.mrf.mxu1 }
 0x1d2   : > { %v2419_v46 = vpop.f32.mrf.mxu3  ;;  %v2789_v53 = vsel %vm644_vm0, %v2786_v19, %v2788_v1  ;;  %v2918_v10 = vadd.f32 %v2917_v7, %v2901_v26  ;;  %v2455_v29 = vadd.f32 %v2414_v50, %v2215_v28  ;;  %v1984_v3 = vadd.f32 %v1945_v2, %v4672_v16 }
 0x1d4   : > { %v2625_v14 = vadd.f32 %v2584_v37, %v2455_v29  ;;  %v2592_v4 = vpop.f32.mrf.mxu0 }
 0x1d6   : > { %v2751_v5 = vmul.f32 %v2676_v42, %v2625_v14 }
 0x1d7   : > { %v2177_v12 = vpop.f32.mrf.mxu2 }
 0x1d8   : > { %v2790_v39 = vrot.slane %v2751_v5, 7  ;;  %v2877_v44 = vadd.f32 %v2876_v41, %v2751_v5  ;;  %v2902_v32 = vmul.f32 %v2751_v5, %v2751_v5  ;;  %v2216_v62 = vadd.f32 %v2177_v12, %v1984_v3 }
 0x1d9   : > { %v1947_v61 = vpop.f32.mrf.mxu1 }
 0x1da   : > { %v2422_v47 = vpop.f32.mrf.mxu3  ;;  %v2791_v55 = vsel %vm644_vm0, %v2788_v1, %v2790_v39  ;;  %v2919_v24 = vadd.f32 %v2918_v10, %v2902_v32  ;;  %v2456_v33 = vadd.f32 %v2417_v35, %v2216_v62  ;;  %v1985_v37 = vadd.f32 %v1947_v61, %v4684_v18  ;;  %v2696_v62 = vpop.permute.xlu1 %2695 }
 0x1db   : > { %v3830_v50 = vpack.c.bf16 %v2791_v55, %v2789_v53 }
 0x1dc   : > { %v2626_v43 = vadd.f32 %v2587_v36, %v2456_v33  ;;  %v2594_v58 = vpop.f32.mrf.mxu0 }
 0x1dd   : > { %3870 = vst [vmem:[%s4096_s26 + $0x8] sm:$0xff] %v3830_v50  }
 0x1de   : > { %v2752_v51 = vmul.f32 %v2681_v31, %v2626_v43 }
 0x1df   : > { %v2179_v16 = vpop.f32.mrf.mxu2 }
 0x1e0   : > { %v2792_v60 = vrot.slane %v2752_v51, 7  ;;  %v2878_v63 = vadd.f32 %v2877_v44, %v2752_v51  ;;  %v2903_v19 = vmul.f32 %v2752_v51, %v2752_v51  ;;  %v2217_v6 = vadd.f32 %v2179_v16, %v1985_v37 }
 0x1e1   : > { %v1950_v57 = vpop.f32.mrf.mxu1 }
 0x1e2   : > { %v2424_v40 = vpop.f32.mrf.mxu3  ;;  %v2793_v15 = vsel %vm644_vm0, %v2790_v39, %v2792_v60  ;;  %v2920_v23 = vadd.f32 %v2919_v24, %v2903_v19  ;;  %v2457_v56 = vadd.f32 %v2419_v46, %v2217_v6  ;;  %v1986_v36 = vadd.f32 %v1950_v57, %v4692_v52  ;;  %v2691_v46 = vpop.permute.xlu0 %2690 }
 0x1e4   : > { %v2627_v35 = vadd.f32 %v2589_v27, %v2457_v56  ;;  %v2597_v1 = vpop.f32.mrf.mxu0 }
 0x1e6   : > { %v2753_v7 = vmul.f32 %v2686_v22, %v2627_v35 }
 0x1e7   : > { %v2182_v18 = vpop.f32.mrf.mxu2 }
 0x1e8   : > { %v2794_v9 = vrot.slane %v2753_v7, 7  ;;  %v2879_v48 = vadd.f32 %v2878_v63, %v2753_v7  ;;  %v2904_v13 = vmul.f32 %v2753_v7, %v2753_v7  ;;  %v2218_v0 = vadd.f32 %v2182_v18, %v1986_v36  ;;  %v2701_v63 = vpop.permute.xlu2 %2700 }
 0x1e9   : > { %v1952_v59 = vpop.f32.mrf.mxu1 }
 0x1ea   : > { %v2427_v8 = vpop.f32.mrf.mxu3  ;;  %v2795_v41 = vsel %vm644_vm0, %v2792_v60, %v2794_v9  ;;  %v2921_v26 = vadd.f32 %v2920_v23, %v2904_v13  ;;  %v2458_v28 = vadd.f32 %v2422_v47, %v2218_v0  ;;  %v1987_v52 = vadd.f32 %v1952_v59, %v4710_v30 }
 0x1eb   : > { %v3835_v2 = vpack.c.bf16 %v2795_v41, %v2793_v15 }
 0x1ec   : > { %v2628_v53 = vadd.f32 %v2592_v4, %v2458_v28  ;;  %v2599_v47 = vpop.f32.mrf.mxu0 }
 0x1ed   : > { %3871 = vst [vmem:[%s4096_s26 + $0x10] sm:$0xff] %v3835_v2  }
 0x1ee   : > { %v2754_v27 = vmul.f32 %v2691_v46, %v2628_v53 }
 0x1ef   : > { %v2184_v10 = vpop.f32.mrf.mxu2 }
 0x1f0   : > { %v2796_v29 = vrot.slane %v2754_v27, 7  ;;  %v2880_v42 = vadd.f32 %v2879_v48, %v2754_v27  ;;  %v2905_v14 = vmul.f32 %v2754_v27, %v2754_v27  ;;  %v2219_v3 = vadd.f32 %v2184_v10, %v1987_v52 }
 0x1f1   : > { %v1955_v5 = vpop.f32.mrf.mxu1 }
 0x1f2   : > { %v2429_v12 = vpop.f32.mrf.mxu3  ;;  %v2797_v39 = vsel %vm644_vm0, %v2794_v9, %v2796_v29  ;;  %v2922_v44 = vadd.f32 %v2921_v26, %v2905_v14  ;;  %v2459_v32 = vadd.f32 %v2424_v40, %v2219_v3  ;;  %v1988_v4 = vadd.f32 %v1955_v5, %v4720_v11  ;;  %v2706_v9 = vpop.permute.xlu0 %2705 }
 0x1f4   : > { %v2629_v61 = vadd.f32 %v2594_v58, %v2459_v32  ;;  %v2602_v58 = vpop.f32.mrf.mxu0 }
 0x1f6   : > { %v2755_v31 = vmul.f32 %v2696_v62, %v2629_v61 }
 0x1f7   : > { %v2187_v30 = vpop.f32.mrf.mxu2 }
 0x1f8   : > { %v2798_v55 = vrot.slane %v2755_v31, 7  ;;  %v2881_v24 = vadd.f32 %v2880_v42, %v2755_v31  ;;  %v2906_v33 = vmul.f32 %v2755_v31, %v2755_v31  ;;  %v2220_v50 = vadd.f32 %v2187_v30, %v1988_v4  ;;  %v2716_v30 = vpop.permute.xlu2 %2715 }
 0x1f9   : > { %v1957_v43 = vpop.f32.mrf.mxu1 }
 0x1fa   : > { %v2799_v37 = vsel %vm644_vm0, %v2796_v29, %v2798_v55  ;;  %v2923_v51 = vadd.f32 %v2922_v44, %v2906_v33  ;;  %v2460_v16 = vadd.f32 %v2427_v8, %v2220_v50  ;;  %v2432_v19 = vpop.f32.mrf.mxu3  ;;  %v1989_v40 = vadd.f32 %v1957_v43, %v4735_v25  ;;  %v2711_v29 = vpop.permute.xlu1 %2710 }
 0x1fb   : > { %v3840_v60 = vpack.c.bf16 %v2799_v37, %v2797_v39 }
 0x1fc   : > { %v2630_v6 = vadd.f32 %v2597_v1, %v2460_v16  ;;  %v2604_v25 = vpop.f32.mrf.mxu0 }
 0x1fd   : > { %3872 = vst [vmem:[%s4096_s26 + $0x18] sm:$0xff] %v3840_v60  }
 0x1fe   : > { %v2756_v11 = vmul.f32 %v2701_v63, %v2630_v6 }
 0x1ff   : > { %v2189_v57 = vpop.f32.mrf.mxu2 }
 0x200   : > { %v2800_v15 = vrot.slane %v2756_v11, 7  ;;  %v2882_v23 = vadd.f32 %v2881_v24, %v2756_v11  ;;  %v2907_v56 = vmul.f32 %v2756_v11, %v2756_v11  ;;  %v2221_v22 = vadd.f32 %v2189_v57, %v1989_v40  ;;  %v2721_v11 = vpop.permute.xlu0 %2720 }
 0x201   : > { %v1960_v35 = vpop.f32.mrf.mxu1 }
 0x202   : > { %v2801_v36 = vsel %vm644_vm0, %v2798_v55, %v2800_v15  ;;  %v2924_v7 = vadd.f32 %v2923_v51, %v2907_v56  ;;  %v2461_v18 = vadd.f32 %v2429_v12, %v2221_v22  ;;  %v2434_v13 = vpop.f32.mrf.mxu3  ;;  %v1990_v0 = vadd.f32 %v1960_v35, %v4745_v20 }
 0x204   : > { %v2631_v48 = vadd.f32 %v2599_v47, %v2461_v18  ;;  %v2607_v62 = vpop.f32.mrf.mxu0 }
 0x206   : > { %v2757_v8 = vmul.f32 %v2706_v9, %v2631_v48 }
 0x207   : > { %v2192_v59 = vpop.f32.mrf.mxu2 }
 0x208   : > { %v2802_v1 = vrot.slane %v2757_v8, 7  ;;  %v2883_v41 = vadd.f32 %v2882_v23, %v2757_v8  ;;  %v2908_v26 = vmul.f32 %v2757_v8, %v2757_v8  ;;  %v2222_v28 = vadd.f32 %v2192_v59, %v1990_v0  ;;  %v2726_v0 = vpop.permute.xlu1 %2725 }
 0x209   : > { %v1962_v2 = vpop.f32.mrf.mxu1 }
 0x20a   : > { %v2803_v46 = vsel %vm644_vm0, %v2800_v15, %v2802_v1  ;;  %v2925_v53 = vadd.f32 %v2924_v7, %v2908_v26  ;;  %v2462_v52 = vadd.f32 %v2432_v19, %v2222_v28  ;;  %v1991_v42 = vadd.f32 %v1962_v2, %v4767_v38  ;;  %v2437_v3 = vpop.f32.mrf.mxu3 }
 0x20b   : > { %v3845_v27 = vpack.c.bf16 %v2803_v46, %v2801_v36 }
 0x20c   : > { %v2632_v10 = vadd.f32 %v2602_v58, %v2462_v52  ;;  %v2609_v58 = vpop.f32.mrf.mxu0 }
 0x20d   : > { %3873 = vst [vmem:[%s4096_s26 + $0x20] sm:$0xff] %v3845_v27  }
 0x20e   : > { %v2758_v14 = vmul.f32 %v2711_v29, %v2632_v10  ;;  %v2731_v29 = vpop.permute.xlu2 %2730 }
 0x20f   : > { %v2194_v20 = vpop.f32.mrf.mxu2 }
 0x210   : > { %v2804_v5 = vrot.slane %v2758_v14, 7  ;;  %v2884_v12 = vadd.f32 %v2883_v41, %v2758_v14  ;;  %v2909_v39 = vmul.f32 %v2758_v14, %v2758_v14  ;;  %v2223_v44 = vadd.f32 %v2194_v20, %v1991_v42 }
 0x211   : > { %v1965_v32 = vpop.f32.mrf.mxu1 }
 0x212   : > { %v2805_v47 = vsel %vm644_vm0, %v2802_v1, %v2804_v5  ;;  %v2926_v61 = vadd.f32 %v2925_v53, %v2909_v39  ;;  %v2463_v4 = vadd.f32 %v2434_v13, %v2223_v44  ;;  %v1992_v24 = vadd.f32 %v1965_v32, %v4778_v17  ;;  %v2439_v16 = vpop.f32.mrf.mxu3 }
 0x214   : > { %v2633_v31 = vadd.f32 %v2604_v25, %v2463_v4  ;;  %v2612_v8 = vpop.f32.mrf.mxu0 }
 0x216   : > { %v2759_v55 = vmul.f32 %v2716_v30, %v2633_v31  ;;  %v2736_v31 = vpop.permute.xlu0 %2735 }
 0x217   : > { %v2197_v38 = vpop.f32.mrf.mxu2 }
 0x218   : > { %v2806_v33 = vrot.slane %v2759_v55, 7  ;;  %v2885_v50 = vadd.f32 %v2884_v12, %v2759_v55  ;;  %v2910_v43 = vmul.f32 %v2759_v55, %v2759_v55  ;;  %v2224_v37 = vadd.f32 %v2197_v38, %v1992_v24 }
 0x219   : > { %v1967_v51 = vpop.f32.mrf.mxu1 }
 0x21a   : > { %v2807_v60 = vsel %vm644_vm0, %v2804_v5, %v2806_v33  ;;  %v2927_v63 = vadd.f32 %v2926_v61, %v2910_v43  ;;  %v2464_v19 = vadd.f32 %v2437_v3, %v2224_v37  ;;  %v1993_v15 = vadd.f32 %v1967_v51, %v4792_v34  ;;  %v2442_v48 = vpop.f32.mrf.mxu3 }
 0x21b   : > { %v3850_v6 = vpack.c.bf16 %v2807_v60, %v2805_v47 }
 0x21c   : > { %v2634_v40 = vadd.f32 %v2607_v62, %v2464_v19  ;;  %v2614_v3 = vpop.f32.mrf.mxu0 }
 0x21d   : > { %3874 = vst [vmem:[%s4096_s26 + $0x28] sm:$0xff] %v3850_v6  }
 0x21e   : > { %v2760_v57 = vmul.f32 %v2721_v11, %v2634_v40 }
 0x21f   : > { %v2199_v17 = vpop.f32.mrf.mxu2 }
 0x220   : > { %v2808_v23 = vrot.slane %v2760_v57, 7  ;;  %v2886_v56 = vadd.f32 %v2885_v50, %v2760_v57  ;;  %v2911_v22 = vmul.f32 %v2760_v57, %v2760_v57  ;;  %v2225_v35 = vadd.f32 %v2199_v17, %v1993_v15 }
 0x221   : > { %v1970_v36 = vpop.f32.mrf.mxu1 }
 0x222   : > { %v2809_v7 = vsel %vm644_vm0, %v2806_v33, %v2808_v23  ;;  %v2928_v18 = vadd.f32 %v2927_v63, %v2911_v22  ;;  %v2465_v9 = vadd.f32 %v2439_v16, %v2225_v35  ;;  %v1994_v25 = vadd.f32 %v1970_v36, %v4798_v54  ;;  %v2444_v42 = vpop.f32.mrf.mxu3 }
 0x224   : > { %v2635_v13 = vadd.f32 %v2609_v58, %v2465_v9  ;;  %v2617_v37 = vpop.f32.mrf.mxu0  ;;  %v2741_v58 = vpop.permute.xlu1 %2740 }
 0x225   : > { %v2746_v9 = vpop.permute.xlu2 %2745 }
 0x226   : > { %v2761_v59 = vmul.f32 %v2726_v0, %v2635_v13 }
 0x227   : > { %v2202_v1 = vpop.f32.mrf.mxu2 }
 0x228   : > { %v2810_v34 = vrot.slane %v2761_v59, 7  ;;  %v2887_v41 = vadd.f32 %v2886_v56, %v2761_v59  ;;  %v2912_v26 = vmul.f32 %v2761_v59, %v2761_v59  ;;  %v2226_v28 = vadd.f32 %v2202_v1, %v1994_v25 }
 0x229   : > { %v1972_v2 = vpop.f32.mrf.mxu1 }
 0x22a   : > { %v2811_v46 = vsel %vm644_vm0, %v2808_v23, %v2810_v34  ;;  %v2929_v53 = vadd.f32 %v2928_v18, %v2912_v26  ;;  %v2466_v52 = vadd.f32 %v2442_v48, %v2226_v28  ;;  %v1995_v20 = vadd.f32 %v1972_v2, %v4810_v45  ;;  %v2447_v24 = vpop.f32.mrf.mxu3 }
 0x22b   : > { %v3855_v27 = vpack.c.bf16 %v2811_v46, %v2809_v7 }
 0x22c   : > { %v2636_v10 = vadd.f32 %v2612_v8, %v2466_v52  ;;  %v2619_v7 = vpop.f32.mrf.mxu0 }
 0x22d   : > { %3875 = vst [vmem:[%s4096_s26 + $0x30] sm:$0xff] %v3855_v27  }
 0x22e   : > { %v2762_v14 = vmul.f32 %v2731_v29, %v2636_v10 }
 0x22f   : > { %v2204_v54 = vpop.f32.mrf.mxu2 }
 0x230   : > { %v2812_v5 = vrot.slane %v2762_v14, 7  ;;  %v2888_v12 = vadd.f32 %v2887_v41, %v2762_v14  ;;  %v2913_v39 = vmul.f32 %v2762_v14, %v2762_v14  ;;  %v2227_v44 = vadd.f32 %v2204_v54, %v1995_v20 }
 0x231   : > { %v1975_v32 = vpop.f32.mrf.mxu1 }
 0x232   : > { %v2813_v62 = vsel %vm644_vm0, %v2810_v34, %v2812_v5  ;;  %v2930_v47 = vadd.f32 %v2929_v53, %v2913_v39  ;;  %v2467_v61 = vadd.f32 %v2444_v42, %v2227_v44  ;;  %v1996_v55 = vadd.f32 %v1975_v32, %v4813_v49  ;;  %v2449_v56 = vpop.f32.mrf.mxu3 }
 0x234   : > { %v2637_v4 = vadd.f32 %v2614_v3, %v2467_v61 }
 0x236   : > { %v2763_v30 = vmul.f32 %v2736_v31, %v2637_v4 }
 0x237   : > { %v2207_v38 = vpop.f32.mrf.mxu2 }
 0x238   : > { %v2814_v45 = vrot.slane %v2763_v30, 7  ;;  %v2889_v33 = vadd.f32 %v2888_v12, %v2763_v30  ;;  %v2914_v50 = vmul.f32 %v2763_v30, %v2763_v30  ;;  %v2228_v43 = vadd.f32 %v2207_v38, %v1996_v55 }
 0x239   : > { %v1977_v19 = vpop.f32.mrf.mxu1 }
 0x23a   : > { %v2815_v51 = vsel %vm644_vm0, %v2812_v5, %v2814_v45  ;;  %v2931_v16 = vadd.f32 %v2930_v47, %v2914_v50  ;;  %v2468_v60 = vadd.f32 %v2447_v24, %v2228_v43  ;;  %v1997_v11 = vadd.f32 %v1977_v19, %v4819_v21 }
 0x23b   : > { %v3860_v63 = vpack.c.bf16 %v2815_v51, %v2813_v62 }
 0x23c   : > { %v2638_v6 = vadd.f32 %v2617_v37, %v2468_v60 }
 0x23d   : > { %3876 = vst [vmem:[%s4096_s26 + $0x38] sm:$0xff] %v3860_v63  }
 0x23e   : > { %v2764_v40 = vmul.f32 %v2741_v58, %v2638_v6 }
 0x23f   : > { %v2209_v49 = vpop.f32.mrf.mxu2 }
 0x240   : > { %v2816_v57 = vrot.slane %v2764_v40, 7  ;;  %v2890_v15 = vadd.f32 %v2889_v33, %v2764_v40  ;;  %v2915_v17 = vmul.f32 %v2764_v40, %v2764_v40  ;;  %v2229_v23 = vadd.f32 %v2209_v49, %v1997_v11 }
 0x242   : > { %v2817_v22 = vsel %vm644_vm0, %v2814_v45, %v2816_v57  ;;  %v2932_v35 = vadd.f32 %v2931_v16, %v2915_v17  ;;  %v2469_v36 = vadd.f32 %v2449_v56, %v2229_v23 }
 0x244   : > { %v2639_v18 = vadd.f32 %v2619_v7, %v2469_v36 }
 0x246   : > { %v2765_v48 = vmul.f32 %v2746_v9, %v2639_v18 }
 0x248   : > { %v2818_v13 = vrot.slane %v2765_v48, 7  ;;  %v2891_v0 = vadd.f32 %v2890_v15, %v2765_v48  ;;  %v2916_v8 = vmul.f32 %v2765_v48, %v2765_v48 }
 0x24a   : > { %v2819_v21 = vsel %vm644_vm0, %v2816_v57, %v2818_v13  ;;  %v2892_v59 = vrot.slane %v2891_v0, 4  ;;  %v2933_v25 = vadd.f32 %v2932_v35, %v2916_v8 }
 0x24b   : > { %v3865_v1 = vpack.c.bf16 %v2819_v21, %v2817_v22 }
 0x24c   : > { %v2893_v34 = vadd.f32 %v2892_v59, %v2891_v0  ;;  %v2934_v41 = vrot.slane %v2933_v25, 4 }
 0x24d   : > { %3877 = vst [vmem:[%s4096_s26 + $0x40] sm:$0xff] %v3865_v1  }
 0x24e   : > { %v2894_v26 = vrot.slane %v2893_v34, 2  ;;  %v2935_v28 = vadd.f32 %v2934_v41, %v2933_v25 }
 0x250   : > { %v2895_v2 = vadd.f32 %v2894_v26, %v2893_v34  ;;  %v2936_v46 = vrot.slane %v2935_v28, 2 }
 0x252   : > { %v2896_v53 = vrot.slane %v2895_v2, 1  ;;  %v2937_v52 = vadd.f32 %v2936_v46, %v2935_v28 }
 0x254   : > { %v2897_v27 = vadd.f32 %v2896_v53, %v2895_v2  ;;  %v2938_v10 = vrot.slane %v2937_v52, 1 }
 0x256   : > { %2898 = vst [vmem:[%s4148_s13] sm:$0x1] %v2897_v27  ;;  %v2939_v29 = vadd.f32 %v2938_v10, %v2937_v52 }
 0x258   : > { %2940 = vst [vmem:[%s4148_s13 + $0x1] sm:$0x1] %v2939_v29 }
 0x259 PF: > { %s20_s10 = sadd.s32 1, %s3990_s10   ;;  %s4895_s28 = smov %s3982_s29 }
 0x25a   : > { %p17_p1 = scmp.ge.s32.totalorder %s20_s10, 6   ;;  %s4896_s3 = smov %s3986_s30 }
 0x25b   : > { %s4897_s29 = smov %s4900_s11  ;;  %s4898_s30 = smov %s4904_s12 }
 0x25c   :  { %19 = sbr.rel (!%p17_p1) target bundleno = 3 (0x3), region = 133 }

// kernel: upsample_bn_forward.4
= control target key start
LH: loop header
LB: loop body
LE: loop exit
PB: predicated region body
PF: predicated region fallthrough
CT: control target
= control target key end

     0   :  { %s4476_s30 = smov 0   ;;  %s4478_s10 = smov 0   ;;  %s5475_s0 = inlined_call_operand.vmem [shape: f32[144,1], index: 0, kind: input, shape index: {}]   ;;  %s5476_s1 = inlined_call_operand.vmem [shape: f32[144,1], index: 1, kind: input, shape index: {}]   ;;  %s5477_s2 = inlined_call_operand.vmem [shape: f32[1,128], index: 2, kind: input, shape index: {}]   ;;  %s5478_s3 = inlined_call_operand.vmem [shape: f32[1,128], index: 3, kind: input, shape index: {}]   ;;  %s5479_s4 = inlined_call_operand.vmem [shape: bf16[2,288,128], index: 4, kind: input, shape index: {}]   ;;  %s5480_s5 = inlined_call_operand.vmem [shape: bf16[2,16,18,128], index: 5, kind: input, shape index: {}, may-alias: {5,6}]   ;;  %s5481_s6 = inlined_call_operand.vmem [shape: bf16[2,16,18,128], index: 6, kind: input, shape index: {}, may-alias: {5,6}]   ;;  %s5482_s7 = inlined_call_operand.vmem [shape: bf16[3,3,128,128], index: 7, kind: input, shape index: {}]   ;;  %s5483_s8 = inlined_call_operand.vmem [shape: bf16[2,288,128], index: 8, kind: output, shape index: {0}]   ;;  %s5484_s9 = inlined_call_operand.vmem [shape: f32[2,2,2,128], index: 9, kind: output, shape index: {1}]  }
   0x1   :  { %5488 = sst [smem:[#allocation7_spill]] %s5480_s5  ;;  %s4480_s11 = smov 0  }
   0x2   :  { %5489 = sst [smem:[#allocation8_spill]] %s5483_s8  ;;  %s4482_s12 = smov 0  }
   0x3   :  { %s4484_s13 = smov 0  }
   0x4 LB: > { %5490 = sst [smem:[#allocation3_spill]] %s4411_s11  ;;  %s35_s14 = sadd.s32 1, %s4411_s11  ;;  %s4419_s13 = sphi %s4484_s13, %s20_s13   ;;  %s4415_s12 = sphi %s4482_s12, %s5502_s12   ;;  %s4411_s11 = sphi %s4480_s11, %s5501_s11   ;;  %s4407_s10 = sphi %s4478_s10, %s5500_s10   ;;  %s4403_s30 = sphi %s4476_s30, %s5499_s30  }
   0x5   : > { %5491 = sst [smem:[#allocation4_spill]] %s4415_s12  ;;  %s39_s15 = sadd.s32 1, %s4415_s12 }
   0x6   : > { %p37_p0 = scmp.ge.s32.totalorder %s35_s14, 2  ;;  %p3541_p1 = scmp.ge.s32.totalorder %s4419_s13, 1 }
   0x7   : > { %p426_p2 = scmp.lt.s32.totalorder %s4419_s13, 5 }
   0x8   : > { %s5504_s14 = smov (%p37_p0, %s35_s14), 0  ;;  %s5506_s15 = smov (!%p37_p0, %s39_s15), %s4415_s12 }
   0x9   : > { %5492 = sst [smem:[#allocation5_spill]] %s5504_s14  ;;  %p427_p3 = pnand %p3541_p1, %p426_p2 }
   0xa   : > { %p41_p4 = scmp.ge.s32.totalorder %s5506_s15, 2  ;;  %s530_s22 = smul.u32 (!%p427_p3), 18, %s4403_s30 }
   0xb   : > { %430 = sbr.rel (%p427_p3) target bundleno = 997 (0x3e5), region = 52  ;;  %p531_p5 = scmp.lt.s32.totalorder (!%p427_p3), %s4407_s10, 1 }
   0xc   : > { %s5508_s15 = smov (%p41_p4, %s5506_s15), 0  ;;  %s3543_s23 = sshll.u32 (!%p427_p3), %s4403_s30, 3 }
   0xd   : > { %5493 = sst [smem:[#allocation6_spill]] %s5508_s15  ;;  %p533_p6 = scmp.lt.s32.totalorder (!%p427_p3), %s530_s22, 35 }
   0xe   : > { %s3544_s24 = sadd.s32 (!%p427_p3), 4294967295, %s3543_s23  ;;  %s564_s15 = sadd.s32 (!%p427_p3), 8, %s3543_s23 }
   0xf   : > { %p545_p7 = scmp.gt.s32.totalorder (!%p427_p3), %s3544_s24, 0  ;;  %p3545_p8 = scmp.lt.s32.totalorder (!%p427_p3), %s3544_s24, 15 }
  0x10   : > { %v630_v0 = vld [vmem:[%s5475_s0 + $0x20] sm:$0xff]  ;;  %v628_v1 = vld [vmem:[%s5475_s0 + $0x10] sm:$0xff]  ;;  %v4421_v3 = vmov 0   ;;  %s5510_s10 = smov (!%p531_p5, %s4407_s10), 1  ;;  %s5512_s22 = smov (!%p533_p6, %s530_s22), 35  ;;  %v631_v4 = vld [vmem:[%s5475_s0 + $0x28] sm:$0xff] }
  0x11   : > { %v4517_v2 = vld [vmem:[%s5475_s0] sm:$0xff]  ;;  %4367 = vset.pattern.permute.xlu2 %v4421_v3  ;;  %4366 = vset.pattern.permute.xlu1 %v4421_v3  ;;  %s4316_s25 = smul.u32 36, %s5510_s10  ;;  %v629_v5 = vld [vmem:[%s5475_s0 + $0x18] sm:$0xff]  ;;  %v4539_v6 = vld [vmem:[%s5475_s0 + $0x8] sm:$0xff]  ;;  %p565_p9 = scmp.lt.s32.totalorder %s564_s15, 15  ;;  %vm904_vm2 = vcmask 1040384  }
  0x12   : > { %4365 = vset.pattern.permute.xlu0 %v4421_v3  ;;  %782 = vperm.xlu2 %4367, %v630_v0   ;;  %s546_s26 = scalar_select %p545_p7, %s3544_s24, 0  ;;  %v634_v7 = vld [vmem:[%s5475_s0 + $0x40] sm:$0xff]  ;;  %v633_v8 = vld [vmem:[%s5475_s0 + $0x38] sm:$0xff]  ;;  %v632_v9 = vld [vmem:[%s5475_s0 + $0x30] sm:$0xff]  ;;  %vm905_vm3 = vcmask 1044484  }
  0x13   : > { %772 = vperm.xlu1 %4366, %v628_v1   ;;  %762 = vperm.xlu0 %4365, %v4517_v2   ;;  %s4531_s29 = sadd.s32 %s4316_s25, %s5512_s22  ;;  %s4318_s21 = smul.u32 48, %s5510_s10  ;;  %v637_v10 = vld [vmem:[%s5475_s0 + $0x58] sm:$0xff]  ;;  %v636_v11 = vld [vmem:[%s5475_s0 + $0x50] sm:$0xff]  ;;  %v635_v12 = vld [vmem:[%s5475_s0 + $0x48] sm:$0xff] }
  0x14   : > { %s5486_s20 = sshll.u32 %s4531_s29, 2  ;;  %s5514_s26 = smov (!%p3545_p8, %s546_s26), 15  ;;  %v640_v13 = vld [vmem:[%s5475_s0 + $0x70] sm:$0xff]  ;;  %v639_v14 = vld [vmem:[%s5475_s0 + $0x68] sm:$0xff]  ;;  %v638_v15 = vld [vmem:[%s5475_s0 + $0x60] sm:$0xff] }
  0x15   : > { %s5494_s8 = sld [smem:[#allocation8_spill]]  ;;  %s4317_s27 = smul.u32 3, %s5514_s26  ;;  %v643_v16 = vld [vmem:[%s5475_s0 + $0x88] sm:$0xff]  ;;  %v642_v17 = vld [vmem:[%s5475_s0 + $0x80] sm:$0xff]  ;;  %v641_v18 = vld [vmem:[%s5475_s0 + $0x78] sm:$0xff] }
  0x16   : > { %s5516_s15 = smov (!%p565_p9, %s564_s15), 15  ;;  %p601_p10 = scmp.lt.s32.totalorder %s4403_s30, 1  ;;  %v4616_v20 = vld [vmem:[%s5477_s2] ss:$0 sm:$0xff]  ;;  %vm4635_vm4 = vmor %vm904_vm2, %vm905_vm3 }
  0x17   : > { %s556_s28 = sadd.s32 %s4318_s21, %s4317_s27  ;;  %s5495_s5 = sld [smem:[#allocation7_spill]]  ;;  %v4621_v22 = vld [vmem:[%s5478_s3] ss:$0 sm:$0xff] }
  0x18   : > { %s3550_s17 = sshll.u32 %s556_s28, 2  ;;  %s3557_s27 = sshll.u32 %s5510_s10, 1 }
  0x19   : > { %s5518_s15 = smov (!%p565_p9, %s5516_s15), 15  ;;  %p3559_p11 = scmp.le.s32.totalorder %s4403_s30, 0 }
  0x1a   : > { %787 = vperm.xlu2 %4367, %v631_v4   ;;  %s4319_s28 = smul.u32 3, %s5518_s15 }
  0x1b   : > { %777 = vperm.xlu1 %4366, %v629_v5   ;;  %767 = vperm.xlu0 %4365, %v4539_v6   ;;  %s4549_s25 = scalar_lea.vmem %s5494_s8, %s5486_s20 }
  0x1c   : > { %s602_s20 = scalar_select %p601_p10, %s4403_s30, 1 }
  0x1d   : > { %s4564_s26 = scalar_lea.vmem %s5495_s5, %s3550_s17  ;;  %s576_s23 = sadd.s32 %s4319_s28, %s4318_s21 }
  0x1e   : > { %s604_s16 = sadd.s32 %s3557_s27, %s602_s20  ;;  %s3555_s19 = sshll.u32 %s576_s23, 2 }
  0x1f   : > { %s3558_s18 = sshll.u32 %s604_s16, 1  ;;  %s4579_s24 = scalar_lea.vmem %s5481_s6, %s3555_s19 }
  0x20   : > { %s4571_s12 = scalar_lea.vmem %s5484_s9, %s3558_s18  ;;  %s5496_s17 = sshll.u32 %s4531_s29, 2 }
  0x21   : > { %s4610_s21 = scalar_lea.vmem %s5479_s4, %s5496_s17 }
  0x22   : > { %802 = vperm.xlu2 %4367, %v634_v7   ;;  %v4274_v19 = vld [vmem:[%s4610_s21 + $0x10] sm:$0xff]   ;;  %v4273_v34 = vld [vmem:[%s4610_s21 + $0x8] sm:$0xff]   ;;  %v4176_v35 = vld [vmem:[%s4610_s21] sm:$0xff]  }
  0x23   : > { %797 = vperm.xlu1 %4366, %v633_v8   ;;  %792 = vperm.xlu0 %4365, %v632_v9   ;;  %v4185_v21 = vunpack.c.l.bf16 %v4274_v19  ;;  %v4186_v25 = vunpack.c.h.bf16 %v4274_v19  ;;  %v4181_v37 = vunpack.c.l.bf16 %v4273_v34  ;;  %v4177_v39 = vunpack.c.l.bf16 %v4176_v35  ;;  %v4646_v50 = vld [vmem:[%s4610_s21 + $0x20] sm:$0xff]   ;;  %v4277_v55 = vld [vmem:[%s4610_s21 + $0x28] sm:$0xff]   ;;  %v4275_v59 = vld [vmem:[%s4610_s21 + $0x18] sm:$0xff]  }
  0x24   : > { %v4182_v52 = vunpack.c.h.bf16 %v4273_v34  ;;  %v4178_v53 = vunpack.c.h.bf16 %v4176_v35  ;;  %v4193_v56 = vunpack.c.l.bf16 %v4646_v50  ;;  %v4654_v58 = vld [vmem:[%s4610_s21 + $0x40] sm:$0xff]   ;;  %v4198_v63 = vunpack.c.h.bf16 %v4277_v55 }
  0x25   : > { %v670_v23 = vmul.f32 %v4616_v20, %v4185_v21  ;;  %v671_v27 = vmul.f32 %v4616_v20, %v4186_v25  ;;  %v668_v42 = vmul.f32 %v4616_v20, %v4181_v37  ;;  %v666_v45 = vmul.f32 %v4616_v20, %v4177_v39 }
  0x26   : > { %v669_v61 = vmul.f32 %v4616_v20, %v4182_v52  ;;  %v667_v62 = vmul.f32 %v4616_v20, %v4178_v53  ;;  %v4210_v0 = vunpack.c.h.bf16 %v4654_v58  ;;  %v4190_v1 = vunpack.c.h.bf16 %v4275_v59  ;;  %v4278_v52 = vld [vmem:[%s4610_s21 + $0x30] sm:$0xff]  }
  0x27   : > { %v692_v24 = vadd.f32 %v4621_v22, %v670_v23  ;;  %v693_v29 = vadd.f32 %v4621_v22, %v671_v27  ;;  %v690_v48 = vadd.f32 %v4621_v22, %v668_v42  ;;  %v688_v51 = vadd.f32 %v4621_v22, %v666_v45 }
  0x28   : > { %v674_v4 = vmul.f32 %v4616_v20, %v4193_v56  ;;  %v691_v8 = vadd.f32 %v4621_v22, %v669_v61  ;;  %v689_v9 = vadd.f32 %v4621_v22, %v667_v62  ;;  %v4197_v25 = vunpack.c.l.bf16 %v4277_v55 }
  0x29   : > { %v728_v26 = vmul.f32 0.01, %v692_v24  ;;  %vm710_vm0 = vcmp.ge.f32.partialorder %v692_v24, 0.0  ;;  %v729_v32 = vmul.f32 0.01, %v693_v29  ;;  %vm711_vm1 = vcmp.ge.f32.partialorder %v693_v29, 0.0 }
  0x2a   : > { %817 = vperm.xlu2 %4367, %v637_v10   ;;  %v726_v57 = vmul.f32 0.01, %v690_v48  ;;  %vm708_vm5 = vcmp.ge.f32.partialorder %v690_v48, 0.0  ;;  %v724_v60 = vmul.f32 0.01, %v688_v51  ;;  %vm706_vm6 = vcmp.ge.f32.partialorder %v688_v51, 0.0 }
  0x2b   : > { %812 = vperm.xlu1 %4366, %v636_v11   ;;  %807 = vperm.xlu0 %4365, %v635_v12   ;;  %v746_v28 = vsel %vm710_vm0, %v692_v24, %v728_v26  ;;  %v747_v36 = vsel %vm711_vm1, %v693_v29, %v729_v32  ;;  %v4189_v10 = vunpack.c.l.bf16 %v4275_v59  ;;  %v677_v12 = vmul.f32 %v4616_v20, %v4198_v63 }
  0x2c   : > { %v744_v5 = vsel %vm708_vm5, %v690_v48, %v726_v57  ;;  %v742_v7 = vsel %vm706_vm6, %v688_v51, %v724_v60  ;;  %v727_v21 = vmul.f32 0.01, %v691_v8  ;;  %v725_v23 = vmul.f32 0.01, %v689_v9 }
  0x2d   : > { %v672_v24 = vmul.f32 %v4616_v20, %v4189_v10  ;;  %v4671_v26 = vadd.f32 %v4621_v22, %v677_v12  ;;  %vm709_vm7 = vcmp.ge.f32.partialorder %v691_v8, 0.0  ;;  %vm707_vm8 = vcmp.ge.f32.partialorder %v689_v9, 0.0 }
  0x2e   : > { %v745_v35 = vsel %vm709_vm7, %v691_v8, %v727_v21  ;;  %v676_v39 = vmul.f32 %v4616_v20, %v4197_v25 }
  0x2f   : > { %v694_v37 = vadd.f32 %v4621_v22, %v672_v24  ;;  %vm717_vm10 = vcmp.ge.f32.partialorder %v4671_v26, 0.0  ;;  %v735_v55 = vmul.f32 0.01, %v4671_v26 }
  0x30   : > { %v698_v57 = vadd.f32 %v4621_v22, %v676_v39 }
  0x31   : > { %v730_v56 = vmul.f32 0.01, %v694_v37  ;;  %vm712_vm13 = vcmp.ge.f32.partialorder %v694_v37, 0.0 }
  0x32   : > { %832 = vperm.xlu2 %4367, %v640_v13   ;;  %v734_v12 = vmul.f32 0.01, %v698_v57  ;;  %vm716_vm14 = vcmp.ge.f32.partialorder %v698_v57, 0.0 }
  0x33   : > { %827 = vperm.xlu1 %4366, %v639_v14   ;;  %822 = vperm.xlu0 %4365, %v638_v15   ;;  %v683_v15 = vmul.f32 %v4616_v20, %v4210_v0  ;;  %v748_v10 = vsel %vm712_vm13, %v694_v37, %v730_v56  ;;  %v4712_v37 = vld [vmem:[%s5475_s0 + $0x10] sm:$0x3] }
  0x35   : > { %v705_v29 = vadd.f32 %v4621_v22, %v683_v15 }
  0x37   : > { %vm723_vm11 = vcmp.ge.f32.partialorder %v705_v29, 0.0 }
  0x3a   : > { %847 = vperm.xlu2 %4367, %v643_v16   ;;  %v673_v16 = vmul.f32 %v4616_v20, %v4190_v1  ;;  %v4202_v1 = vunpack.c.h.bf16 %v4278_v52 }
  0x3b   : > { %842 = vperm.xlu1 %4366, %v642_v17   ;;  %837 = vperm.xlu0 %4365, %v641_v18   ;;  %v696_v17 = vadd.f32 %v4621_v22, %v674_v4 }
  0x3d   : > { %v732_v32 = vmul.f32 0.01, %v696_v17  ;;  %vm714_vm9 = vcmp.ge.f32.partialorder %v696_v17, 0.0 }
  0x3f   : > { %v750_v53 = vsel %vm714_vm9, %v696_v17, %v732_v32 }
  0x6c   : > { %v783_v30 = vpop.permute.xlu2 %782 }
  0x6d   : > { %v854_v31 = vmul.f32 %v783_v30, %v746_v28  ;;  %v4674_v28 = vld [vmem:[%s4610_s21 + $0x38] sm:$0xff]   ;;  %v695_v30 = vadd.f32 %v4621_v22, %v673_v16 }
  0x6f   : > { %v872_v33 = vpack.c.bf16 %v854_v31, %v854_v31  ;;  %v4194_v31 = vunpack.c.h.bf16 %v4646_v50  ;;  %v731_v45 = vmul.f32 0.01, %v695_v30  ;;  %vm713_vm12 = vcmp.ge.f32.partialorder %v695_v30, 0.0 }
  0x71   : > { %v4629_v38 = vrot.slane %v872_v33, 7  ;;  %v675_v48 = vmul.f32 %v4616_v20, %v4194_v31  ;;  %v749_v63 = vsel %vm713_vm12, %v695_v30, %v731_v45  ;;  %v753_v31 = vsel %vm717_vm10, %v4671_v26, %v735_v55 }
  0x72   : > { %v752_v26 = vsel %vm716_vm14, %v698_v57, %v734_v12 }
  0x73   : > { %v920_v43 = vrot.slane %v4629_v38, 4  ;;  %v697_v0 = vadd.f32 %v4621_v22, %v675_v48 }
  0x74   : > { %v788_v40 = vpop.permute.xlu2 %787 }
  0x75   : > { %v855_v41 = vmul.f32 %v788_v40, %v747_v36  ;;  %v743_v36 = vsel %vm707_vm8, %v689_v9, %v725_v23  ;;  %v733_v24 = vmul.f32 0.01, %v697_v0  ;;  %vm715_vm15 = vcmp.ge.f32.partialorder %v697_v0, 0.0 }
  0x77   : > { %v873_v44 = vpack.c.bf16 %v855_v41, %v855_v41  ;;  %v4205_v41 = vunpack.c.l.bf16 %v4674_v28  ;;  %v751_v45 = vsel %vm715_vm15, %v697_v0, %v733_v24 }
  0x79   : > { %v4639_v47 = vrot.slane %v873_v44, 7  ;;  %v741_v44 = vmul.f32 0.01, %v705_v29  ;;  %v680_v59 = vmul.f32 %v4616_v20, %v4205_v41 }
  0x7b   : > { %v922_v49 = vsel %vm4635_vm4, %v920_v43, %v4639_v47  ;;  %v759_v62 = vsel %vm723_vm11, %v705_v29, %v741_v44  ;;  %v923_v39 = vrot.slane %v4639_v47, 4 }
  0x7c   : > { %984 = vst [vmem:[#allocation2 + $0x1c] sm:$0xf] %v922_v49  ;;  %v4649_v54 = vpop.permute.xlu2 %802 }
  0x7d   : > { %v858_v9 = vmul.f32 %v4649_v54, %v750_v53  ;;  %v679_v54 = vmul.f32 %v4616_v20, %v4202_v1 }
  0x7f   : > { %v701_v48 = vadd.f32 %v4621_v22, %v679_v54 }
  0x81   : > { %v737_v0 = vmul.f32 0.01, %v701_v48  ;;  %vm719_vm1 = vcmp.ge.f32.partialorder %v701_v48, 0.0 }
  0x84   : > { %v4663_v11 = vpop.permute.xlu2 %817 }
  0x85   : > { %v773_v13 = vpop.permute.xlu1 %772  ;;  %v763_v14 = vpop.permute.xlu0 %762 }
  0x86   : > { %v852_v18 = vmul.f32 %v773_v13, %v744_v5  ;;  %v850_v19 = vmul.f32 %v763_v14, %v742_v7  ;;  %v4201_v13 = vunpack.c.l.bf16 %v4278_v52  ;;  %v4206_v52 = vunpack.c.h.bf16 %v4674_v28 }
  0x88   : > { %v868_v27 = vpack.c.bf16 %v850_v19, %v850_v19  ;;  %v870_v33 = vpack.c.bf16 %v852_v18, %v852_v18 }
  0x8a   : > { %v907_v34 = vrot.slane %v868_v27, 7  ;;  %v912_v49 = vrot.slane %v870_v33, 7  ;;  %v678_v33 = vmul.f32 %v4616_v20, %v4201_v13 }
  0x8c   : > { %979 = vst [vmem:[#allocation2 + $0x8] sm:$0xe] %v907_v34  ;;  %v4682_v40 = vpop.permute.xlu2 %832  ;;  %v914_v4 = vrot.slane %v912_v49, 4  ;;  %v908_v5 = vrot.slane %v907_v34, 4  ;;  %v876_v34 = vpack.c.bf16 %v858_v9, %v858_v9 }
  0x8d   : > { %v778_v42 = vpop.permute.xlu1 %777  ;;  %v768_v43 = vpop.permute.xlu0 %767 }
  0x8e   : > { %v853_v50 = vmul.f32 %v778_v42, %v745_v35  ;;  %v851_v51 = vmul.f32 %v768_v43, %v743_v36  ;;  %v702_v35 = vadd.f32 %v4621_v22, %v680_v59  ;;  %v4209_v42 = vunpack.c.l.bf16 %v4654_v58 }
  0x8f   : > { %v930_v47 = vrot.slane %v876_v34, 7 }
  0x90   : > { %v871_v60 = vpack.c.bf16 %v853_v50, %v853_v50  ;;  %v869_v61 = vpack.c.bf16 %v851_v51, %v851_v51  ;;  %v700_v51 = vadd.f32 %v4621_v22, %v678_v33  ;;  %vm720_vm0 = vcmp.ge.f32.partialorder %v702_v35, 0.0 }
  0x91   : > { %v738_v58 = vmul.f32 0.01, %v702_v35 }
  0x92   : > { %v915_v7 = vrot.slane %v871_v60, 7  ;;  %v909_v8 = vrot.slane %v869_v61, 7  ;;  %v682_v60 = vmul.f32 %v4616_v20, %v4209_v42  ;;  %v736_v1 = vmul.f32 0.01, %v700_v51 }
  0x93   : > { %vm718_vm3 = vcmp.ge.f32.partialorder %v700_v51, 0.0 }
  0x94   : > { %v916_v14 = vsel %vm4635_vm4, %v914_v4, %v915_v7  ;;  %v917_v15 = vrot.slane %v915_v7, 4  ;;  %v910_v16 = vsel %vm4635_vm4, %v908_v5, %v909_v8  ;;  %v911_v17 = vrot.slane %v909_v8, 4  ;;  %v848_v18 = vpop.permute.xlu2 %847 }
  0x95   : > { %982 = vst [vmem:[#allocation2 + $0x14] sm:$0xf] %v916_v14  ;;  %v867_v19 = vmul.f32 %v848_v18, %v759_v62  ;;  %v798_v21 = vpop.permute.xlu1 %797  ;;  %v793_v23 = vpop.permute.xlu0 %792  ;;  %v681_v4 = vmul.f32 %v4616_v20, %v4206_v52  ;;  %v756_v8 = vsel %vm720_vm0, %v702_v35, %v738_v58  ;;  %v704_v9 = vadd.f32 %v4621_v22, %v682_v60 }
  0x96   : > { %v919_v25 = vsel %vm4635_vm4, %v917_v15, %v4629_v38  ;;  %v913_v27 = vsel %vm4635_vm4, %v911_v17, %v912_v49  ;;  %980 = vst [vmem:[#allocation2 + $0xc] sm:$0xf] %v910_v16  ;;  %v857_v29 = vmul.f32 %v798_v21, %v749_v63  ;;  %v856_v30 = vmul.f32 %v793_v23, %v748_v10 }
  0x97   : > { %983 = vst [vmem:[#allocation2 + $0x18] sm:$0xf] %v919_v25  ;;  %v885_v32 = vpack.c.bf16 %v867_v19, %v867_v19  ;;  %v861_v49 = vmul.f32 %v4663_v11, %v753_v31  ;;  %v932_v10 = vrot.slane %v930_v47, 4  ;;  %v755_v15 = vsel %vm719_vm1, %v701_v48, %v737_v0 }
  0x98   : > { %981 = vst [vmem:[#allocation2 + $0x10] sm:$0xf] %v913_v27  ;;  %v875_v38 = vpack.c.bf16 %v857_v29, %v857_v29  ;;  %v874_v36 = vpack.c.bf16 %v856_v30, %v856_v30  ;;  %v754_v16 = vsel %vm718_vm3, %v700_v51, %v736_v1  ;;  %v703_v17 = vadd.f32 %v4621_v22, %v681_v4 }
  0x99   : > { %v4715_v41 = vrot.slane %v885_v32, 7  ;;  %v879_v63 = vpack.c.bf16 %v861_v49, %v861_v49  ;;  %v864_v18 = vmul.f32 %v4682_v40, %v756_v8  ;;  %vm722_vm5 = vcmp.ge.f32.partialorder %v704_v9, 0.0 }
  0x9a   : > { %v927_v43 = vrot.slane %v875_v38, 7  ;;  %v924_v44 = vrot.slane %v874_v36, 7  ;;  %v740_v22 = vmul.f32 0.01, %v704_v9  ;;  %v739_v40 = vmul.f32 0.01, %v703_v17 }
  0x9b   : > { %v959_v50 = vrot.slane %v4715_v41, 4  ;;  %v939_v14 = vrot.slane %v879_v63, 7  ;;  %v882_v30 = vpack.c.bf16 %v864_v18, %v864_v18  ;;  %vm721_vm6 = vcmp.ge.f32.partialorder %v703_v17, 0.0 }
  0x9c   : > { %v929_v53 = vrot.slane %v927_v43, 4  ;;  %v925_v55 = vsel %vm4635_vm4, %v923_v39, %v924_v44  ;;  %v926_v56 = vrot.slane %v924_v44, 4  ;;  %v758_v38 = vsel %vm722_vm5, %v704_v9, %v740_v22 }
  0x9d   : > { %997 = vst [vmem:[#allocation2 + $0x50] sm:$0x1] %v959_v50  ;;  %v813_v57 = vpop.permute.xlu1 %812  ;;  %v808_v59 = vpop.permute.xlu0 %807  ;;  %v941_v33 = vrot.slane %v939_v14, 4  ;;  %v757_v36 = vsel %vm721_vm6, %v703_v17, %v739_v40  ;;  %v948_v39 = vrot.slane %v882_v30, 7 }
  0x9e   : > { %v931_v11 = vsel %vm4635_vm4, %v929_v53, %v930_v47  ;;  %v928_v61 = vsel %vm4635_vm4, %v926_v56, %v927_v43  ;;  %985 = vst [vmem:[#allocation2 + $0x20] sm:$0xf] %v925_v55  ;;  %v860_v28 = vmul.f32 %v813_v57, %v752_v26  ;;  %v859_v62 = vmul.f32 %v808_v59, %v751_v45 }
  0x9f   : > { %987 = vst [vmem:[#allocation2 + $0x28] sm:$0xf] %v931_v11  ;;  %v950_v53 = vrot.slane %v948_v39, 4 }
  0xa0   : > { %986 = vst [vmem:[#allocation2 + $0x24] sm:$0xf] %v928_v61  ;;  %v878_v5 = vpack.c.bf16 %v860_v28, %v860_v28  ;;  %v877_v7 = vpack.c.bf16 %v859_v62, %v859_v62 }
  0xa2   : > { %v936_v12 = vrot.slane %v878_v5, 7  ;;  %v933_v13 = vrot.slane %v877_v7, 7 }
  0xa4   : > { %v938_v20 = vrot.slane %v936_v12, 4  ;;  %v934_v19 = vsel %vm4635_vm4, %v932_v10, %v933_v13  ;;  %v935_v21 = vrot.slane %v933_v13, 4 }
  0xa5   : > { %988 = vst [vmem:[#allocation2 + $0x2c] sm:$0xf] %v934_v19  ;;  %v828_v23 = vpop.permute.xlu1 %827  ;;  %v823_v24 = vpop.permute.xlu0 %822 }
  0xa6   : > { %v940_v54 = vsel %vm4635_vm4, %v938_v20, %v939_v14  ;;  %v937_v25 = vsel %vm4635_vm4, %v935_v21, %v936_v12  ;;  %v863_v27 = vmul.f32 %v828_v23, %v755_v15  ;;  %v862_v29 = vmul.f32 %v823_v24, %v754_v16 }
  0xa7   : > { %990 = vst [vmem:[#allocation2 + $0x34] sm:$0xf] %v940_v54 }
  0xa8   : > { %989 = vst [vmem:[#allocation2 + $0x30] sm:$0xf] %v937_v25  ;;  %v881_v31 = vpack.c.bf16 %v863_v27, %v863_v27  ;;  %v880_v32 = vpack.c.bf16 %v862_v29, %v862_v29 }
  0xaa   : > { %v945_v34 = vrot.slane %v881_v31, 7  ;;  %v942_v35 = vrot.slane %v880_v32, 7 }
  0xac   : > { %v947_v26 = vrot.slane %v945_v34, 4  ;;  %v943_v42 = vsel %vm4635_vm4, %v941_v33, %v942_v35  ;;  %v944_v43 = vrot.slane %v942_v35, 4 }
  0xad   : > { %991 = vst [vmem:[#allocation2 + $0x38] sm:$0xf] %v943_v42  ;;  %v843_v44 = vpop.permute.xlu1 %842  ;;  %v838_v45 = vpop.permute.xlu0 %837 }
  0xae   : > { %v949_v48 = vsel %vm4635_vm4, %v947_v26, %v948_v39  ;;  %v946_v49 = vsel %vm4635_vm4, %v944_v43, %v945_v34  ;;  %v866_v50 = vmul.f32 %v843_v44, %v758_v38  ;;  %v865_v51 = vmul.f32 %v838_v45, %v757_v36 }
  0xaf   : > { %993 = vst [vmem:[#allocation2 + $0x40] sm:$0xf] %v949_v48 }
  0xb0   : > { %992 = vst [vmem:[#allocation2 + $0x3c] sm:$0xf] %v946_v49  ;;  %v884_v52 = vpack.c.bf16 %v866_v50, %v866_v50  ;;  %v883_v47 = vpack.c.bf16 %v865_v51, %v865_v51 }
  0xb2   : > { %v954_v55 = vrot.slane %v884_v52, 7  ;;  %v951_v56 = vrot.slane %v883_v47, 7 }
  0xb4   : > { %v956_v58 = vrot.slane %v954_v55, 4  ;;  %v952_v57 = vsel %vm4635_vm4, %v950_v53, %v951_v56  ;;  %v953_v59 = vrot.slane %v951_v56, 4  ;;  %1004 = sbr.rel (%p3559_p11) target bundleno = 315 (0x13b), region = 56 }
  0xb5   : > { %994 = vst [vmem:[#allocation2 + $0x44] sm:$0xf] %v952_v57 }
  0xb6   : > { %v958_v60 = vsel %vm4635_vm4, %v956_v58, %v4715_v41  ;;  %v955_v11 = vsel %vm4635_vm4, %v953_v59, %v954_v55 }
  0xb7   : > { %996 = vst [vmem:[#allocation2 + $0x4c] sm:$0xf] %v958_v60 }
  0xb8   : > { %995 = vst [vmem:[#allocation2 + $0x48] sm:$0xf] %v955_v11 }
  0xb9   : > { %v4422_v61 = vmov 0   ;;  %v1007_v41 = vld [vmem:[%s4564_s26 + $0x8] sm:$0x1]  ;;  %v4372_v62 = vld [vmem:[%s5477_s2] ss:$0 sm:$0xff] }
  0xba   : > { %4370 = vset.pattern.permute.xlu0 %v4422_v61  ;;  %4371 = vset.pattern.permute.xlu1 %v4422_v61  ;;  %v1010_v28 = vunpack.c.l.bf16 %v1007_v41  ;;  %v4212_v0 = vld [vmem:[%s4564_s26] sm:$0xff]  }
  0xbb   : > { %1036 = vperm.xlu0 %4370, %v4517_v2   ;;  %1046 = vperm.xlu1 %4371, %v4712_v37   ;;  %v4373_v1 = vld [vmem:[%s5478_s3] ss:$0 sm:$0xff]  ;;  %v4213_v4 = vunpack.c.l.bf16 %v4212_v0  ;;  %v4214_v7 = vunpack.c.h.bf16 %v4212_v0 }
  0xbc   : > { %v1017_v63 = vmul.f32 %v4372_v62, %v1010_v28 }
  0xbd   : > { %v1015_v8 = vmul.f32 %v4372_v62, %v4213_v4  ;;  %v1016_v10 = vmul.f32 %v4372_v62, %v4214_v7 }
  0xbe   : > { %v1024_v5 = vadd.f32 %v4373_v1, %v1017_v63 }
  0xbf   : > { %v1022_v12 = vadd.f32 %v4373_v1, %v1015_v8  ;;  %v1023_v14 = vadd.f32 %v4373_v1, %v1016_v10 }
  0xc0   : > { %v1030_v9 = vmul.f32 0.01, %v1024_v5  ;;  %vm1027_vm7 = vcmp.ge.f32.partialorder %v1024_v5, 0.0 }
  0xc1   : > { %v1028_v18 = vmul.f32 0.01, %v1022_v12  ;;  %v1029_v20 = vmul.f32 0.01, %v1023_v14  ;;  %vm1025_vm8 = vcmp.ge.f32.partialorder %v1022_v12, 0.0  ;;  %vm1026_vm9 = vcmp.ge.f32.partialorder %v1023_v14, 0.0 }
  0xc2   : > { %v1033_v13 = vsel %vm1027_vm7, %v1024_v5, %v1030_v9 }
  0xc3   : > { %1041 = vperm.xlu0 %4370, %v4539_v6   ;;  %v1031_v21 = vsel %vm1025_vm8, %v1022_v12, %v1028_v18  ;;  %v1032_v23 = vsel %vm1026_vm9, %v1023_v14, %v1029_v20 }
 0x12d   : > { %v1037_v15 = vpop.permute.xlu0 %1036  ;;  %v1047_v16 = vpop.permute.xlu1 %1046 }
 0x12e   : > { %v1051_v17 = vmul.f32 %v1047_v16, %v1033_v13  ;;  %v1049_v54 = vmul.f32 %v1037_v15, %v1031_v21 }
 0x130   : > { %v1054_v19 = vpack.c.bf16 %v1051_v17, %v1051_v17 }
 0x132   : > { %1057 = vst [vmem:[#allocation2 + $0x8] sm:$0x1] %v1054_v19 }
 0x135   : > { %v1042_v24 = vpop.permute.xlu0 %1041 }
 0x136   : > { %v1050_v25 = vmul.f32 %v1042_v24, %v1032_v23 }
 0x138   : > { %v4218_v27 = vpack.c.bf16 %v1050_v25, %v1049_v54 }
 0x13a   : > { %4219 = vst [vmem:[#allocation2] sm:$0xff] %v4218_v27  }
 0x13b PF: > { %p3560_p12 = scmp.ne.s32.totalorder %s4403_s30, 0 }
 0x13d   : > { %1061 = sbr.rel (%p3560_p12) target bundleno = 326 (0x146), region = 60 }
 0x142   : > { %v4423_v29 = vmov 0  }
 0x143   : > { %1062 = vst [vmem:[#allocation2] sm:$0xf] %v4423_v29 }
 0x144   : > { %1063 = vst [vmem:[#allocation2 + $0x4] sm:$0xf] %v4423_v29 }
 0x145   : > { %1064 = vst [vmem:[#allocation2 + $0x8] sm:$0x1] %v4423_v29 }
 0x146 PF: > { %p3561_p13 = scmp.ge.s32.totalorder %s4403_s30, 1 }
 0x148   : > { %1068 = sbr.rel (%p3561_p13) target bundleno = 468 (0x1d4), region = 64 }
 0x14d   : > { %v4424_v22 = vmov 0   ;;  %v4221_v40 = vld [vmem:[%s4579_s24] sm:$0xff]   ;;  %v1071_v32 = vld [vmem:[%s4579_s24 + $0x8] sm:$0x1] }
 0x14e   : > { %4374 = vset.pattern.permute.xlu0 %v4424_v22  ;;  %4375 = vset.pattern.permute.xlu1 %v4424_v22  ;;  %v4222_v30 = vunpack.c.l.bf16 %v4221_v40  ;;  %v4376_v31 = vld [vmem:[%s5477_s2] ss:$0 sm:$0xff]  ;;  %v1074_v35 = vunpack.c.l.bf16 %v1071_v32  ;;  %v4223_v36 = vunpack.c.h.bf16 %v4221_v40 }
 0x14f   : > { %1100 = vperm.xlu0 %4374, %v4517_v2   ;;  %1110 = vperm.xlu1 %4375, %v4712_v37   ;;  %v4377_v34 = vld [vmem:[%s5478_s3] ss:$0 sm:$0xff] }
 0x150   : > { %v1079_v33 = vmul.f32 %v4376_v31, %v4222_v30  ;;  %v1081_v2 = vmul.f32 %v4376_v31, %v1074_v35  ;;  %v1080_v37 = vmul.f32 %v4376_v31, %v4223_v36 }
 0x152   : > { %v1086_v38 = vadd.f32 %v4377_v34, %v1079_v33  ;;  %v1088_v26 = vadd.f32 %v4377_v34, %v1081_v2  ;;  %v1087_v42 = vadd.f32 %v4377_v34, %v1080_v37 }
 0x154   : > { %v1092_v39 = vmul.f32 0.01, %v1086_v38  ;;  %vm1089_vm10 = vcmp.ge.f32.partialorder %v1086_v38, 0.0  ;;  %v1094_v43 = vmul.f32 0.01, %v1088_v26  ;;  %vm1091_vm11 = vcmp.ge.f32.partialorder %v1088_v26, 0.0 }
 0x155   : > { %v1093_v48 = vmul.f32 0.01, %v1087_v42  ;;  %vm1090_vm12 = vcmp.ge.f32.partialorder %v1087_v42, 0.0 }
 0x156   : > { %v1097_v50 = vsel %vm1091_vm11, %v1088_v26, %v1094_v43 }
 0x157   : > { %1105 = vperm.xlu0 %4374, %v4539_v6   ;;  %v1095_v6 = vsel %vm1089_vm10, %v1086_v38, %v1092_v39  ;;  %v1096_v53 = vsel %vm1090_vm12, %v1087_v42, %v1093_v48 }
 0x1c1   : > { %v1101_v44 = vpop.permute.xlu0 %1100  ;;  %v1111_v49 = vpop.permute.xlu1 %1110 }
 0x1c2   : > { %v1113_v45 = vmul.f32 %v1101_v44, %v1095_v6  ;;  %v1115_v47 = vmul.f32 %v1111_v49, %v1097_v50 }
 0x1c4   : > { %v1116_v51 = vpack.c.bf16 %v1113_v45, %v1113_v45  ;;  %v1118_v58 = vpack.c.bf16 %v1115_v47, %v1115_v47 }
 0x1c6   : > { %v1122_v52 = vrot.slane %v1116_v51, 7  ;;  %v1127_v11 = vrot.slane %v1118_v58, 7 }
 0x1c8   : > { %1132 = vst [vmem:[#allocation2 + $0x50] sm:$0xe] %v1122_v52  ;;  %v1123_v59 = vrot.slane %v1122_v52, 4 }
 0x1c9   : > { %v1106_v55 = vpop.permute.xlu0 %1105 }
 0x1ca   : > { %v1114_v56 = vmul.f32 %v1106_v55, %v1096_v53 }
 0x1cc   : > { %v1117_v57 = vpack.c.bf16 %v1114_v56, %v1114_v56 }
 0x1ce   : > { %v1124_v60 = vrot.slane %v1117_v57, 7 }
 0x1d0   : > { %v1125_v61 = vsel %vm4635_vm4, %v1123_v59, %v1124_v60  ;;  %v1126_v41 = vrot.slane %v1124_v60, 4 }
 0x1d1   : > { %1133 = vst [vmem:[#allocation2 + $0x54] sm:$0xf] %v1125_v61 }
 0x1d2   : > { %v1128_v28 = vsel %vm4635_vm4, %v1126_v41, %v1127_v11 }
 0x1d3   : > { %1134 = vst [vmem:[#allocation2 + $0x58] sm:$0x3] %v1128_v28 }
 0x1d4 PF: > { %p3562_p0 = scmp.ne.s32.totalorder %s4403_s30, 1 }
 0x1d6   : > { %1138 = sbr.rel (%p3562_p0) target bundleno = 479 (0x1df), region = 68 }
 0x1db   : > { %v4425_v62 = vmov 0  }
 0x1dc   : > { %1139 = vst [vmem:[#allocation2 + $0x50] sm:$0xe] %v4425_v62 }
 0x1dd   : > { %1140 = vst [vmem:[#allocation2 + $0x54] sm:$0xf] %v4425_v62 }
 0x1de   : > { %1141 = vst [vmem:[#allocation2 + $0x58] sm:$0x3] %v4425_v62 }
 0x1df PF: > { %v4102_v63 = vld [vmem:[%s5482_s7 + $0x78] sm:$0xff]  ;;  %4378 = vset.pattern.permute.xlu0 %v4421_v3  ;;  %4379 = vset.pattern.permute.xlu1 %v4421_v3  ;;  %v4101_v46 = vld [vmem:[%s5482_s7 + $0x70] sm:$0xff]  ;;  %1142 = vst [vmem:[#allocation2 + $0x58] sm:$0xc] %v4421_v3  ;;  %v4100_v0 = vld [vmem:[%s5482_s7 + $0x68] sm:$0xff]  ;;  %vm1564_vm13 = vcmask 1046528  }
 0x1e0   : > { %4380 = vset.pattern.permute.xlu2 %v4421_v3  ;;  %4292 = vmatpush.bf16.msra.mxu1 %v4102_v63  ;;  %v4099_v1 = vld [vmem:[%s5482_s7 + $0x60] sm:$0xff]  ;;  %v4098_v3 = vld [vmem:[%s5482_s7 + $0x58] sm:$0xff]  ;;  %v4805_v4 = vld [vmem:[#allocation2 + $0x10] sm:$0xff]  ;;  %vm1244_vm4 = vsmask.f32 7424  ;;  %vm2848_vm0 = vcmask 1044480  }
 0x1e1   : > { %4293 = vmatpush.bf16.msra.mxu2 %v4102_v63  ;;  %4294 = vmatpush.bf16.msra.mxu3 %v4102_v63  ;;  %v4807_v5 = vld [vmem:[#allocation2 + $0x28] sm:$0xff]  ;;  %v4809_v7 = vld [vmem:[#allocation2 + $0x18] sm:$0xff]  ;;  %v4811_v8 = vld [vmem:[#allocation2] sm:$0xff]   ;;  %v1261_v10 = vshll.u32 %v4805_v4, 16  ;;  %v1265_v17 = vshrl.u32 %v4805_v4, 16  ;;  %vm2206_vm1 = vcmask 1045504  }
 0x1e2   : > { %1378 = vmatpush.bf16.msra.mxu0 %v4102_v63  ;;  %v4097_v9 = vld [vmem:[%s5482_s7 + $0x50] sm:$0xff]  ;;  %v1285_v13 = vshll.u32 %v4807_v5, 16  ;;  %v4820_v14 = vld [vmem:[#allocation2 + $0x40] sm:$0xff]  ;;  %v1248_v15 = vshll.u32 %v4811_v8, 16  ;;  %v1178_v16 = vld [vmem:[#allocation2 + $0x48] sm:$0x1] }
 0x1e3   : > { %v4817_v12 = vld [vmem:[#allocation2 + $0x30] sm:$0xff]  ;;  %v1269_v18 = vshll.u32 %v4809_v7, 16  ;;  %v4825_v20 = vld [vmem:[#allocation2 + $0x8] sm:$0xff]  ;;  %v1233_v19 = vunpack.c.l.b16 %v1178_v16  ;;  %v1309_v21 = vshll.u32 %v4820_v14, 16  ;;  %v4831_v24 = vrot.slane %v1261_v10, 1  ;;  %v4095_v34 = vld [vmem:[%s5482_s7 + $0x40] sm:$0xff] }
 0x1e4   : > { %4295 = vmatpush.bf16.msra.mxu1 %v4101_v46  ;;  %v4096_v23 = vld [vmem:[%s5482_s7 + $0x48] sm:$0xff]  ;;  %v4833_v54 = vrot.slane %v1285_v13, 1  ;;  %v1289_v25 = vshrl.u32 %v4807_v5, 16  ;;  %v1293_v27 = vshll.u32 %v4817_v12, 16  ;;  %v1246_v22 = vshrl.u32 %v4811_v8, 16  ;;  %v4110_v39 = vld [vmem:[%s5482_s7 + $0xb8] sm:$0xff] }
 0x1e5   : > { %4296 = vmatpush.bf16.msra.mxu2 %v4101_v46  ;;  %4297 = vmatpush.bf16.msra.mxu3 %v4101_v46  ;;  %v4837_v29 = vpack.c.b16 %v1233_v19, %v1233_v19  ;;  %v1250_v40 = vrot.slane %v1248_v15, 1  ;;  %v1253_v30 = vshll.u32 %v4825_v20, 16  ;;  %v4841_v31 = vrot.slane %v1309_v21, 1  ;;  %v4094_v37 = vld [vmem:[%s5482_s7 + $0x38] sm:$0xff]  ;;  %v4109_v50 = vld [vmem:[%s5482_s7 + $0xb0] sm:$0xff]  ;;  %v4876_v55 = vld [vmem:[#allocation2 + $0x20] sm:$0xff] }
 0x1e6   : > { %1379 = vmatpush.bf16.msra.mxu0 %v4101_v46  ;;  %v1313_v32 = vshrl.u32 %v4820_v14, 16  ;;  %v1267_v35 = vor.u32 %v1265_v17, %v4831_v24  ;;  %v1271_v38 = vrot.slane %v1269_v18, 1  ;;  %v1291_v36 = vor.u32 %v1289_v25, %v4833_v54  ;;  %v4126_v48 = vld [vmem:[%s5482_s7 + $0xf8] sm:$0xff]  ;;  %v4093_v51 = vld [vmem:[%s5482_s7 + $0x30] sm:$0xff]  ;;  %v4108_v57 = vld [vmem:[%s5482_s7 + $0xa8] sm:$0xff] }
 0x1e7   : > { %v1317_v33 = vshll.u32 %v4837_v29, 16  ;;  %v1295_v2 = vrot.slane %v1293_v27, 1  ;;  %v1251_v26 = vor.u32 %v1250_v40, %v1246_v22  ;;  %v1255_v6 = vrot.slane %v1253_v30, 1  ;;  %v4134_v49 = vld [vmem:[%s5482_s7 + $0x138] sm:$0xff]  ;;  %v4125_v52 = vld [vmem:[%s5482_s7 + $0xf0] sm:$0xff]  ;;  %v4092_v59 = vld [vmem:[%s5482_s7 + $0x28] sm:$0xff] }
 0x1e8   : > { %4298 = vmatpush.bf16.msra.mxu1 %v4100_v0  ;;  %v1315_v42 = vor.u32 %v1313_v32, %v4841_v31  ;;  %v1272_v44 = vsel %vm1244_vm4, %v1267_v35, %v1271_v38  ;;  %v4878_v56 = vld [vmem:[#allocation2 + $0x38] sm:$0xff]  ;;  %v4133_v58 = vld [vmem:[%s5482_s7 + $0x130] sm:$0xff]  ;;  %v1273_v60 = vshrl.u32 %v4809_v7, 16  ;;  %v1277_v11 = vshll.u32 %v4876_v55, 16  ;;  %v4124_v28 = vld [vmem:[%s5482_s7 + $0xe8] sm:$0xff] }
 0x1e9   : > { %4299 = vmatpush.bf16.msra.mxu2 %v4100_v0  ;;  %4300 = vmatpush.bf16.msra.mxu3 %v4100_v0  ;;  %v1319_v43 = vrot.slane %v1317_v33, 1  ;;  %v1296_v45 = vsel %vm1244_vm4, %v1291_v36, %v1295_v2  ;;  %v1256_v47 = vsel %vm1244_vm4, %v1251_v26, %v1255_v6  ;;  %v1297_v61 = vshrl.u32 %v4817_v12, 16  ;;  %v4132_v62 = vld [vmem:[%s5482_s7 + $0x128] sm:$0xff]  ;;  %v4107_v63 = vld [vmem:[%s5482_s7 + $0xa0] sm:$0xff]  ;;  %v4106_v16 = vld [vmem:[%s5482_s7 + $0x98] sm:$0xff] }
 0x1ea   : > { %1380 = vmatpush.bf16.msra.mxu0 %v4100_v0  ;;  %v1301_v41 = vshll.u32 %v4878_v56, 16  ;;  %v4091_v46 = vld [vmem:[%s5482_s7 + $0x20] sm:$0xff]  ;;  %v1257_v0 = vshrl.u32 %v4825_v20, 16  ;;  %v4090_v17 = vld [vmem:[%s5482_s7 + $0x18] sm:$0xff]  ;;  %v1713_v18 = vld [vmem:[#allocation2 + $0x8] sm:$0xe] }
 0x1eb   : > { %v1320_v53 = vsel %vm1244_vm4, %v1315_v42, %v1319_v43  ;;  %v4123_v13 = vld [vmem:[%s5482_s7 + $0xe0] sm:$0xff]  ;;  %v4918_v19 = vld [vmem:[#allocation2 + $0xc] sm:$0xf]  ;;  %v4122_v27 = vld [vmem:[%s5482_s7 + $0xd8] sm:$0xff]  ;;  %v1768_v32 = vunpack.c.l.b16 %v1713_v18  ;;  %v1281_v43 = vshrl.u32 %v4876_v55, 16 }
 0x1ec   : > { %4301 = vmatpush.bf16.msra.mxu1 %v4099_v1  ;;  %v1303_v10 = vrot.slane %v1301_v41, 1  ;;  %v4131_v15 = vld [vmem:[%s5482_s7 + $0x120] sm:$0xff]  ;;  %v1259_v21 = vor.u32 %v1257_v0, %v1255_v6  ;;  %v4130_v22 = vld [vmem:[%s5482_s7 + $0x118] sm:$0xff]  ;;  %v4105_v40 = vld [vmem:[%s5482_s7 + $0x90] sm:$0xff]  ;;  %v1769_v33 = vunpack.c.l.b16 %v4918_v19  ;;  %vm1966_vm14 = vsmask.f32 6400 }
 0x1ed   : > { %4302 = vmatpush.bf16.msra.mxu2 %v4099_v1  ;;  %4303 = vmatpush.bf16.msra.mxu3 %v4099_v1  ;;  %v4089_v30 = vld [vmem:[%s5482_s7 + $0x10] sm:$0xff]  ;;  %v4104_v36 = vld [vmem:[%s5482_s7 + $0x88] sm:$0xff]  ;;  %v5006_v18 = vld [vmem:[#allocation2 + $0x18] sm:$0xff]  ;;  %vm2608_vm15 = vsmask.f32 5376 }
 0x1ee   : > { %1381 = vmatpush.bf16.msra.mxu0 %v4099_v1  ;;  %v1275_v1 = vor.u32 %v1273_v60, %v1271_v38  ;;  %v4121_v35 = vld [vmem:[%s5482_s7 + $0xd0] sm:$0xff] }
 0x1ef   : > { %v4129_v38 = vld [vmem:[%s5482_s7 + $0x110] sm:$0xff] }
 0x1f0   : > { %4304 = vmatpush.bf16.msra.mxu1 %v4098_v3 }
 0x1f1   : > { %4305 = vmatpush.bf16.msra.mxu2 %v4098_v3  ;;  %4306 = vmatpush.bf16.msra.mxu3 %v4098_v3 }
 0x1f2   : > { %1382 = vmatpush.bf16.msra.mxu0 %v4098_v3  ;;  %v1279_v3 = vrot.slane %v1277_v11, 1  ;;  %v4119_v11 = vld [vmem:[%s5482_s7 + $0xc0] sm:$0xff] }
 0x1f4   : > { %4307 = vmatpush.bf16.msra.mxu1 %v4097_v9 }
 0x1f5   : > { %4308 = vmatpush.bf16.msra.mxu2 %v4097_v9  ;;  %4309 = vmatpush.bf16.msra.mxu3 %v4097_v9 }
 0x1f6   : > { %1383 = vmatpush.bf16.msra.mxu0 %v4097_v9  ;;  %v1299_v9 = vor.u32 %v1297_v61, %v1295_v2  ;;  %v4949_v2 = vld [vmem:[#allocation2 + $0x10] sm:$0xff]  ;;  %v4127_v61 = vld [vmem:[%s5482_s7 + $0x100] sm:$0xff] }
 0x1f7   : > { %v1976_v6 = vshrl.u32 %v4949_v2, 16  ;;  %v1979_v42 = vshll.u32 %v4949_v2, 16 }
 0x1f8   : > { %4310 = vmatpush.bf16.msra.mxu1 %v4096_v23  ;;  %v1304_v25 = vsel %vm1244_vm4, %v1299_v9, %v1303_v10 }
 0x1f9   : > { %4311 = vmatpush.bf16.msra.mxu2 %v4096_v23  ;;  %4312 = vmatpush.bf16.msra.mxu3 %v4096_v23 }
 0x1fa   : > { %1384 = vmatpush.bf16.msra.mxu0 %v4096_v23  ;;  %v1280_v23 = vsel %vm1244_vm4, %v1275_v1, %v1279_v3 }
 0x1fc   : > { %4313 = vmatpush.bf16.msra.mxu1 %v4095_v34 }
 0x1fd   : > { %4314 = vmatpush.bf16.msra.mxu2 %v4095_v34  ;;  %4315 = vmatpush.bf16.msra.mxu3 %v4095_v34 }
 0x1fe   : > { %1385 = vmatpush.bf16.msra.mxu0 %v4095_v34  ;;  %v1264_v34 = vsel %vm1244_vm4, %v1259_v21, %v4831_v24  ;;  %v4088_v24 = vld [vmem:[%s5482_s7 + $0x8] sm:$0xff]  ;;  %v1985_v21 = vshrl.u32 %v5006_v18, 16 }
 0x1ff   : > { %1396 = vmatmul.bf16.vlgmr.msra.gmra.mxu1 %v1272_v44  ;;  %v1305_v44 = vshrl.u32 %v4878_v56, 16 }
 0x200   : > { %1489 = vmatpush.bf16.msrb.mxu1 %v4094_v37  ;;  %1411 = vmatmul.bf16.vlgmr.msra.gmra.mxu2 %v1296_v45  ;;  %v4120_v45 = vld [vmem:[%s5482_s7 + $0xc8] sm:$0xff] }
 0x201   : > { %1641 = vmatpush.bf16.msrb.mxu2 %v4110_v39  ;;  %1873 = vmatpush.bf16.msrb.mxu3 %v4126_v48  ;;  %v1787_v39 = vpack.c.b16 %v1769_v33, %v1768_v32  ;;  %v4128_v48 = vld [vmem:[%s5482_s7 + $0x108] sm:$0xff]  ;;  %v1307_v60 = vor.u32 %v1305_v44, %v1303_v10  ;;  %v1800_v32 = vrot.slane %v5006_v18, 1 }
 0x202   : > { %2113 = vmatpush.bf16.msrb.mxu0 %v4134_v49  ;;  %1426 = vmatmul.bf16.vlgmr.msra.gmra.mxu3 %v1320_v53  ;;  %v4103_v49 = vld [vmem:[%s5482_s7 + $0x80] sm:$0xff] }
 0x203   : > { %1386 = vmatmul.bf16.vlgmr.msra.gmra.mxu0 %v1256_v47  ;;  %v1968_v37 = vshrl.u32 %v1787_v39, 16  ;;  %v1971_v26 = vshll.u32 %v1787_v39, 16  ;;  %v1797_v41 = vrot.slane %v1787_v39, 1  ;;  %v4164_v39 = vld [vmem:[%s5482_s7 + $0x1e8] sm:$0xff] }
 0x204   : > { %1490 = vmatpush.bf16.msrb.mxu1 %v4093_v51  ;;  %v4158_v51 = vld [vmem:[%s5482_s7 + $0x1b8] sm:$0xff] }
 0x205   : > { %1642 = vmatpush.bf16.msrb.mxu2 %v4109_v50  ;;  %1874 = vmatpush.bf16.msrb.mxu3 %v4125_v52  ;;  %v4087_v50 = vld [vmem:[%s5482_s7] sm:$0xff]  ;;  %v4142_v52 = vld [vmem:[%s5482_s7 + $0x178] sm:$0xff]  ;;  %v1970_v47 = vrot.slane %v1968_v37, 1  ;;  %v1973_v53 = vrot.slane %v1971_v26, 2  ;;  %v4140_v37 = vld [vmem:[%s5482_s7 + $0x168] sm:$0xff] }
 0x206   : > { %2114 = vmatpush.bf16.msrb.mxu0 %v4133_v58  ;;  %v1978_v58 = vrot.slane %v1976_v6, 1  ;;  %v5028_v26 = vld [vmem:[#allocation2 + $0x20] sm:$0xff] }
 0x207   : > { %v1994_v6 = vshrl.u32 %v5028_v26, 16 }
 0x208   : > { %1491 = vmatpush.bf16.msrb.mxu1 %v4092_v59  ;;  %v1283_v59 = vor.u32 %v1281_v43, %v1279_v3  ;;  %v1312_v3 = vsel %vm1244_vm4, %v1307_v60, %v4841_v31  ;;  %v4141_v31 = vld [vmem:[%s5482_s7 + $0x170] sm:$0xff] }
 0x209   : > { %1643 = vmatpush.bf16.msrb.mxu2 %v4108_v57  ;;  %1875 = vmatpush.bf16.msrb.mxu3 %v4124_v28  ;;  %v1981_v57 = vrot.slane %v1979_v42, 2  ;;  %v1798_v28 = vrot.slane %v4949_v2, 1  ;;  %v1997_v42 = vshll.u32 %v5028_v26, 16  ;;  %v1996_v43 = vrot.slane %v1994_v6, 1 }
 0x20a   : > { %2115 = vmatpush.bf16.msrb.mxu0 %v4132_v62  ;;  %v4166_v62 = vld [vmem:[%s5482_s7 + $0x1f8] sm:$0xff]  ;;  %v1288_v1 = vsel %vm1244_vm4, %v1283_v59, %v4833_v54  ;;  %v4165_v54 = vld [vmem:[%s5482_s7 + $0x1f0] sm:$0xff] }
 0x20b   : > { %v1982_v0 = vor.u32 %v1981_v57, %v1978_v58  ;;  %v1799_v9 = vsel %vm1564_vm13, %v1797_v41, %v1798_v28  ;;  %v1999_v44 = vrot.slane %v1997_v42, 2  ;;  %v4139_v58 = vld [vmem:[%s5482_s7 + $0x160] sm:$0xff]  ;;  %v5047_v57 = vld [vmem:[#allocation2 + $0x28] sm:$0xff] }
 0x20c   : > { %1492 = vmatpush.bf16.msrb.mxu1 %v4091_v46  ;;  %v1974_v46 = vor.u32 %v1973_v53, %v1970_v47  ;;  %v4155_v47 = vld [vmem:[%s5482_s7 + $0x1a0] sm:$0xff]  ;;  %v2006_v59 = vshll.u32 %v5047_v57, 16  ;;  %v1804_v41 = vrot.slane %v5047_v57, 1 }
 0x20d   : > { %1644 = vmatpush.bf16.msrb.mxu2 %v4107_v63  ;;  %1876 = vmatpush.bf16.msrb.mxu3 %v4123_v13  ;;  %v4174_v63 = vld [vmem:[%s5482_s7 + $0x238] sm:$0xff]  ;;  %v4157_v13 = vld [vmem:[%s5482_s7 + $0x1b0] sm:$0xff]  ;;  %v4163_v53 = vld [vmem:[%s5482_s7 + $0x1e0] sm:$0xff] }
 0x20e   : > { %2116 = vmatpush.bf16.msrb.mxu0 %v4131_v15  ;;  %v1983_v10 = vsel %vm1966_vm14, %v1974_v46, %v1982_v0  ;;  %v4173_v15 = vld [vmem:[%s5482_s7 + $0x230] sm:$0xff]  ;;  %v5101_v42 = vld [vmem:[#allocation2 + $0x40] sm:$0xff] }
 0x20f   : > { %1401 = vmatmul.bf16.gmra.mxu1 %v1280_v23  ;;  %v1988_v23 = vshll.u32 %v5006_v18, 16 }
 0x210   : > { %1493 = vmatpush.bf16.msrb.mxu1 %v4090_v17  ;;  %1416 = vmatmul.bf16.gmra.mxu2 %v1304_v25  ;;  %v4282_v17 = vld [vmem:[#allocation2] sm:$0xe] }
 0x211   : > { %1645 = vmatpush.bf16.msrb.mxu2 %v4106_v16  ;;  %1877 = vmatpush.bf16.msrb.mxu3 %v4122_v27  ;;  %v4281_v16 = vld [vmem:[#allocation2] sm:$0xf0]  ;;  %v1987_v27 = vrot.slane %v1985_v21, 1 }
 0x212   : > { %2117 = vmatpush.bf16.msrb.mxu0 %v4130_v22  ;;  %v4283_v25 = vor.u32 %v4282_v17, %v4281_v16  ;;  %v1990_v22 = vrot.slane %v1988_v23, 2 }
 0x213   : > { %1391 = vmatmul.bf16.gmra.mxu0 %v1264_v34 }
 0x214   : > { %1494 = vmatpush.bf16.msrb.mxu1 %v4089_v30  ;;  %v1566_v30 = vrot.slane %v4825_v20, 1  ;;  %v1991_v34 = vor.u32 %v1990_v22, %v1987_v27  ;;  %v4170_v27 = vld [vmem:[%s5482_s7 + $0x218] sm:$0xff] }
 0x215   : > { %1646 = vmatpush.bf16.msrb.mxu2 %v4105_v40  ;;  %1878 = vmatpush.bf16.msrb.mxu3 %v4121_v35  ;;  %v1565_v40 = vrot.slane %v4283_v25, 1  ;;  %v5082_v22 = vld [vmem:[#allocation2 + $0x38] sm:$0xff] }
 0x216   : > { %2118 = vmatpush.bf16.msrb.mxu0 %v4129_v38  ;;  %v1801_v38 = vsel %vm1564_vm13, %v1798_v28, %v1800_v32 }
 0x217   : > { %v1567_v35 = vsel %vm1564_vm13, %v1565_v40, %v1566_v30  ;;  %v2021_v40 = vshrl.u32 %v5082_v22, 16 }
 0x218   : > { %1495 = vmatpush.bf16.msrb.mxu1 %v4088_v24  ;;  %v4156_v24 = vld [vmem:[%s5482_s7 + $0x1a8] sm:$0xff] }
 0x219   : > { %1647 = vmatpush.bf16.msrb.mxu2 %v4104_v36  ;;  %1879 = vmatpush.bf16.msrb.mxu3 %v4120_v45  ;;  %v1992_v36 = vsel %vm1966_vm14, %v1982_v0, %v1991_v34  ;;  %v1568_v45 = vrot.slane %v4805_v4, 1  ;;  %v4171_v0 = vld [vmem:[%s5482_s7 + $0x220] sm:$0xff] }
 0x21a   : > { %2119 = vmatpush.bf16.msrb.mxu0 %v4128_v48  ;;  %v1802_v48 = vrot.slane %v5028_v26, 1 }
 0x21c   : > { %1496 = vmatpush.bf16.msrb.mxu1 %v4087_v50  ;;  %v1569_v50 = vsel %vm1564_vm13, %v1566_v30, %v1568_v45  ;;  %v2024_v30 = vshll.u32 %v5082_v22, 16 }
 0x21d   : > { %1648 = vmatpush.bf16.msrb.mxu2 %v4103_v49  ;;  %1880 = vmatpush.bf16.msrb.mxu3 %v4119_v11  ;;  %v2000_v49 = vor.u32 %v1999_v44, %v1996_v43  ;;  %v2008_v11 = vrot.slane %v2006_v59, 2  ;;  %v4169_v43 = vld [vmem:[%s5482_s7 + $0x210] sm:$0xff]  ;;  %v2030_v44 = vshrl.u32 %v5101_v42, 16 }
 0x21e   : > { %2120 = vmatpush.bf16.msrb.mxu0 %v4127_v61  ;;  %v1570_v61 = vrot.slane %v4809_v7, 1 }
 0x21f   : > { %1406 = vmatmul.bf16.gmra.mxu1 %v1288_v1  ;;  %v4154_v1 = vld [vmem:[%s5482_s7 + $0x198] sm:$0xff] }
 0x220   : > { %2283 = vmatpush.bf16.msra.mxu1 %v4142_v52  ;;  %1421 = vmatmul.bf16.gmra.mxu2 %v1312_v3  ;;  %v2001_v52 = vsel %vm1966_vm14, %v1991_v34, %v2000_v49  ;;  %v4162_v3 = vld [vmem:[%s5482_s7 + $0x1d8] sm:$0xff]  ;;  %v2026_v34 = vrot.slane %v2024_v30, 2  ;;  %v4159_v30 = vld [vmem:[%s5482_s7 + $0x1c0] sm:$0xff] }
 0x221   : > { %2515 = vmatpush.bf16.msra.mxu2 %v4158_v51  ;;  %2755 = vmatpush.bf16.msra.mxu3 %v4166_v62  ;;  %v1803_v51 = vsel %vm1564_vm13, %v1800_v32, %v1802_v48  ;;  %v1571_v62 = vsel %vm1564_vm13, %v1568_v45, %v1570_v61  ;;  %v2023_v32 = vrot.slane %v2021_v40, 1  ;;  %v2033_v45 = vshll.u32 %v5101_v42, 16 }
 0x222   : > { %2925 = vmatpush.bf16.msra.mxu0 %v4174_v63  ;;  %1881 = vmatmul.bf16.vlgmr.msrb.gmra.mxu3 %v1799_v9  ;;  %v1805_v63 = vsel %vm1564_vm13, %v1802_v48, %v1804_v41  ;;  %v5069_v9 = vld [vmem:[#allocation2 + $0x30] sm:$0xff]  ;;  %v2032_v48 = vrot.slane %v2030_v44, 1 }
 0x223   : > { %2121 = vmatmul.bf16.vlgmr.msrb.gmra.mxu0 %v1983_v10  ;;  %v2012_v10 = vshrl.u32 %v5069_v9, 16  ;;  %v1806_v16 = vrot.slane %v5069_v9, 1 }
 0x224   : > { %2284 = vmatpush.bf16.msra.mxu1 %v4141_v31 }
 0x225   : > { %2516 = vmatpush.bf16.msra.mxu2 %v4157_v13  ;;  %2756 = vmatpush.bf16.msra.mxu3 %v4165_v54  ;;  %v2015_v13 = vshll.u32 %v5069_v9, 16  ;;  %v2014_v54 = vrot.slane %v2012_v10, 1  ;;  %v1807_v23 = vsel %vm1564_vm13, %v1804_v41, %v1806_v16 }
 0x226   : > { %2926 = vmatpush.bf16.msra.mxu0 %v4173_v15  ;;  %v1572_v15 = vrot.slane %v4876_v55, 1 }
 0x227   : > { %v2017_v31 = vrot.slane %v2015_v13, 2 }
 0x228   : > { %2285 = vmatpush.bf16.msra.mxu1 %v4140_v37  ;;  %v1573_v21 = vsel %vm1564_vm13, %v1570_v61, %v1572_v15  ;;  %v4137_v37 = vld [vmem:[%s5482_s7 + $0x150] sm:$0xff]  ;;  %v5127_v61 = vld [vmem:[#allocation2 + $0x48] sm:$0xff] }
 0x229   : > { %2517 = vmatpush.bf16.msra.mxu2 %v4156_v24  ;;  %2757 = vmatpush.bf16.msra.mxu3 %v4164_v39  ;;  %v2018_v17 = vor.u32 %v2017_v31, %v2014_v54  ;;  %v2027_v24 = vor.u32 %v2026_v34, %v2023_v32  ;;  %v1812_v10 = vrot.slane %v5127_v61, 1  ;;  %v4135_v32 = vld [vmem:[%s5482_s7 + $0x140] sm:$0xff] }
 0x22b   : > { %v2028_v6 = vsel %vm1966_vm14, %v2018_v17, %v2027_v24 }
 0x22c   : > { %2286 = vmatpush.bf16.msra.mxu1 %v4139_v58  ;;  %v4160_v58 = vld [vmem:[%s5482_s7 + $0x1c8] sm:$0xff] }
 0x22d   : > { %2518 = vmatpush.bf16.msra.mxu2 %v4155_v47  ;;  %2758 = vmatpush.bf16.msra.mxu3 %v4163_v53 }
 0x22f   : > { %1497 = vmatmul.bf16.vlgmr.msrb.gmra.mxu1 %v4811_v8  ;;  %v4172_v8 = vld [vmem:[%s5482_s7 + $0x228] sm:$0xff] }
 0x230   : > { %1649 = vmatmul.bf16.vlgmr.msrb.gmra.mxu2 %v1567_v35  ;;  %2927 = vmatpush.bf16.msra.mxu0 %v4172_v8  ;;  %v1574_v35 = vrot.slane %v4807_v5, 1 }
 0x231   : > { %2519 = vmatpush.bf16.msra.mxu2 %v4154_v1  ;;  %2759 = vmatpush.bf16.msra.mxu3 %v4162_v3  ;;  %v1578_v3 = vrot.slane %v4878_v56, 1 }
 0x232   : > { %1886 = vmatmul.bf16.gmra.mxu3 %v1801_v38  ;;  %v1808_v38 = vrot.slane %v5082_v22, 1  ;;  %v1575_v39 = vsel %vm1564_vm13, %v1572_v15, %v1574_v35 }
 0x233   : > { %2126 = vmatmul.bf16.gmra.mxu0 %v1992_v36  ;;  %v4161_v36 = vld [vmem:[%s5482_s7 + $0x1d0] sm:$0xff] }
 0x234   : > { %2928 = vmatpush.bf16.msra.mxu0 %v4171_v0  ;;  %v1809_v8 = vsel %vm1564_vm13, %v1806_v16, %v1808_v38 }
 0x235   : > { %2760 = vmatpush.bf16.msra.mxu3 %v4161_v36 }
 0x238   : > { %2929 = vmatpush.bf16.msra.mxu0 %v4170_v27 }
 0x239   : > { %2761 = vmatpush.bf16.msra.mxu3 %v4160_v58 }
 0x23c   : > { %2930 = vmatpush.bf16.msra.mxu0 %v4169_v43 }
 0x23d   : > { %2762 = vmatpush.bf16.msra.mxu3 %v4159_v30 }
 0x23f   : > { %1502 = vmatmul.bf16.gmra.mxu1 %v4825_v20  ;;  %v2003_v20 = vshrl.u32 %v5047_v57, 16 }
 0x240   : > { %1654 = vmatmul.bf16.gmra.mxu2 %v1569_v50  ;;  %v1810_v50 = vrot.slane %v5101_v42, 1 }
 0x241   : > { %v2005_v60 = vrot.slane %v2003_v20, 1 }
 0x242   : > { %1891 = vmatmul.bf16.gmra.mxu3 %v1803_v51  ;;  %v4152_v51 = vld [vmem:[%s5482_s7 + $0x188] sm:$0xff]  ;;  %v1811_v20 = vsel %vm1564_vm13, %v1808_v38, %v1810_v50 }
 0x243   : > { %2131 = vmatmul.bf16.gmra.mxu0 %v2001_v52  ;;  %v2009_v28 = vor.u32 %v2008_v11, %v2005_v60  ;;  %v4136_v11 = vld [vmem:[%s5482_s7 + $0x148] sm:$0xff] }
 0x245   : > { %v2010_v46 = vsel %vm1966_vm14, %v2000_v49, %v2009_v28  ;;  %v2019_v25 = vsel %vm1966_vm14, %v2009_v28, %v2018_v17  ;;  %v2035_v49 = vrot.slane %v2033_v45, 2  ;;  %v2039_v28 = vshrl.u32 %v5127_v61, 16 }
 0x246   : > { %v1813_v17 = vsel %vm1564_vm13, %v1810_v50, %v1812_v10  ;;  %v1580_v45 = vrot.slane %v4820_v14, 1 }
 0x247   : > { %v2036_v52 = vor.u32 %v2035_v49, %v2032_v48  ;;  %v2041_v0 = vrot.slane %v2039_v28, 1 }
 0x248   : > { %v1581_v58 = vsel %vm1564_vm13, %v1578_v3, %v1580_v45 }
 0x249   : > { %v2037_v60 = vsel %vm1966_vm14, %v2027_v24, %v2036_v52 }
 0x24f   : > { %1507 = vmatmul.bf16.gmra.mxu1 %v4805_v4  ;;  %v4138_v4 = vld [vmem:[%s5482_s7 + $0x158] sm:$0xff] }
 0x250   : > { %1659 = vmatmul.bf16.gmra.mxu2 %v1571_v62  ;;  %2287 = vmatpush.bf16.msra.mxu1 %v4138_v4  ;;  %v1945_v4 = vld [vmem:[#allocation2 + $0x50] sm:$0x3] }
 0x251   : > { %v1964_v31 = vunpack.c.l.b16 %v1945_v4 }
 0x252   : > { %1896 = vmatmul.bf16.gmra.mxu3 %v1805_v63  ;;  %v4168_v63 = vld [vmem:[%s5482_s7 + $0x208] sm:$0xff] }
 0x253   : > { %2136 = vmatmul.bf16.gmra.mxu0 %v2010_v46 }
 0x254   : > { %2288 = vmatpush.bf16.msra.mxu1 %v4137_v37  ;;  %2931 = vmatpush.bf16.msra.mxu0 %v4168_v63  ;;  %v2355_v37 = vld [vmem:[#allocation2 + $0x10] sm:$0xc] }
 0x255   : > { %v2827_v63 = vld [vmem:[#allocation2 + $0x10] sm:$0x8] }
 0x258   : > { %2289 = vmatpush.bf16.msra.mxu1 %v4136_v11 }
 0x25c   : > { %2290 = vmatpush.bf16.msra.mxu1 %v4135_v32  ;;  %v1582_v32 = vrot.slane %v4837_v29, 1 }
 0x25f   : > { %1512 = vmatmul.bf16.gmra.mxu1 %v4809_v7  ;;  %v4153_v7 = vld [vmem:[%s5482_s7 + $0x190] sm:$0xff] }
 0x260   : > { %1664 = vmatmul.bf16.gmra.mxu2 %v1573_v21  ;;  %v4151_v21 = vld [vmem:[%s5482_s7 + $0x180] sm:$0xff] }
 0x261   : > { %2520 = vmatpush.bf16.msra.mxu2 %v4153_v7  ;;  %v5160_v7 = vpack.c.b16 %v1964_v31, %v1964_v31 }
 0x262   : > { %1901 = vmatmul.bf16.gmra.mxu3 %v1807_v23  ;;  %v1731_v23 = vld [vmem:[#allocation2 + $0x50] sm:$0x1] }
 0x263   : > { %2141 = vmatmul.bf16.gmra.mxu0 %v2019_v25  ;;  %v2051_v38 = vshll.u32 %v5160_v7, 16 }
 0x265   : > { %2521 = vmatpush.bf16.msra.mxu2 %v4152_v51  ;;  %v2053_v44 = vrot.slane %v2051_v38, 2 }
 0x269   : > { %2522 = vmatpush.bf16.msra.mxu2 %v4151_v21 }
 0x26f   : > { %1517 = vmatmul.bf16.gmra.mxu1 %v4876_v55  ;;  %v1576_v55 = vrot.slane %v4817_v12, 1 }
 0x270   : > { %1669 = vmatmul.bf16.gmra.mxu2 %v1575_v39  ;;  %v4167_v39 = vld [vmem:[%s5482_s7 + $0x200] sm:$0xff] }
 0x271   : > { %v1577_v53 = vsel %vm1564_vm13, %v1574_v35, %v1576_v55  ;;  %v1579_v16 = vsel %vm1564_vm13, %v1576_v55, %v1578_v3  ;;  %v2048_v35 = vshrl.u32 %v5160_v7, 16  ;;  %2932 = vmatpush.bf16.msra.mxu0 %v4167_v39  ;;  %v2410_v55 = vunpack.c.l.b16 %v2355_v37 }
 0x272   : > { %1906 = vmatmul.bf16.gmra.mxu3 %v1809_v8  ;;  %v2356_v8 = vld [vmem:[#allocation2 + $0x14] sm:$0xf] }
 0x273   : > { %2146 = vmatmul.bf16.gmra.mxu0 %v2028_v6  ;;  %v2050_v43 = vrot.slane %v2048_v35, 1  ;;  %v2411_v50 = vunpack.c.l.b16 %v2356_v8 }
 0x275   : > { %v5187_v11 = vpack.c.b16 %v2411_v50, %v2410_v55  ;;  %v2185_v55 = vld [vmem:[#allocation2 + $0x8] sm:$0xc] }
 0x27c   : > { %v5113_v47 = vpop.f32.mrf.mxu1 }
 0x27f   : > { %1522 = vmatmul.bf16.gmra.mxu1 %v4807_v5  ;;  %v2042_v5 = vshll.u32 %v5127_v61, 16 }
 0x280   : > { %1674 = vmatmul.bf16.gmra.mxu2 %v1577_v53  ;;  %v5121_v59 = vpop.f32.mrf.mxu0 }
 0x281   : > { %v2044_v1 = vrot.slane %v2042_v5, 2 }
 0x282   : > { %1911 = vmatmul.bf16.gmra.mxu3 %v1811_v20 }
 0x283   : > { %v5129_v41 = vpop.f32.mrf.mxu2  ;;  %2151 = vmatmul.bf16.gmra.mxu0 %v2037_v60  ;;  %v2045_v54 = vor.u32 %v2044_v1, %v2041_v0  ;;  %v5185_v60 = vld [vmem:[#allocation2 + $0x18] sm:$0xff]  ;;  %v2610_v0 = vshrl.u32 %v5187_v11, 16  ;;  %v2613_v1 = vshll.u32 %v5187_v11, 16 }
 0x284   : > { %v5133_v62 = vpop.f32.mrf.mxu1  ;;  %v2618_v3 = vshrl.u32 %v5185_v60, 16  ;;  %v2621_v4 = vshll.u32 %v5185_v60, 16  ;;  %v2850_v37 = vrot.slane %v5185_v60, 3  ;;  %v2440_v19 = vrot.slane %v5185_v60, 2  ;;  %v2998_v60 = vld [vmem:[%s5476_s1 + $0x8] sm:$0xff] }
 0x285   : > { %v5152_v25 = vpop.f32.mrf.mxu3  ;;  %v2046_v40 = vsel %vm1966_vm14, %v2036_v52, %v2045_v54  ;;  %v2054_v52 = vor.u32 %v2053_v44, %v2050_v43  ;;  %v2615_v21 = vrot.slane %v2613_v1, 3  ;;  %v1583_v43 = vsel %vm1564_vm13, %v1580_v45, %v1582_v32 }
 0x286   : > { %v2439_v32 = vrot.slane %v5187_v11, 2  ;;  %v5230_v11 = vld [vmem:[#allocation2 + $0x28] sm:$0xff] }
 0x287   : > { %v2055_v5 = vsel %vm1966_vm14, %v2045_v54, %v2054_v52  ;;  %v2620_v54 = vrot.slane %v2618_v3, 2 }
 0x288   : > { %v5138_v46 = vpop.f32.mrf.mxu0 }
 0x28b   : > { %v5142_v13 = vpop.f32.mrf.mxu2 }
 0x28c   : > { %v5144_v15 = vpop.f32.mrf.mxu1 }
 0x28d   : > { %v5177_v48 = vpop.f32.mrf.mxu3 }
 0x28f   : > { %1527 = vmatmul.bf16.gmra.mxu1 %v4817_v12  ;;  %v1786_v12 = vunpack.c.l.b16 %v1731_v23  ;;  %v2623_v23 = vrot.slane %v2621_v4, 3 }
 0x290   : > { %1679 = vmatmul.bf16.gmra.mxu2 %v1579_v16  ;;  %v5154_v27 = vpop.f32.mrf.mxu0  ;;  %v2846_v16 = vunpack.c.l.b16 %v2827_v63 }
 0x291   : > { %v1796_v24 = vpack.c.b16 %v1786_v12, %v1786_v12  ;;  %v2624_v35 = vor.u32 %v2623_v23, %v2620_v54 }
 0x292   : > { %1916 = vmatmul.bf16.gmra.mxu3 %v1813_v17  ;;  %v2612_v17 = vrot.slane %v2610_v0, 2  ;;  %v2847_v30 = vpack.c.b16 %v2411_v50, %v2846_v16  ;;  %v5208_v50 = vld [vmem:[#allocation2 + $0x20] sm:$0xff] }
 0x293   : > { %v5165_v34 = vpop.f32.mrf.mxu2  ;;  %2156 = vmatmul.bf16.gmra.mxu0 %v2046_v40  ;;  %v1814_v49 = vrot.slane %v1796_v24, 1  ;;  %v2630_v45 = vshll.u32 %v5208_v50, 16 }
 0x294   : > { %v5169_v36 = vpop.f32.mrf.mxu1  ;;  %v2616_v12 = vor.u32 %v2615_v21, %v2612_v17  ;;  %v2849_v39 = vrot.slane %v2847_v30, 3  ;;  %v2997_v17 = vld [vmem:[%s5476_s1] sm:$0xff]  ;;  %v2208_v30 = vrot.slane %v4949_v2, 2 }
 0x295   : > { %v1815_v20 = vsel %vm1564_vm13, %v1812_v10, %v1814_v49  ;;  %v2632_v16 = vrot.slane %v2630_v45, 3  ;;  %3017 = vperm.xlu0 %4378, %v2997_v17  }
 0x296   : > { %v2625_v49 = vsel %vm2608_vm15, %v2616_v12, %v2624_v35  ;;  %v2851_v52 = vsel %vm2848_vm0, %v2849_v39, %v2850_v37  ;;  %v2852_v39 = vrot.slane %v5208_v50, 3 }
 0x298   : > { %v5174_v6 = vpop.f32.mrf.mxu0 }
 0x29b   : > { %v5179_v51 = vpop.f32.mrf.mxu2 }
 0x29c   : > { %v5181_v53 = vpop.f32.mrf.mxu1 }
 0x29d   : > { %3022 = vperm.xlu0 %4378, %v2998_v60  }
 0x29f   : > { %1532 = vmatmul.bf16.gmra.mxu1 %v4878_v56 }
 0x2a0   : > { %1684 = vmatmul.bf16.gmra.mxu2 %v1581_v58  ;;  %v2122_v28 = vpop.f32.mrf.mxu0  ;;  %v2204_v58 = vunpack.c.l.b16 %v2185_v55 }
 0x2a2   : > { %1921 = vmatmul.bf16.gmra.mxu3 %v1815_v20  ;;  %v2627_v20 = vshrl.u32 %v5208_v50, 16  ;;  %v2205_v1 = vpack.c.b16 %v1769_v33, %v2204_v58 }
 0x2a3   : > { %v5195_v10 = vpop.f32.mrf.mxu2  ;;  %2161 = vmatmul.bf16.gmra.mxu0 %v2055_v5 }
 0x2a4   : > { %v5197_v56 = vpop.f32.mrf.mxu1  ;;  %v2629_v4 = vrot.slane %v2627_v20, 2  ;;  %v2207_v23 = vrot.slane %v2205_v1, 2 }
 0x2a5   : > { %v1882_v31 = vpop.f32.mrf.mxu3 }
 0x2a6   : > { %v2633_v33 = vor.u32 %v2632_v16, %v2629_v4  ;;  %v2210_v4 = vrot.slane %v5006_v18, 2  ;;  %v2442_v16 = vrot.slane %v5208_v50, 2  ;;  %v3000_v18 = vld [vmem:[%s5476_s1 + $0x18] sm:$0xff] }
 0x2a8   : > { %v5199_v40 = vpop.f32.mrf.mxu0  ;;  %v2634_v2 = vsel %vm2608_vm15, %v2624_v35, %v2633_v33  ;;  %v2639_v35 = vshll.u32 %v5230_v11, 16 }
 0x2ab   : > { %v5202_v38 = vpop.f32.mrf.mxu2 }
 0x2ac   : > { %v1498_v8 = vpop.f32.mrf.mxu1 }
 0x2ad   : > { %v1884_v24 = vpop.f32.mrf.mxu3  ;;  %v1499_v44 = vadd.f32 %v1498_v8, %v5121_v59 }
 0x2af   : > { %1537 = vmatmul.bf16.gmra.mxu1 %v4820_v14 }
 0x2b0   : > { %1689 = vmatmul.bf16.gmra.mxu2 %v1583_v43  ;;  %v2127_v29 = vpop.f32.mrf.mxu0  ;;  %v2209_v43 = vsel %vm2206_vm1, %v2207_v23, %v2208_v30 }
 0x2b2   : > { %2763 = vmatmul.bf16.vlgmr.msra.gmra.mxu3 %v2625_v49 }
 0x2b3   : > { %v1650_v5 = vpop.f32.mrf.mxu2  ;;  %2933 = vmatmul.bf16.vlgmr.msra.gmra.mxu0 %v2851_v52  ;;  %v2853_v52 = vsel %vm2848_vm0, %v2850_v37, %v2852_v39 }
 0x2b4   : > { %v1695_v59 = vadd.f32 %v1650_v5, %v1499_v44  ;;  %v1500_v0 = vpop.f32.mrf.mxu1 }
 0x2b5   : > { %v1887_v63 = vpop.f32.mrf.mxu3  ;;  %v1501_v14 = vadd.f32 %v1500_v0, %v5138_v46 }
 0x2b6   : > { %v1927_v3 = vadd.f32 %v1882_v31, %v1695_v59 }
 0x2b8   : > { %v2129_v21 = vpop.f32.mrf.mxu0  ;;  %v5220_v54 = vadd.f32 %v2122_v28, %v1927_v3  ;;  %v2441_v28 = vsel %vm2206_vm1, %v2439_v32, %v2440_v19  ;;  %v2641_v3 = vrot.slane %v2639_v35, 3 }
 0x2bb   : > { %v1652_v46 = vpop.f32.mrf.mxu2 }
 0x2bc   : > { %v1696_v31 = vadd.f32 %v1652_v46, %v1501_v14  ;;  %v1503_v8 = vpop.f32.mrf.mxu1 }
 0x2bd   : > { %v1889_v12 = vpop.f32.mrf.mxu3  ;;  %v1504_v49 = vadd.f32 %v1503_v8, %v5154_v27  ;;  %v2636_v27 = vshrl.u32 %v5230_v11, 16  ;;  %v2443_v8 = vsel %vm2206_vm1, %v2440_v19, %v2442_v16 }
 0x2be   : > { %v1928_v44 = vadd.f32 %v1884_v24, %v1696_v31  ;;  %v2211_v31 = vsel %vm2206_vm1, %v2208_v30, %v2210_v4 }
 0x2bf   : > { %2291 = vmatmul.bf16.vlgmr.msra.gmra.mxu1 %v2209_v43  ;;  %v2638_v1 = vrot.slane %v2636_v27, 2 }
 0x2c0   : > { %2523 = vmatmul.bf16.vlgmr.msra.gmra.mxu2 %v2441_v28  ;;  %v2132_v55 = vpop.f32.mrf.mxu0  ;;  %v5237_v58 = vadd.f32 %v5199_v40, %v1928_v44  ;;  %v2999_v40 = vld [vmem:[%s5476_s1 + $0x10] sm:$0xff] }
 0x2c1   : > { %3027 = vperm.xlu1 %4379, %v2999_v40   ;;  %v2642_v17 = vor.u32 %v2641_v3, %v2638_v1 }
 0x2c2   : > { %2768 = vmatmul.bf16.gmra.mxu3 %v2634_v2 }
 0x2c3   : > { %v1655_v24 = vpop.f32.mrf.mxu2  ;;  %2938 = vmatmul.bf16.gmra.mxu0 %v2853_v52  ;;  %v2643_v28 = vsel %vm2608_vm15, %v2633_v33, %v2642_v17 }
 0x2c4   : > { %v1697_v20 = vadd.f32 %v1655_v24, %v1504_v49  ;;  %v1505_v5 = vpop.f32.mrf.mxu1 }
 0x2c5   : > { %v1892_v45 = vpop.f32.mrf.mxu3  ;;  %v1506_v0 = vadd.f32 %v1505_v5, %v5174_v6  ;;  %v2854_v6 = vrot.slane %v5230_v11, 3 }
 0x2c6   : > { %v1929_v59 = vadd.f32 %v1887_v63, %v1697_v20 }
 0x2c7   : > { %v2855_v44 = vsel %vm2848_vm0, %v2852_v39, %v2854_v6  ;;  %v2444_v39 = vrot.slane %v5230_v11, 2 }
 0x2c8   : > { %v2134_v37 = vpop.f32.mrf.mxu0  ;;  %v5245_v14 = vadd.f32 %v2127_v29, %v1929_v59  ;;  %v5253_v29 = vld [vmem:[#allocation2 + $0x30] sm:$0xff] }
 0x2c9   : > { %3032 = vperm.xlu1 %4379, %v3000_v18   ;;  %v2645_v19 = vshrl.u32 %v5253_v29, 16  ;;  %v2648_v33 = vshll.u32 %v5253_v29, 16  ;;  %v2856_v40 = vrot.slane %v5253_v29, 3 }
 0x2cb   : > { %v1657_v23 = vpop.f32.mrf.mxu2  ;;  %v2647_v35 = vrot.slane %v2645_v19, 2  ;;  %v2650_v24 = vrot.slane %v2648_v33, 3  ;;  %v2446_v33 = vrot.slane %v5253_v29, 2 }
 0x2cc   : > { %v1698_v32 = vadd.f32 %v1657_v23, %v1506_v0  ;;  %v1508_v46 = vpop.f32.mrf.mxu1 }
 0x2cd   : > { %v1894_v63 = vpop.f32.mrf.mxu3  ;;  %v1509_v30 = vadd.f32 %v1508_v46, %v5113_v47  ;;  %v2651_v59 = vor.u32 %v2650_v24, %v2647_v35 }
 0x2ce   : > { %v1930_v43 = vadd.f32 %v1889_v12, %v1698_v32  ;;  %v2445_v32 = vsel %vm2206_vm1, %v2442_v16, %v2444_v39 }
 0x2cf   : > { %2296 = vmatmul.bf16.gmra.mxu1 %v2211_v31  ;;  %v5273_v31 = vld [vmem:[#allocation2 + $0x38] sm:$0xff] }
 0x2d0   : > { %2528 = vmatmul.bf16.gmra.mxu2 %v2443_v8  ;;  %v2137_v50 = vpop.f32.mrf.mxu0  ;;  %v5259_v49 = vadd.f32 %v2129_v21, %v1930_v43  ;;  %v2212_v21 = vrot.slane %v5028_v26, 2  ;;  %v2654_v43 = vshrl.u32 %v5273_v31, 16  ;;  %v2858_v35 = vrot.slane %v5273_v31, 3 }
 0x2d2   : > { %2773 = vmatmul.bf16.gmra.mxu3 %v2643_v28 }
 0x2d3   : > { %v1660_v12 = vpop.f32.mrf.mxu2  ;;  %2943 = vmatmul.bf16.gmra.mxu0 %v2855_v44  ;;  %v2656_v44 = vrot.slane %v2654_v43, 2 }
 0x2d4   : > { %v1699_v2 = vadd.f32 %v1660_v12, %v1509_v30  ;;  %v1510_v52 = vpop.f32.mrf.mxu1 }
 0x2d5   : > { %v1897_v60 = vpop.f32.mrf.mxu3  ;;  %v1511_v47 = vadd.f32 %v1510_v52, %v5133_v62  ;;  %v2857_v62 = vsel %vm2848_vm0, %v2854_v6, %v2856_v40 }
 0x2d6   : > { %v1931_v27 = vadd.f32 %v1892_v45, %v1699_v2  ;;  %v2213_v45 = vsel %vm2206_vm1, %v2210_v4, %v2212_v21  ;;  %v2657_v4 = vshll.u32 %v5273_v31, 16 }
 0x2d8   : > { %v2139_v20 = vpop.f32.mrf.mxu0  ;;  %v5264_v5 = vadd.f32 %v2132_v55, %v1931_v27  ;;  %v2652_v55 = vsel %vm2608_vm15, %v2642_v17, %v2651_v59  ;;  %v2659_v30 = vrot.slane %v2657_v4, 3 }
 0x2da   : > { %v2660_v2 = vor.u32 %v2659_v30, %v2656_v44 }
 0x2db   : > { %v1662_v0 = vpop.f32.mrf.mxu2 }
 0x2dc   : > { %v1700_v1 = vadd.f32 %v1662_v0, %v1511_v47  ;;  %v1513_v23 = vpop.f32.mrf.mxu1  ;;  %v2447_v0 = vsel %vm2206_vm1, %v2444_v39, %v2446_v33 }
 0x2dd   : > { %v1899_v3 = vpop.f32.mrf.mxu3  ;;  %v1514_v8 = vadd.f32 %v1513_v23, %v5144_v15  ;;  %v2214_v15 = vrot.slane %v5047_v57, 2  ;;  %v5293_v23 = vld [vmem:[#allocation2 + $0x40] sm:$0xff] }
 0x2de   : > { %v1932_v46 = vadd.f32 %v1894_v63, %v1700_v1  ;;  %v3001_v57 = vld [vmem:[%s5476_s1 + $0x20] sm:$0xff] }
 0x2df   : > { %2301 = vmatmul.bf16.gmra.mxu1 %v2213_v45  ;;  %v2215_v47 = vsel %vm2206_vm1, %v2212_v21, %v2214_v15  ;;  %3037 = vperm.xlu2 %4380, %v3001_v57   ;;  %v2859_v21 = vsel %vm2848_vm0, %v2856_v40, %v2858_v35  ;;  %v2666_v45 = vshll.u32 %v5293_v23, 16  ;;  %v3007_v57 = vld [vmem:[%s5476_s1 + $0x50] sm:$0xff] }
 0x2e0   : > { %2533 = vmatmul.bf16.gmra.mxu2 %v2445_v32  ;;  %v2142_v26 = vpop.f32.mrf.mxu0  ;;  %v5276_v11 = vadd.f32 %v2134_v37, %v1932_v46  ;;  %v3003_v37 = vld [vmem:[%s5476_s1 + $0x30] sm:$0xff] }
 0x2e1   : > { %3047 = vperm.xlu0 %4378, %v3003_v37   ;;  %v2668_v4 = vrot.slane %v2666_v45, 3  ;;  %v2860_v37 = vrot.slane %v5293_v23, 3  ;;  %v2218_v45 = vrot.slane %v5082_v22, 2 }
 0x2e2   : > { %2778 = vmatmul.bf16.gmra.mxu3 %v2652_v55 }
 0x2e3   : > { %v1665_v16 = vpop.f32.mrf.mxu2  ;;  %2948 = vmatmul.bf16.gmra.mxu0 %v2857_v62 }
 0x2e4   : > { %v1701_v63 = vadd.f32 %v1665_v16, %v1514_v8  ;;  %v1515_v28 = vpop.f32.mrf.mxu1  ;;  %v2216_v16 = vrot.slane %v5069_v9, 2  ;;  %v3006_v9 = vld [vmem:[%s5476_s1 + $0x48] sm:$0xff] }
 0x2e5   : > { %v1902_v17 = vpop.f32.mrf.mxu3  ;;  %v1516_v12 = vadd.f32 %v1515_v28, %v5169_v36  ;;  %v3004_v36 = vld [vmem:[%s5476_s1 + $0x38] sm:$0xff] }
 0x2e6   : > { %v1933_v18 = vadd.f32 %v1897_v60, %v1701_v63  ;;  %3052 = vperm.xlu1 %4379, %v3004_v36   ;;  %v2448_v63 = vrot.slane %v5273_v31, 2  ;;  %v2861_v31 = vsel %vm2848_vm0, %v2858_v35, %v2860_v37 }
 0x2e8   : > { %v2144_v6 = vpop.f32.mrf.mxu0  ;;  %v5284_v19 = vadd.f32 %v2137_v50, %v1933_v18  ;;  %v2661_v50 = vsel %vm2608_vm15, %v2651_v59, %v2660_v2 }
 0x2e9   : > { %3062 = vperm.xlu0 %4378, %v3006_v9  }
 0x2eb   : > { %v1667_v52 = vpop.f32.mrf.mxu2 }
 0x2ec   : > { %v1702_v27 = vadd.f32 %v1667_v52, %v1516_v12  ;;  %v1518_v24 = vpop.f32.mrf.mxu1  ;;  %v2217_v52 = vsel %vm2206_vm1, %v2214_v15, %v2216_v16 }
 0x2ed   : > { %v1904_v60 = vpop.f32.mrf.mxu3  ;;  %v1519_v59 = vadd.f32 %v1518_v24, %v5181_v53 }
 0x2ee   : > { %v1934_v1 = vadd.f32 %v1899_v3, %v1702_v27  ;;  %v2663_v3 = vshrl.u32 %v5293_v23, 16  ;;  %v2449_v27 = vsel %vm2206_vm1, %v2446_v33, %v2448_v63  ;;  %3067 = vperm.xlu1 %4379, %v3007_v57  }
 0x2ef   : > { %2306 = vmatmul.bf16.gmra.mxu1 %v2215_v47  ;;  %v5321_v47 = vld [vmem:[#allocation2 + $0x48] sm:$0xff] }
 0x2f0   : > { %2538 = vmatmul.bf16.gmra.mxu2 %v2447_v0  ;;  %v2147_v29 = vpop.f32.mrf.mxu0  ;;  %v5302_v39 = vadd.f32 %v2139_v20, %v1934_v1  ;;  %v2665_v43 = vrot.slane %v2663_v3, 2  ;;  %v3002_v20 = vld [vmem:[%s5476_s1 + $0x28] sm:$0xff]  ;;  %v2672_v33 = vshrl.u32 %v5321_v47, 16  ;;  %v2452_v57 = vrot.slane %v5321_v47, 2 }
 0x2f1   : > { %3042 = vperm.xlu2 %4380, %v3002_v20   ;;  %v3010_v20 = vld [vmem:[%s5476_s1 + $0x68] sm:$0xff] }
 0x2f2   : > { %2783 = vmatmul.bf16.gmra.mxu3 %v2661_v50  ;;  %v2669_v18 = vor.u32 %v2668_v4, %v2665_v43  ;;  %v2862_v4 = vrot.slane %v5321_v47, 3 }
 0x2f3   : > { %v1670_v32 = vpop.f32.mrf.mxu2  ;;  %2953 = vmatmul.bf16.gmra.mxu0 %v2859_v21 }
 0x2f4   : > { %v1703_v46 = vadd.f32 %v1670_v32, %v1519_v59  ;;  %v1520_v62 = vpop.f32.mrf.mxu1  ;;  %v2450_v32 = vrot.slane %v5293_v23, 2 }
 0x2f5   : > { %v1907_v55 = vpop.f32.mrf.mxu3  ;;  %v1521_v28 = vadd.f32 %v1520_v62, %v5197_v56 }
 0x2f6   : > { %v1935_v8 = vadd.f32 %v1902_v17, %v1703_v46  ;;  %3082 = vperm.xlu1 %4379, %v3010_v20   ;;  %v2453_v20 = vsel %vm2206_vm1, %v2450_v32, %v2452_v57 }
 0x2f8   : > { %v5310_v40 = vpop.f32.mrf.mxu0  ;;  %v5312_v53 = vadd.f32 %v2142_v26, %v1935_v8  ;;  %v2670_v26 = vsel %vm2608_vm15, %v2660_v2, %v2669_v18  ;;  %v2675_v2 = vshll.u32 %v5321_v47, 16 }
 0x2fa   : > { %v2677_v21 = vrot.slane %v2675_v2, 3  ;;  %v2587_v2 = vld [vmem:[#allocation2 + $0x58] sm:$0x7] }
 0x2fb   : > { %v1672_v44 = vpop.f32.mrf.mxu2 }
 0x2fc   : > { %v1704_v17 = vadd.f32 %v1672_v44, %v1521_v28  ;;  %v1523_v12 = vpop.f32.mrf.mxu1  ;;  %v2451_v44 = vsel %vm2206_vm1, %v2448_v63, %v2450_v32 }
 0x2fd   : > { %v1909_v30 = vpop.f32.mrf.mxu3  ;;  %v1524_v15 = vadd.f32 %v1523_v12, %v5129_v41  ;;  %v3009_v41 = vld [vmem:[%s5476_s1 + $0x60] sm:$0xff] }
 0x2fe   : > { %v1936_v24 = vadd.f32 %v1904_v60, %v1704_v17  ;;  %3077 = vperm.xlu0 %4378, %v3009_v41   ;;  %v3005_v17 = vld [vmem:[%s5476_s1 + $0x40] sm:$0xff] }
 0x2ff   : > { %2311 = vmatmul.bf16.gmra.mxu1 %v2217_v52  ;;  %3057 = vperm.xlu2 %4380, %v3005_v17   ;;  %v2863_v52 = vsel %vm2848_vm0, %v2860_v37, %v2862_v4  ;;  %v3013_v37 = vld [vmem:[%s5476_s1 + $0x80] sm:$0xff] }
 0x300   : > { %2543 = vmatmul.bf16.gmra.mxu2 %v2449_v27  ;;  %v2152_v56 = vpop.f32.mrf.mxu0  ;;  %v5327_v0 = vadd.f32 %v2144_v6, %v1936_v24  ;;  %v2674_v6 = vrot.slane %v2672_v33, 2  ;;  %3097 = vperm.xlu1 %4379, %v3013_v37  }
 0x302   : > { %2788 = vmatmul.bf16.gmra.mxu3 %v2670_v26  ;;  %v2678_v62 = vor.u32 %v2677_v21, %v2674_v6  ;;  %v2606_v6 = vunpack.c.l.b16 %v2587_v2 }
 0x303   : > { %v1675_v60 = vpop.f32.mrf.mxu2  ;;  %2958 = vmatmul.bf16.gmra.mxu0 %v2861_v31 }
 0x304   : > { %v1705_v1 = vadd.f32 %v1675_v60, %v1524_v15  ;;  %v1525_v36 = vpop.f32.mrf.mxu1  ;;  %v2679_v23 = vsel %vm2608_vm15, %v2669_v18, %v2678_v62 }
 0x305   : > { %v1912_v50 = vpop.f32.mrf.mxu3  ;;  %v1526_v46 = vadd.f32 %v1525_v36, %v5142_v13  ;;  %v5352_v13 = vld [vmem:[#allocation2 + $0x50] sm:$0xff] }
 0x306   : > { %v1937_v35 = vadd.f32 %v1907_v55, %v1705_v1  ;;  %v2684_v27 = vshll.u32 %v5352_v13, 16  ;;  %v2220_v1 = vrot.slane %v5101_v42, 2  ;;  %v2607_v42 = vpack.c.b16 %v2606_v6, %v2606_v6  ;;  %v2373_v6 = vld [vmem:[#allocation2 + $0x58] sm:$0x3] }
 0x308   : > { %v5338_v59 = vpop.f32.mrf.mxu0  ;;  %v5340_v3 = vadd.f32 %v2147_v29, %v1937_v35  ;;  %v2219_v29 = vsel %vm2206_vm1, %v2216_v16, %v2218_v45  ;;  %v3012_v16 = vld [vmem:[%s5476_s1 + $0x78] sm:$0xff]  ;;  %v2686_v33 = vrot.slane %v2684_v27, 3  ;;  %v2690_v32 = vshrl.u32 %v2607_v42, 16 }
 0x309   : > { %3092 = vperm.xlu0 %4378, %v3012_v16   ;;  %v2454_v27 = vrot.slane %v5352_v13, 2 }
 0x30a   : > { %v2692_v16 = vrot.slane %v2690_v32, 2 }
 0x30b   : > { %v1677_v8 = vpop.f32.mrf.mxu2  ;;  %v2455_v2 = vsel %vm2206_vm1, %v2452_v57, %v2454_v27 }
 0x30c   : > { %v1706_v55 = vadd.f32 %v1677_v8, %v1526_v46  ;;  %v1528_v28 = vpop.f32.mrf.mxu1  ;;  %v2864_v8 = vrot.slane %v5352_v13, 3 }
 0x30d   : > { %v1914_v43 = vpop.f32.mrf.mxu3  ;;  %v1529_v18 = vadd.f32 %v1528_v28, %v5165_v34 }
 0x30e   : > { %v1938_v22 = vadd.f32 %v1909_v30, %v1706_v55  ;;  %v2681_v30 = vshrl.u32 %v5352_v13, 16  ;;  %v2221_v55 = vsel %vm2206_vm1, %v2218_v45, %v2220_v1 }
 0x30f   : > { %2316 = vmatmul.bf16.gmra.mxu1 %v2219_v29  ;;  %v2865_v29 = vsel %vm2848_vm0, %v2862_v4, %v2864_v8  ;;  %v3011_v4 = vld [vmem:[%s5476_s1 + $0x70] sm:$0xff] }
 0x310   : > { %2548 = vmatmul.bf16.gmra.mxu2 %v2451_v44  ;;  %v2157_v12 = vpop.f32.mrf.mxu0  ;;  %v5362_v63 = vadd.f32 %v5310_v40, %v1938_v22  ;;  %v2683_v15 = vrot.slane %v2681_v30, 2 }
 0x312   : > { %2793 = vmatmul.bf16.gmra.mxu3 %v2679_v23  ;;  %v2687_v35 = vor.u32 %v2686_v33, %v2683_v15 }
 0x313   : > { %v1680_v24 = vpop.f32.mrf.mxu2  ;;  %2963 = vmatmul.bf16.gmra.mxu0 %v2863_v52 }
 0x314   : > { %v1707_v26 = vadd.f32 %v1680_v24, %v1529_v18  ;;  %v1530_v31 = vpop.f32.mrf.mxu1  ;;  %v2688_v28 = vsel %vm2608_vm15, %v2678_v62, %v2687_v35 }
 0x315   : > { %v1917_v9 = vpop.f32.mrf.mxu3  ;;  %v1531_v36 = vadd.f32 %v1530_v31, %v5179_v51  ;;  %v3008_v51 = vld [vmem:[%s5476_s1 + $0x58] sm:$0xff] }
 0x316   : > { %v1939_v40 = vadd.f32 %v1912_v50, %v1707_v26  ;;  %3072 = vperm.xlu2 %4380, %v3008_v51  }
 0x318   : > { %v2159_v60 = vpop.f32.mrf.mxu0  ;;  %v5370_v34 = vadd.f32 %v2152_v56, %v1939_v40  ;;  %v2866_v40 = vrot.slane %v2607_v42, 3 }
 0x31a   : > { %v2867_v13 = vsel %vm2848_vm0, %v2864_v8, %v2866_v40 }
 0x31b   : > { %v1682_v21 = vpop.f32.mrf.mxu2 }
 0x31c   : > { %v1708_v41 = vadd.f32 %v1682_v21, %v1531_v36  ;;  %v1533_v50 = vpop.f32.mrf.mxu1 }
 0x31d   : > { %v1919_v46 = vpop.f32.mrf.mxu3  ;;  %v1534_v45 = vadd.f32 %v1533_v50, %v5195_v10  ;;  %v2222_v10 = vrot.slane %v5127_v61, 2  ;;  %v3014_v61 = vld [vmem:[%s5476_s1 + $0x88] sm:$0xff] }
 0x31e   : > { %v1940_v56 = vadd.f32 %v1914_v43, %v1708_v41  ;;  %v2693_v43 = vshll.u32 %v2607_v42, 16  ;;  %3087 = vperm.xlu2 %4380, %v3011_v4   ;;  %v2224_v42 = vrot.slane %v5160_v7, 2 }
 0x31f   : > { %2321 = vmatmul.bf16.gmra.mxu1 %v2221_v55  ;;  %v2223_v33 = vsel %vm2206_vm1, %v2220_v1, %v2222_v10  ;;  %v2428_v1 = vunpack.c.l.b16 %v2373_v6 }
 0x320   : > { %2553 = vmatmul.bf16.gmra.mxu2 %v2453_v20  ;;  %v2162_v47 = vpop.f32.mrf.mxu0  ;;  %v5384_v44 = vadd.f32 %v5338_v59, %v1940_v56  ;;  %v2695_v18 = vrot.slane %v2693_v43, 3 }
 0x321   : > { %v2438_v55 = vpack.c.b16 %v2428_v1, %v2428_v1 }
 0x322   : > { %2798 = vmatmul.bf16.gmra.mxu3 %v2688_v28  ;;  %v2696_v26 = vor.u32 %v2695_v18, %v2692_v16  ;;  %v3018_v16 = vpop.permute.xlu0 %3017 }
 0x323   : > { %v1685_v62 = vpop.f32.mrf.mxu2  ;;  %2968 = vmatmul.bf16.gmra.mxu0 %v2865_v29  ;;  %v2456_v51 = vrot.slane %v2438_v55, 2 }
 0x324   : > { %v1709_v22 = vadd.f32 %v1685_v62, %v1534_v45  ;;  %v1535_v17 = vpop.f32.mrf.mxu1 }
 0x325   : > { %v1922_v23 = vpop.f32.mrf.mxu3  ;;  %v1536_v24 = vadd.f32 %v1535_v17, %v5202_v38  ;;  %v2457_v43 = vsel %vm2206_vm1, %v2454_v27, %v2456_v51 }
 0x326   : > { %v1941_v52 = vadd.f32 %v1917_v9, %v1709_v22  ;;  %3102 = vperm.xlu2 %4380, %v3014_v61  }
 0x328   : > { %v2164_v59 = vpop.f32.mrf.mxu0  ;;  %v5390_v30 = vadd.f32 %v2157_v12, %v1941_v52  ;;  %v2697_v12 = vsel %vm2608_vm15, %v2687_v35, %v2696_v26 }
 0x32b   : > { %v1687_v37 = vpop.f32.mrf.mxu2 }
 0x32c   : > { %v1710_v31 = vadd.f32 %v1687_v37, %v1536_v24  ;;  %v1538_v15 = vpop.f32.mrf.mxu1 }
 0x32d   : > { %v1924_v9 = vpop.f32.mrf.mxu3  ;;  %v1539_v57 = vadd.f32 %v1538_v15, %v5152_v25  ;;  %v2225_v25 = vsel %vm2206_vm1, %v2222_v10, %v2224_v42 }
 0x32e   : > { %v1942_v36 = vadd.f32 %v1919_v46, %v1710_v31 }
 0x32f   : > { %2326 = vmatmul.bf16.gmra.mxu1 %v2223_v33 }
 0x330   : > { %2558 = vmatmul.bf16.gmra.mxu2 %v2455_v2  ;;  %v2934_v38 = vpop.f32.mrf.mxu0  ;;  %v5402_v21 = vadd.f32 %v2159_v60, %v1942_v36 }
 0x332   : > { %2803 = vmatmul.bf16.gmra.mxu3 %v2697_v12 }
 0x333   : > { %v1690_v41 = vpop.f32.mrf.mxu2  ;;  %2973 = vmatmul.bf16.gmra.mxu0 %v2867_v13 }
 0x334   : > { %v1711_v35 = vadd.f32 %v1690_v41, %v1539_v57  ;;  %v1540_v50 = vpop.f32.mrf.mxu1  ;;  %v3028_v41 = vpop.permute.xlu1 %3027 }
 0x335   : > { %v2764_v46 = vpop.f32.mrf.mxu3  ;;  %v1541_v60 = vadd.f32 %v1540_v50, %v5177_v48 }
 0x336   : > { %v1943_v20 = vadd.f32 %v1922_v23, %v1711_v35 }
 0x338   : > { %v2936_v56 = vpop.f32.mrf.mxu0  ;;  %v5405_v28 = vadd.f32 %v2162_v47, %v1943_v20 }
 0x33b   : > { %v1692_v8 = vpop.f32.mrf.mxu2 }
 0x33c   : > { %v1712_v29 = vadd.f32 %v1692_v8, %v1541_v60  ;;  %v2292_v32 = vpop.f32.mrf.mxu1 }
 0x33d   : > { %v2766_v45 = vpop.f32.mrf.mxu3  ;;  %v2337_v47 = vadd.f32 %v2292_v32, %v5220_v54 }
 0x33e   : > { %v1944_v62 = vadd.f32 %v1924_v9, %v1712_v29 }
 0x33f   : > { %2331 = vmatmul.bf16.gmra.mxu1 %v2225_v25 }
 0x340   : > { %2563 = vmatmul.bf16.gmra.mxu2 %v2457_v43  ;;  %v2939_v22 = vpop.f32.mrf.mxu0  ;;  %v5411_v23 = vadd.f32 %v2164_v59, %v1944_v62  ;;  %v3023_v59 = vpop.permute.xlu0 %3022 }
 0x343   : > { %v2524_v7 = vpop.f32.mrf.mxu2 }
 0x344   : > { %v2569_v17 = vadd.f32 %v2524_v7, %v2337_v47  ;;  %v2294_v48 = vpop.f32.mrf.mxu1 }
 0x345   : > { %v2769_v52 = vpop.f32.mrf.mxu3  ;;  %v2338_v24 = vadd.f32 %v2294_v48, %v5237_v58 }
 0x346   : > { %v2809_v18 = vadd.f32 %v2764_v46, %v2569_v17  ;;  %v3033_v17 = vpop.permute.xlu1 %3032 }
 0x348   : > { %v2941_v4 = vpop.f32.mrf.mxu0  ;;  %v2979_v10 = vadd.f32 %v2934_v38, %v2809_v18 }
 0x34a   : > { %v3105_v9 = vmul.f32 %v3018_v16, %v2979_v10 }
 0x34b   : > { %v2526_v26 = vpop.f32.mrf.mxu2 }
 0x34c   : > { %v2570_v27 = vadd.f32 %v2526_v26, %v2338_v24  ;;  %v2297_v31 = vpop.f32.mrf.mxu1  ;;  %v3142_v54 = vrot.slane %v3105_v9, 7  ;;  %v3256_v12 = vmul.f32 %v3105_v9, %v3105_v9 }
 0x34d   : > { %v2771_v37 = vpop.f32.mrf.mxu3  ;;  %v2339_v2 = vadd.f32 %v2297_v31, %v5245_v14 }
 0x34e   : > { %v2810_v40 = vadd.f32 %v2766_v45, %v2570_v27  ;;  %v3195_v35 = vsel %vm904_vm2, 0.0, %v3142_v54 }
 0x350   : > { %v2980_v15 = vadd.f32 %v2936_v56, %v2810_v40  ;;  %v2944_v33 = vpop.f32.mrf.mxu0 }
 0x352   : > { %v3106_v36 = vmul.f32 %v3023_v59, %v2980_v15 }
 0x353   : > { %v2529_v6 = vpop.f32.mrf.mxu2 }
 0x354   : > { %v3143_v61 = vrot.slane %v3106_v36, 7  ;;  %v3232_v13 = vadd.f32 %v3106_v36, %v3105_v9  ;;  %v3257_v58 = vmul.f32 %v3106_v36, %v3106_v36  ;;  %v2571_v38 = vadd.f32 %v2529_v6, %v2339_v2  ;;  %v2299_v57 = vpop.f32.mrf.mxu1  ;;  %v3038_v9 = vpop.permute.xlu2 %3037 }
 0x355   : > { %v2774_v1 = vpop.f32.mrf.mxu3  ;;  %v2340_v42 = vadd.f32 %v2299_v57, %v5259_v49 }
 0x356   : > { %v3144_v46 = vsel %vm904_vm2, %v3142_v54, %v3143_v61  ;;  %v3274_v50 = vadd.f32 %v3257_v58, %v3256_v12  ;;  %v2811_v55 = vadd.f32 %v2769_v52, %v2571_v38 }
 0x357   : > { %v4231_v20 = vpack.c.bf16 %v3144_v46, %v3195_v35 }
 0x358   : > { %v2981_v56 = vadd.f32 %v2939_v22, %v2811_v55  ;;  %v2946_v14 = vpop.f32.mrf.mxu0 }
 0x359   : > { %4232 = vst [vmem:[%s4549_s25] sm:$0xff] %v4231_v20  }
 0x35a   : > { %v3107_v51 = vmul.f32 %v3028_v41, %v2981_v56 }
 0x35b   : > { %v2531_v60 = vpop.f32.mrf.mxu2 }
 0x35c   : > { %v3145_v8 = vrot.slane %v3107_v51, 7  ;;  %v3233_v29 = vadd.f32 %v3232_v13, %v3107_v51  ;;  %v3258_v45 = vmul.f32 %v3107_v51, %v3107_v51  ;;  %v2572_v32 = vadd.f32 %v2531_v60, %v2340_v42  ;;  %v2302_v43 = vpop.f32.mrf.mxu1  ;;  %v3043_v46 = vpop.permute.xlu2 %3042 }
 0x35d   : > { %v2776_v25 = vpop.f32.mrf.mxu3  ;;  %v2341_v22 = vadd.f32 %v2302_v43, %v5264_v5 }
 0x35e   : > { %v3146_v62 = vsel %vm904_vm2, %v3143_v61, %v3145_v8  ;;  %v3275_v47 = vadd.f32 %v3274_v50, %v3258_v45  ;;  %v2812_v7 = vadd.f32 %v2771_v37, %v2572_v32 }
 0x360   : > { %v2982_v52 = vadd.f32 %v2941_v4, %v2812_v7  ;;  %v2949_v48 = vpop.f32.mrf.mxu0 }
 0x362   : > { %v3108_v16 = vmul.f32 %v3033_v17, %v2982_v52 }
 0x363   : > { %v2534_v49 = vpop.f32.mrf.mxu2 }
 0x364   : > { %v3147_v18 = vrot.slane %v3108_v16, 7  ;;  %v3234_v24 = vadd.f32 %v3233_v29, %v3108_v16  ;;  %v3259_v10 = vmul.f32 %v3108_v16, %v3108_v16  ;;  %v2573_v26 = vadd.f32 %v2534_v49, %v2341_v22  ;;  %v2304_v31 = vpop.f32.mrf.mxu1 }
 0x365   : > { %v2779_v27 = vpop.f32.mrf.mxu3  ;;  %v2342_v4 = vadd.f32 %v2304_v31, %v5276_v11 }
 0x366   : > { %v3148_v40 = vsel %vm904_vm2, %v3145_v8, %v3147_v18  ;;  %v3276_v59 = vadd.f32 %v3275_v47, %v3259_v10  ;;  %v2813_v15 = vadd.f32 %v2774_v1, %v2573_v26  ;;  %v3053_v26 = vpop.permute.xlu1 %3052 }
 0x367   : > { %v4236_v37 = vpack.c.bf16 %v3148_v40, %v3146_v62 }
 0x368   : > { %v2983_v54 = vadd.f32 %v2944_v33, %v2813_v15  ;;  %v2951_v36 = vpop.f32.mrf.mxu0 }
 0x369   : > { %4284 = vst [vmem:[%s4549_s25 + $0x8] sm:$0xff] %v4236_v37  }
 0x36a   : > { %v3109_v2 = vmul.f32 %v3038_v9, %v2983_v54 }
 0x36b   : > { %v2536_v5 = vpop.f32.mrf.mxu2 }
 0x36c   : > { %v3149_v12 = vrot.slane %v3109_v2, 7  ;;  %v3235_v6 = vadd.f32 %v3234_v24, %v3109_v2  ;;  %v3260_v61 = vmul.f32 %v3109_v2, %v3109_v2  ;;  %v2574_v13 = vadd.f32 %v2536_v5, %v2342_v4  ;;  %v2307_v38 = vpop.f32.mrf.mxu1 }
 0x36d   : > { %v2781_v58 = vpop.f32.mrf.mxu3  ;;  %v2343_v33 = vadd.f32 %v2307_v38, %v5284_v19 }
 0x36e   : > { %v3150_v57 = vsel %vm904_vm2, %v3147_v18, %v3149_v12  ;;  %v3277_v41 = vadd.f32 %v3276_v59, %v3260_v61  ;;  %v2814_v35 = vadd.f32 %v2776_v25, %v2574_v13  ;;  %v3048_v25 = vpop.permute.xlu0 %3047 }
 0x370   : > { %v2984_v1 = vadd.f32 %v2946_v14, %v2814_v35  ;;  %v2954_v8 = vpop.f32.mrf.mxu0 }
 0x372   : > { %v3110_v50 = vmul.f32 %v3043_v46, %v2984_v1 }
 0x373   : > { %v2539_v11 = vpop.f32.mrf.mxu2 }
 0x374   : > { %v3151_v55 = vrot.slane %v3110_v50, 7  ;;  %v3236_v20 = vadd.f32 %v3235_v6, %v3110_v50  ;;  %v3261_v56 = vmul.f32 %v3110_v50, %v3110_v50  ;;  %v2575_v42 = vadd.f32 %v2539_v11, %v2343_v33  ;;  %v2309_v60 = vpop.f32.mrf.mxu1  ;;  %v3058_v6 = vpop.permute.xlu2 %3057 }
 0x375   : > { %v2784_v51 = vpop.f32.mrf.mxu3  ;;  %v2344_v19 = vadd.f32 %v2309_v60, %v5302_v39 }
 0x376   : > { %v3152_v29 = vsel %vm904_vm2, %v3149_v12, %v3151_v55  ;;  %v3278_v45 = vadd.f32 %v3277_v41, %v3261_v56  ;;  %v2815_v32 = vadd.f32 %v2779_v27, %v2575_v42 }
 0x377   : > { %v4241_v43 = vpack.c.bf16 %v3152_v29, %v3150_v57 }
 0x378   : > { %v2985_v62 = vadd.f32 %v2949_v48, %v2815_v32  ;;  %v2956_v27 = vpop.f32.mrf.mxu0 }
 0x379   : > { %4285 = vst [vmem:[%s4549_s25 + $0x10] sm:$0xff] %v4241_v43  }
 0x37a   : > { %v3111_v14 = vmul.f32 %v3048_v25, %v2985_v62 }
 0x37b   : > { %v2541_v47 = vpop.f32.mrf.mxu2 }
 0x37c   : > { %v3153_v7 = vrot.slane %v3111_v14, 7  ;;  %v3237_v17 = vadd.f32 %v3236_v20, %v3111_v14  ;;  %v3262_v52 = vmul.f32 %v3111_v14, %v3111_v14  ;;  %v2576_v22 = vadd.f32 %v2541_v47, %v2344_v19  ;;  %v2312_v16 = vpop.f32.mrf.mxu1 }
 0x37d   : > { %v2786_v49 = vpop.f32.mrf.mxu3  ;;  %v2345_v48 = vadd.f32 %v2312_v16, %v5312_v53 }
 0x37e   : > { %v3154_v18 = vsel %vm904_vm2, %v3151_v55, %v3153_v7  ;;  %v3279_v24 = vadd.f32 %v3278_v45, %v3262_v52  ;;  %v2816_v10 = vadd.f32 %v2781_v58, %v2576_v22  ;;  %v3063_v55 = vpop.permute.xlu0 %3062 }
 0x380   : > { %v2986_v31 = vadd.f32 %v2951_v36, %v2816_v10  ;;  %v2959_v36 = vpop.f32.mrf.mxu0 }
 0x382   : > { %v3112_v9 = vmul.f32 %v3053_v26, %v2986_v31 }
 0x383   : > { %v2544_v39 = vpop.f32.mrf.mxu2 }
 0x384   : > { %v3155_v40 = vrot.slane %v3112_v9, 7  ;;  %v3238_v59 = vadd.f32 %v3237_v17, %v3112_v9  ;;  %v3263_v15 = vmul.f32 %v3112_v9, %v3112_v9  ;;  %v2577_v37 = vadd.f32 %v2544_v39, %v2345_v48  ;;  %v2314_v54 = vpop.f32.mrf.mxu1  ;;  %v3073_v39 = vpop.permute.xlu2 %3072 }
 0x385   : > { %v2789_v61 = vpop.f32.mrf.mxu3  ;;  %v2346_v58 = vadd.f32 %v2314_v54, %v5327_v0 }
 0x386   : > { %v3156_v4 = vsel %vm904_vm2, %v3153_v7, %v3155_v40  ;;  %v3280_v2 = vadd.f32 %v3279_v24, %v3263_v15  ;;  %v2817_v5 = vadd.f32 %v2784_v51, %v2577_v37  ;;  %v3068_v7 = vpop.permute.xlu1 %3067 }
 0x387   : > { %v4246_v12 = vpack.c.bf16 %v3156_v4, %v3154_v18 }
 0x388   : > { %v2987_v13 = vadd.f32 %v2954_v8, %v2817_v5  ;;  %v2961_v0 = vpop.f32.mrf.mxu0 }
 0x389   : > { %4286 = vst [vmem:[%s4549_s25 + $0x18] sm:$0xff] %v4246_v12  }
 0x38a   : > { %v3113_v53 = vmul.f32 %v3058_v6, %v2987_v13 }
 0x38b   : > { %v2546_v38 = vpop.f32.mrf.mxu2 }
 0x38c   : > { %v3157_v57 = vrot.slane %v3113_v53, 7  ;;  %v3239_v41 = vadd.f32 %v3238_v59, %v3113_v53  ;;  %v3264_v35 = vmul.f32 %v3113_v53, %v3113_v53  ;;  %v2578_v46 = vadd.f32 %v2546_v38, %v2346_v58  ;;  %v2317_v1 = vpop.f32.mrf.mxu1  ;;  %v3078_v53 = vpop.permute.xlu0 %3077 }
 0x38d   : > { %v2791_v56 = vpop.f32.mrf.mxu3  ;;  %v2347_v42 = vadd.f32 %v2317_v1, %v5340_v3 }
 0x38e   : > { %v3158_v33 = vsel %vm904_vm2, %v3155_v40, %v3157_v57  ;;  %v3281_v50 = vadd.f32 %v3280_v2, %v3264_v35  ;;  %v2818_v11 = vadd.f32 %v2786_v49, %v2578_v46 }
 0x390   : > { %v2988_v20 = vadd.f32 %v2956_v27, %v2818_v11  ;;  %v2964_v26 = vpop.f32.mrf.mxu0 }
 0x392   : > { %v3114_v51 = vmul.f32 %v3063_v55, %v2988_v20 }
 0x393   : > { %v2549_v60 = vpop.f32.mrf.mxu2 }
 0x394   : > { %v3159_v8 = vrot.slane %v3114_v51, 7  ;;  %v3240_v29 = vadd.f32 %v3239_v41, %v3114_v51  ;;  %v3265_v45 = vmul.f32 %v3114_v51, %v3114_v51  ;;  %v2579_v32 = vadd.f32 %v2549_v60, %v2347_v42  ;;  %v2319_v43 = vpop.f32.mrf.mxu1  ;;  %v3083_v42 = vpop.permute.xlu1 %3082 }
 0x395   : > { %v2348_v17 = vadd.f32 %v2319_v43, %v5362_v63  ;;  %v2794_v22 = vpop.f32.mrf.mxu3 }
 0x396   : > { %v3160_v25 = vsel %vm904_vm2, %v3157_v57, %v3159_v8  ;;  %v3282_v62 = vadd.f32 %v3281_v50, %v3265_v45  ;;  %v2819_v19 = vadd.f32 %v2789_v61, %v2579_v32 }
 0x397   : > { %v4251_v14 = vpack.c.bf16 %v3160_v25, %v3158_v33 }
 0x398   : > { %v2989_v47 = vadd.f32 %v2959_v36, %v2819_v19  ;;  %v2966_v36 = vpop.f32.mrf.mxu0 }
 0x399   : > { %4287 = vst [vmem:[%s4549_s25 + $0x20] sm:$0xff] %v4251_v14  }
 0x39a   : > { %v3115_v52 = vmul.f32 %v3068_v7, %v2989_v47  ;;  %v3088_v7 = vpop.permute.xlu2 %3087 }
 0x39b   : > { %v2551_v3 = vpop.f32.mrf.mxu2 }
 0x39c   : > { %v3161_v16 = vrot.slane %v3115_v52, 7  ;;  %v3241_v49 = vadd.f32 %v3240_v29, %v3115_v52  ;;  %v3266_v18 = vmul.f32 %v3115_v52, %v3115_v52  ;;  %v2580_v24 = vadd.f32 %v2551_v3, %v2348_v17  ;;  %v2322_v10 = vpop.f32.mrf.mxu1 }
 0x39d   : > { %v2349_v59 = vadd.f32 %v2322_v10, %v5370_v34  ;;  %v2796_v5 = vpop.f32.mrf.mxu3 }
 0x39e   : > { %v3162_v27 = vsel %vm904_vm2, %v3159_v8, %v3161_v16  ;;  %v3283_v31 = vadd.f32 %v3282_v62, %v3266_v18  ;;  %v2820_v48 = vadd.f32 %v2791_v56, %v2580_v24 }
 0x3a0   : > { %v2990_v9 = vadd.f32 %v2961_v0, %v2820_v48  ;;  %v2969_v51 = vpop.f32.mrf.mxu0 }
 0x3a2   : > { %v3116_v40 = vmul.f32 %v3073_v39, %v2990_v9  ;;  %v3093_v9 = vpop.permute.xlu0 %3092 }
 0x3a3   : > { %v2554_v63 = vpop.f32.mrf.mxu2 }
 0x3a4   : > { %v3163_v15 = vrot.slane %v3116_v40, 7  ;;  %v3242_v37 = vadd.f32 %v3241_v49, %v3116_v40  ;;  %v3267_v54 = vmul.f32 %v3116_v40, %v3116_v40  ;;  %v2581_v4 = vadd.f32 %v2554_v63, %v2349_v59  ;;  %v2324_v2 = vpop.f32.mrf.mxu1 }
 0x3a5   : > { %v2350_v57 = vadd.f32 %v2324_v2, %v5384_v44  ;;  %v2799_v20 = vpop.f32.mrf.mxu3 }
 0x3a6   : > { %v3164_v12 = vsel %vm904_vm2, %v3161_v16, %v3163_v15  ;;  %v3284_v6 = vadd.f32 %v3283_v31, %v3267_v54  ;;  %v2821_v61 = vadd.f32 %v2794_v22, %v2581_v4 }
 0x3a7   : > { %v4256_v13 = vpack.c.bf16 %v3164_v12, %v3162_v27 }
 0x3a8   : > { %v2991_v58 = vadd.f32 %v2964_v26, %v2821_v61  ;;  %v2971_v22 = vpop.f32.mrf.mxu0 }
 0x3a9   : > { %4288 = vst [vmem:[%s4549_s25 + $0x28] sm:$0xff] %v4256_v13  }
 0x3aa   : > { %v3117_v38 = vmul.f32 %v3078_v53, %v2991_v58 }
 0x3ab   : > { %v2556_v34 = vpop.f32.mrf.mxu2 }
 0x3ac   : > { %v3165_v41 = vrot.slane %v3117_v38, 7  ;;  %v3243_v35 = vadd.f32 %v3242_v37, %v3117_v38  ;;  %v3268_v46 = vmul.f32 %v3117_v38, %v3117_v38  ;;  %v2582_v1 = vadd.f32 %v2556_v34, %v2350_v57  ;;  %v2327_v33 = vpop.f32.mrf.mxu1 }
 0x3ad   : > { %v2351_v0 = vadd.f32 %v2327_v33, %v5390_v30  ;;  %v2801_v17 = vpop.f32.mrf.mxu3 }
 0x3ae   : > { %v3166_v50 = vsel %vm904_vm2, %v3163_v15, %v3165_v41  ;;  %v3285_v11 = vadd.f32 %v3284_v6, %v3268_v46  ;;  %v2822_v55 = vadd.f32 %v2796_v5, %v2582_v1 }
 0x3b0   : > { %v2992_v56 = vadd.f32 %v2966_v36, %v2822_v55  ;;  %v2974_v4 = vpop.f32.mrf.mxu0  ;;  %v3098_v36 = vpop.permute.xlu1 %3097 }
 0x3b1   : > { %v3103_v55 = vpop.permute.xlu2 %3102 }
 0x3b2   : > { %v3118_v60 = vmul.f32 %v3083_v42, %v2992_v56 }
 0x3b3   : > { %v2559_v8 = vpop.f32.mrf.mxu2 }
 0x3b4   : > { %v3167_v44 = vrot.slane %v3118_v60, 7  ;;  %v3244_v29 = vadd.f32 %v3243_v35, %v3118_v60  ;;  %v3269_v45 = vmul.f32 %v3118_v60, %v3118_v60  ;;  %v2583_v32 = vadd.f32 %v2559_v8, %v2351_v0  ;;  %v2329_v43 = vpop.f32.mrf.mxu1 }
 0x3b5   : > { %v2352_v3 = vadd.f32 %v2329_v43, %v5402_v21  ;;  %v2804_v59 = vpop.f32.mrf.mxu3 }
 0x3b6   : > { %v3168_v25 = vsel %vm904_vm2, %v3165_v41, %v3167_v44  ;;  %v3286_v62 = vadd.f32 %v3285_v11, %v3269_v45  ;;  %v2823_v19 = vadd.f32 %v2799_v20, %v2583_v32 }
 0x3b7   : > { %v4261_v14 = vpack.c.bf16 %v3168_v25, %v3166_v50 }
 0x3b8   : > { %v2993_v47 = vadd.f32 %v2969_v51, %v2823_v19  ;;  %v2976_v50 = vpop.f32.mrf.mxu0 }
 0x3b9   : > { %4289 = vst [vmem:[%s4549_s25 + $0x30] sm:$0xff] %v4261_v14  }
 0x3ba   : > { %v3119_v52 = vmul.f32 %v3088_v7, %v2993_v47 }
 0x3bb   : > { %v2561_v30 = vpop.f32.mrf.mxu2 }
 0x3bc   : > { %v3169_v16 = vrot.slane %v3119_v52, 7  ;;  %v3245_v49 = vadd.f32 %v3244_v29, %v3119_v52  ;;  %v3270_v18 = vmul.f32 %v3119_v52, %v3119_v52  ;;  %v2584_v24 = vadd.f32 %v2561_v30, %v2352_v3  ;;  %v2332_v10 = vpop.f32.mrf.mxu1 }
 0x3bd   : > { %v2353_v40 = vadd.f32 %v2332_v10, %v5405_v28  ;;  %v2806_v35 = vpop.f32.mrf.mxu3 }
 0x3be   : > { %v3170_v26 = vsel %vm904_vm2, %v3167_v44, %v3169_v16  ;;  %v3287_v27 = vadd.f32 %v3286_v62, %v3270_v18  ;;  %v2824_v31 = vadd.f32 %v2801_v17, %v2584_v24 }
 0x3c0   : > { %v2994_v48 = vadd.f32 %v2971_v22, %v2824_v31 }
 0x3c2   : > { %v3120_v39 = vmul.f32 %v3093_v9, %v2994_v48 }
 0x3c3   : > { %v2564_v63 = vpop.f32.mrf.mxu2 }
 0x3c4   : > { %v3171_v21 = vrot.slane %v3120_v39, 7  ;;  %v3246_v15 = vadd.f32 %v3245_v49, %v3120_v39  ;;  %v3271_v37 = vmul.f32 %v3120_v39, %v3120_v39  ;;  %v2585_v54 = vadd.f32 %v2564_v63, %v2353_v40  ;;  %v2334_v61 = vpop.f32.mrf.mxu1 }
 0x3c5   : > { %v2354_v53 = vadd.f32 %v2334_v61, %v5411_v23 }
 0x3c6   : > { %v3172_v2 = vsel %vm904_vm2, %v3169_v16, %v3171_v21  ;;  %v3288_v5 = vadd.f32 %v3287_v27, %v3271_v37  ;;  %v2825_v12 = vadd.f32 %v2804_v59, %v2585_v54 }
 0x3c7   : > { %v4266_v6 = vpack.c.bf16 %v3172_v2, %v3170_v26 }
 0x3c8   : > { %v2995_v13 = vadd.f32 %v2974_v4, %v2825_v12 }
 0x3c9   : > { %4290 = vst [vmem:[%s4549_s25 + $0x38] sm:$0xff] %v4266_v6  }
 0x3ca   : > { %v3121_v58 = vmul.f32 %v3098_v36, %v2995_v13 }
 0x3cb   : > { %v2566_v28 = vpop.f32.mrf.mxu2 }
 0x3cc   : > { %v3173_v38 = vrot.slane %v3121_v58, 7  ;;  %v3247_v57 = vadd.f32 %v3246_v15, %v3121_v58  ;;  %v3272_v34 = vmul.f32 %v3121_v58, %v3121_v58  ;;  %v2586_v41 = vadd.f32 %v2566_v28, %v2354_v53 }
 0x3ce   : > { %v3174_v46 = vsel %vm904_vm2, %v3171_v21, %v3173_v38  ;;  %v3289_v1 = vadd.f32 %v3288_v5, %v3272_v34  ;;  %v2826_v33 = vadd.f32 %v2806_v35, %v2586_v41 }
 0x3d0   : > { %v2996_v11 = vadd.f32 %v2976_v50, %v2826_v33 }
 0x3d2   : > { %v3122_v20 = vmul.f32 %v3103_v55, %v2996_v11 }
 0x3d4   : > { %v3175_v56 = vrot.slane %v3122_v20, 7  ;;  %v3248_v42 = vadd.f32 %v3247_v57, %v3122_v20  ;;  %v3273_v51 = vmul.f32 %v3122_v20, %v3122_v20 }
 0x3d6   : > { %v3176_v23 = vsel %vm904_vm2, %v3173_v38, %v3175_v56  ;;  %v3249_v60 = vrot.slane %v3248_v42, 4  ;;  %v3290_v0 = vadd.f32 %v3289_v1, %v3273_v51 }
 0x3d7   : > { %v4271_v8 = vpack.c.bf16 %v3176_v23, %v3174_v46 }
 0x3d8   : > { %v3250_v44 = vadd.f32 %v3249_v60, %v3248_v42  ;;  %v3291_v29 = vrot.slane %v3290_v0, 4 }
 0x3d9   : > { %4291 = vst [vmem:[%s4549_s25 + $0x40] sm:$0xff] %v4271_v8  }
 0x3da   : > { %v3251_v45 = vrot.slane %v3250_v44, 2  ;;  %v3292_v32 = vadd.f32 %v3291_v29, %v3290_v0 }
 0x3dc   : > { %v3252_v43 = vadd.f32 %v3251_v45, %v3250_v44  ;;  %v3293_v25 = vrot.slane %v3292_v32, 2 }
 0x3de   : > { %v3253_v62 = vrot.slane %v3252_v43, 1  ;;  %v3294_v19 = vadd.f32 %v3293_v25, %v3292_v32 }
 0x3e0   : > { %v3254_v14 = vadd.f32 %v3253_v62, %v3252_v43  ;;  %v3295_v47 = vrot.slane %v3294_v19, 1 }
 0x3e2   : > { %3255 = vst [vmem:[%s4571_s12] sm:$0x1] %v3254_v14  ;;  %v3296_v7 = vadd.f32 %v3295_v47, %v3294_v19 }
 0x3e4   : > { %3297 = vst [vmem:[%s4571_s12 + $0x1] sm:$0x1] %v3296_v7 }
 0x3e5 PF: > { %s20_s13 = sadd.s32 1, %s4419_s13   ;;  %s5499_s30 = sld [smem:[#allocation3_spill]] }
 0x3e6   : > { %p17_p1 = scmp.ge.s32.totalorder %s20_s13, 6   ;;  %s5500_s10 = sld [smem:[#allocation4_spill]] }
 0x3e7   : > { %s5501_s11 = sld [smem:[#allocation5_spill]] }
 0x3e8   : > { %s5502_s12 = sld [smem:[#allocation6_spill]]  ;;  %19 = sbr.rel (!%p17_p1) target bundleno = 4 (0x4), region = 133 }

</bundles_post_ra>
